<compile_context>
chip_gen: v6e
topology: v6e:2x2x1
jax: 0.10.0
libtpu: 0.0.40
codegen_flags: <defaults>
</compile_context>

<pallas_src>
import functools
import math

import jax
import jax.numpy as jnp
from jax import lax
from jax.experimental import pallas as pl
from jax.experimental.pallas import tpu as pltpu


def _round_up(x, m):
    return (x + m - 1) // m * m


# --------------------------------------------------------------------------
# in-kernel helpers
# --------------------------------------------------------------------------
def _apply_act(y, act):
    if act == "relu":
        return jnp.maximum(y, 0.0)
    if act == "sigmoid":
        # exp and approx reciprocal both run on the EUP slot (frees VALU).
        return pl.reciprocal(1.0 + jnp.exp(-y), approx=True)
    if act == "tanh":
        return jnp.tanh(y)
    return y


# --------------------------------------------------------------------------
# fused pair kernels
# --------------------------------------------------------------------------
def _conv_convt_kernel(xp_ref, w1_ref, b1_ref, wp_ref, b2_ref, o_ref, pmid,
                       *, H, W, act):
    """(Conv3x3 s1 p1 + ReLU) -> (ConvTranspose3x3 s2 p1 op1 + act), fused.

    xp_ref : (BT, H+2, W+2, Cin)   wrapper-pre-padded input tile
    w1_ref : (9*Cin, Cmid)  bf16   im2col conv weight, rows ordered (kh,kw,cin)
    b1_ref : (1, Cmid)      f32
    wp_ref : (4*Cmid, 4*Cout) bf16 4 sub-pixel phases merged column-wise
    b2_ref : (1, 4*Cout)    f32    convT bias tiled over the 4 phases
    o_ref  : (BT*H*W, 4*Cout) f32  lane-dense phase-major output
    pmid   : (BT, H+1, Wp, Cmid)   f32 scratch; right/bottom border stays zero
    """
    BT = xp_ref.shape[0]
    Cin = xp_ref.shape[3]
    Cmid = w1_ref.shape[1]
    Wp = pmid.shape[2]
    M = BT * H * W

    # Zero only the 1-px read border (row H, cols >= W); the interior is fully
    # overwritten below.  Cheap and correct regardless of grid/core split.
    pmid[:, H:H + 1, :, :] = jnp.zeros((BT, 1, Wp, Cmid), pmid.dtype)
    pmid[:, 0:H, W:Wp, :] = jnp.zeros((BT, H, Wp - W, Cmid), pmid.dtype)

    # ---- layer 1: 3x3 conv + ReLU as ONE K = 9*Cin bf16 matmul -----------
    taps = [xp_ref[:, kh:kh + H, kw:kw + W, :].reshape(M, Cin)
            for kh in range(3) for kw in range(3)]
    patches = jnp.concatenate(taps, axis=1).astype(jnp.bfloat16)   # (M, 9*Cin)
    y1 = jnp.dot(patches, w1_ref[...], preferred_element_type=jnp.float32)
    y1 = jnp.maximum(y1 + b1_ref[...], 0.0)

    pmid[:, 0:H, 0:W, :] = y1.reshape(BT, H, W, Cmid)

    # ---- layer 2: stride-2 convT, all 4 sub-pixel phases in ONE matmul ----
    t = [pmid[:, th:th + H, tw:tw + W, :].reshape(M, Cmid)
         for th in (0, 1) for tw in (0, 1)]
    p2 = jnp.concatenate(t, axis=1).astype(jnp.bfloat16)           # (M, 4*Cmid)
    y2 = jnp.dot(p2, wp_ref[...], preferred_element_type=jnp.float32)
    o_ref[...] = _apply_act(y2 + b2_ref[...], act)


def _conv_conv_kernel(xp_ref, w1_ref, b1_ref, w2_ref, b2_ref, o_ref, pmid,
                      *, H, W, act):
    """Conv3x3+ReLU -> Conv3x3+act (upsampling_num == 0 branch)."""
    BT = xp_ref.shape[0]
    Cin = xp_ref.shape[3]
    Cmid = w1_ref.shape[1]
    Wp = pmid.shape[2]
    M = BT * H * W

    # zero the 1-px ring (read border); interior [1:H+1, 1:W+1] is overwritten
    pmid[:, 0:1, :, :] = jnp.zeros((BT, 1, Wp, Cmid), pmid.dtype)
    pmid[:, H + 1:H + 2, :, :] = jnp.zeros((BT, 1, Wp, Cmid), pmid.dtype)
    pmid[:, 1:H + 1, 0:1, :] = jnp.zeros((BT, H, 1, Cmid), pmid.dtype)
    pmid[:, 1:H + 1, W + 1:Wp, :] = jnp.zeros((BT, H, Wp - W - 1, Cmid),
                                              pmid.dtype)

    taps = [xp_ref[:, kh:kh + H, kw:kw + W, :].reshape(M, Cin)
            for kh in range(3) for kw in range(3)]
    patches = jnp.concatenate(taps, axis=1).astype(jnp.bfloat16)
    y1 = jnp.dot(patches, w1_ref[...], preferred_element_type=jnp.float32)
    y1 = jnp.maximum(y1 + b1_ref[...], 0.0)
    pmid[:, 1:H + 1, 1:W + 1, :] = y1.reshape(BT, H, W, Cmid)

    t = [pmid[:, kh:kh + H, kw:kw + W, :].reshape(M, Cmid)
         for kh in range(3) for kw in range(3)]
    p2 = jnp.concatenate(t, axis=1).astype(jnp.bfloat16)
    y2 = jnp.dot(p2, w2_ref[...], preferred_element_type=jnp.float32)
    o_ref[...] = _apply_act(y2 + b2_ref[...], act)


# --------------------------------------------------------------------------
# weight preparation (wrapper side, tiny)
# --------------------------------------------------------------------------
def _conv_w_im2col(w_oihw):
    """(Cout, Cin, 3, 3) -> (9*Cin, Cout), rows ordered (kh, kw, cin)."""
    Cin, Cout = w_oihw.shape[1], w_oihw.shape[0]
    return jnp.transpose(w_oihw, (2, 3, 1, 0)).reshape(9 * Cin, Cout)


def _convt_w_wide(w_iohw):
    """ConvTranspose2d weight (Cin, Cout, 3, 3) -> (4*Cin, 4*Cout).
    Rows: forward taps x[i+th, j+tw], (th,tw) in (0,0),(0,1),(1,0),(1,1), each
    Cin wide.  Cols: sub-pixel phases (r,c) in the same order, each Cout wide.
    """
    Cin, Cout = w_iohw.shape[0], w_iohw.shape[1]
    # equivalent direct-conv weight on the dilated input: flip + swap in/out
    w_eq = jnp.transpose(jnp.flip(w_iohw, axis=(2, 3)), (2, 3, 0, 1))  # (3,3,Ci,Co)
    z = jnp.zeros((Cin, Cout), w_eq.dtype)
    phase_taps = [
        [w_eq[1, 1], z, z, z],                                  # (r,c)=(0,0)
        [w_eq[1, 0], w_eq[1, 2], z, z],                         # (0,1)
        [w_eq[0, 1], z, w_eq[2, 1], z],                         # (1,0)
        [w_eq[0, 0], w_eq[0, 2], w_eq[2, 0], w_eq[2, 2]],       # (1,1)
    ]
    cols = [jnp.concatenate(t, axis=0) for t in phase_taps]     # (4*Cin, Cout)
    return jnp.concatenate(cols, axis=1)                        # (4*Cin, 4*Cout)


def _pick_batch_tile(B):
    # Keep >= 2 grid steps when possible (both v7x TCs busy) while folding as
    # much batch as possible into the matmul M dimension.
    if B >= 2 and B % 2 == 0:
        return B // 2
    return 1


# --------------------------------------------------------------------------
# pallas_call wrappers
# --------------------------------------------------------------------------
def _conv_convt_pair(x_nhwc, w_conv, b_conv, w_convt, b_convt, act):
    B, H, W, Cin = x_nhwc.shape
    Cmid = w_conv.shape[0]
    Cout = w_convt.shape[1]
    BT = _pick_batch_tile(B)
    n_tiles = B // BT
    Wp = _round_up(W + 1, 8)

    xp = jnp.pad(x_nhwc, ((0, 0), (1, 1), (1, 1), (0, 0)))
    w1 = _conv_w_im2col(w_conv).astype(jnp.bfloat16)
    wp = _convt_w_wide(w_convt).astype(jnp.bfloat16)
    b1 = b_conv.reshape(1, Cmid).astype(jnp.float32)
    b2 = jnp.tile(b_convt.reshape(1, Cout), (1, 4)).astype(jnp.float32)

    kern = functools.partial(_conv_convt_kernel, H=H, W=W, act=act)
    out = pl.pallas_call(
        kern,
        out_shape=jax.ShapeDtypeStruct((B * H * W, 4 * Cout), jnp.float32),
        grid=(n_tiles,),
        in_specs=[
            pl.BlockSpec((BT, H + 2, W + 2, Cin), lambda b: (b, 0, 0, 0)),
            pl.BlockSpec((9 * Cin, Cmid), lambda b: (0, 0)),
            pl.BlockSpec((1, Cmid), lambda b: (0, 0)),
            pl.BlockSpec((4 * Cmid, 4 * Cout), lambda b: (0, 0)),
            pl.BlockSpec((1, 4 * Cout), lambda b: (0, 0)),
        ],
        out_specs=pl.BlockSpec((BT * H * W, 4 * Cout), lambda b: (b, 0)),
        scratch_shapes=[pltpu.VMEM((BT, H + 1, Wp, Cmid), jnp.float32)],
        compiler_params=pltpu.CompilerParams(
            dimension_semantics=("parallel",)),
    )(xp, w1, b1, wp, b2)

    # de-interleave the 4 sub-pixel phases: (B*H*W, 4*Cout) -> (B, 2H, 2W, Cout)
    out = out.reshape(B, H, W, 2, 2, Cout)
    out = jnp.transpose(out, (0, 1, 3, 2, 4, 5)).reshape(B, 2 * H, 2 * W, Cout)
    return out


def _conv_conv_pair(x_nhwc, w1_oihw, b1, w2_oihw, b2, act):
    B, H, W, Cin = x_nhwc.shape
    Cmid = w1_oihw.shape[0]
    Cout = w2_oihw.shape[0]
    BT = _pick_batch_tile(B)
    n_tiles = B // BT
    Wp = _round_up(W + 2, 8)

    xp = jnp.pad(x_nhwc, ((0, 0), (1, 1), (1, 1), (0, 0)))
    w1 = _conv_w_im2col(w1_oihw).astype(jnp.bfloat16)
    w2 = _conv_w_im2col(w2_oihw).astype(jnp.bfloat16)
    b1v = b1.reshape(1, Cmid).astype(jnp.float32)
    b2v = b2.reshape(1, Cout).astype(jnp.float32)

    kern = functools.partial(_conv_conv_kernel, H=H, W=W, act=act)
    out = pl.pallas_call(
        kern,
        out_shape=jax.ShapeDtypeStruct((B * H * W, Cout), jnp.float32),
        grid=(n_tiles,),
        in_specs=[
            pl.BlockSpec((BT, H + 2, W + 2, Cin), lambda b: (b, 0, 0, 0)),
            pl.BlockSpec((9 * Cin, Cmid), lambda b: (0, 0)),
            pl.BlockSpec((1, Cmid), lambda b: (0, 0)),
            pl.BlockSpec((9 * Cmid, Cout), lambda b: (0, 0)),
            pl.BlockSpec((1, Cout), lambda b: (0, 0)),
        ],
        out_specs=pl.BlockSpec((BT * H * W, Cout), lambda b: (b, 0)),
        scratch_shapes=[pltpu.VMEM((BT, H + 2, Wp, Cmid), jnp.float32)],
        compiler_params=pltpu.CompilerParams(
            dimension_semantics=("parallel",)),
    )(xp, w1, b1v, w2, b2v)
    return out.reshape(B, H, W, Cout)


# --------------------------------------------------------------------------
# model: deterministic params + forward
# --------------------------------------------------------------------------
def build_params(key, input_nc, output_nc, input_dim, output_dim,
                 activation="sigmoid"):
    ups = int(math.log2(output_dim // input_dim))
    params = []
    k = key

    def split():
        nonlocal k
        k, sub = jax.random.split(k)
        return sub

    def uni(shape, fan_in):
        bound = 1.0 / math.sqrt(fan_in)
        return jax.random.uniform(split(), shape, jnp.float32, -bound, bound)

    nc = input_nc
    for _ in range(ups - 1):
        co = nc // 2
        params.append(("conv", uni((co, nc, 3, 3), nc * 9),
                       uni((co,), nc * 9), "relu"))
        params.append(("convT", uni((co, co, 3, 3), co * 9),
                       uni((co,), co * 9), "relu"))
        nc = co
    if ups >= 1:
        c = input_nc // (2 ** (ups - 1))
        params.append(("conv", uni((c, c, 3, 3), c * 9),
                       uni((c,), c * 9), "relu"))
        params.append(("convT", uni((c, output_nc, 3, 3), output_nc * 9),
                       uni((output_nc,), output_nc * 9), activation))
    else:
        params.append(("conv", uni((input_nc, input_nc, 3, 3), input_nc * 9),
                       uni((input_nc,), input_nc * 9), "relu"))
        params.append(("conv", uni((output_nc, input_nc, 3, 3), input_nc * 9),
                       uni((output_nc,), input_nc * 9), activation))
    return params


def custom_ae_forward(params, x_nchw):
    """Forward pass; each (conv+ReLU, convT|conv + act) pair runs as one fused
    Pallas kernel."""
    x = jnp.transpose(x_nchw, (0, 2, 3, 1))          # NCHW -> NHWC
    assert len(params) % 2 == 0
    for i in range(0, len(params), 2):
        k1, w1, b1, _ = params[i]
        k2, w2, b2, a2 = params[i + 1]
        assert k1 == "conv"
        if k2 == "convT":
            x = _conv_convt_pair(x, w1, b1, w2, b2, a2)
        else:
            x = _conv_conv_pair(x, w1, b1, w2, b2, a2)
    return jnp.transpose(x, (0, 3, 1, 2))            # NHWC -> NCHW


# --------------------------------------------------------------------------
# pure-JAX reference for correctness check
# --------------------------------------------------------------------------
def reference_forward(params, x_nchw):
    x = x_nchw
    for kind, w, b, act in params:
        if kind == "conv":
            y = lax.conv_general_dilated(
                x, w, (1, 1), [(1, 1), (1, 1)],
                dimension_numbers=("NCHW", "OIHW", "NCHW"))
        else:
            w_eq = jnp.transpose(jnp.flip(w, axis=(2, 3)), (1, 0, 2, 3))
            y = lax.conv_general_dilated(
                x, w_eq, (1, 1), [(1, 2), (1, 2)], lhs_dilation=(2, 2),
                dimension_numbers=("NCHW", "OIHW", "NCHW"))
        y = y + b[None, :, None, None]
        if act == "relu":
            y = jnp.maximum(y, 0.0)
        elif act == "sigmoid":
            y = jax.nn.sigmoid(y)
        elif act == "tanh":
            y = jnp.tanh(y)
        x = y
    return x


if __name__ == "__main__":
    # shape-faithful small config: (B, input_nc, 8, 8) -> (B, 3, 32, 32)
    B, INPUT_NC, OUTPUT_NC, INPUT_DIM, OUTPUT_DIM = 2, 32, 3, 8, 32

    key = jax.random.PRNGKey(0)
    kp, kx = jax.random.split(key)
    params = build_params(kp, INPUT_NC, OUTPUT_NC, INPUT_DIM, OUTPUT_DIM,
                          activation="sigmoid")
    x = jax.random.normal(kx, (B, INPUT_NC, INPUT_DIM, INPUT_DIM), jnp.float32)

    fwd = jax.jit(functools.partial(custom_ae_forward, params))
    out = jax.block_until_ready(fwd(x))
    assert out.shape == (B, OUTPUT_NC, OUTPUT_DIM, OUTPUT_DIM), out.shape

    ref = jax.block_until_ready(reference_forward(params, x))
    max_err = float(jnp.max(jnp.abs(out - ref)))
    # bf16 MXU operands (per perf review) vs f32 lax reference -> looser bound
    assert max_err < 1e-2, f"mismatch vs reference: {max_err}"

    print("KERNEL_OK")
</pallas_src>

<mosaic_0001>
module attributes {stable_mosaic.version = 11 : i64} {
  func.func @_conv_convt_kernel(%arg0: i32, %arg1: memref<1x10x10x32xf32, #tpu.memory_space<vmem>>, %arg2: memref<288x16xbf16, #tpu.memory_space<vmem>>, %arg3: memref<1x16xf32, #tpu.memory_space<vmem>>, %arg4: memref<64x64xbf16, #tpu.memory_space<vmem>>, %arg5: memref<1x64xf32, #tpu.memory_space<vmem>>, %arg6: memref<64x64xf32, #tpu.memory_space<vmem>>, %arg7: memref<1x9x16x16xf32, #tpu.memory_space<vmem>>) attributes {dimension_semantics = [#tpu.dimension_semantics<parallel>], iteration_bounds = array<i64: 2>, scalar_prefetch = 0 : i64, scratch_operands = 1 : i64, tpu.core_type = #tpu.core_type<tc>, window_params = [{transform_indices = @transform_0, window_bounds = array<i64: 1, 10, 10, 32>}, {pipeline_mode = #tpu.pipeline_mode<synchronous>, transform_indices = @transform_1, window_bounds = array<i64: 288, 16>}, {pipeline_mode = #tpu.pipeline_mode<synchronous>, transform_indices = @transform_2, window_bounds = array<i64: 1, 16>}, {pipeline_mode = #tpu.pipeline_mode<synchronous>, transform_indices = @transform_3, window_bounds = array<i64: 64, 64>}, {pipeline_mode = #tpu.pipeline_mode<synchronous>, transform_indices = @transform_4, window_bounds = array<i64: 1, 64>}, {transform_indices = @transform_5, window_bounds = array<i64: 64, 64>}]} {
    %cst = arith.constant 0.000000e+00 : f32
    %0 = vector.broadcast %cst : f32 to vector<1x1x16x16xf32>
    %c0 = arith.constant 0 : index
    %c8 = arith.constant 8 : index
    %c0_0 = arith.constant 0 : index
    %c0_1 = arith.constant 0 : index
    %1 = vector.load %arg7[%c0, %c8, %c0_0, %c0_1] : memref<1x9x16x16xf32, #tpu.memory_space<vmem>>, vector<1x1x16x16xf32>
    tpu.vector_store %arg7[%c0, %c8, %c0_0, %c0_1], %0 {strides = array<i32>} : memref<1x9x16x16xf32, #tpu.memory_space<vmem>>, vector<1x1x16x16xf32>,
    %cst_2 = arith.constant 0.000000e+00 : f32
    %2 = vector.broadcast %cst_2 : f32 to vector<1x8x8x16xf32>
    %c0_3 = arith.constant 0 : index
    %c0_4 = arith.constant 0 : index
    %c8_5 = arith.constant 8 : index
    %c0_6 = arith.constant 0 : index
    %3 = vector.load %arg7[%c0_3, %c0_4, %c8_5, %c0_6] : memref<1x9x16x16xf32, #tpu.memory_space<vmem>>, vector<1x8x8x16xf32>
    tpu.vector_store %arg7[%c0_3, %c0_4, %c8_5, %c0_6], %2 {strides = array<i32>} : memref<1x9x16x16xf32, #tpu.memory_space<vmem>>, vector<1x8x8x16xf32>,
    %c0_7 = arith.constant 0 : index
    %c0_8 = arith.constant 0 : index
    %c0_9 = arith.constant 0 : index
    %c0_10 = arith.constant 0 : index
    %4 = vector.load %arg1[%c0_7, %c0_8, %c0_9, %c0_10] : memref<1x10x10x32xf32, #tpu.memory_space<vmem>>, vector<1x8x8x32xf32>
    %5 = vector.shape_cast %4 : vector<1x8x8x32xf32> to vector<64x32xf32>
    %c0_11 = arith.constant 0 : index
    %c0_12 = arith.constant 0 : index
    %c1 = arith.constant 1 : index
    %c0_13 = arith.constant 0 : index
    %6 = vector.load %arg1[%c0_11, %c0_12, %c1, %c0_13] : memref<1x10x10x32xf32, #tpu.memory_space<vmem>>, vector<1x8x8x32xf32>
    %7 = vector.shape_cast %6 : vector<1x8x8x32xf32> to vector<64x32xf32>
    %c0_14 = arith.constant 0 : index
    %c0_15 = arith.constant 0 : index
    %c2 = arith.constant 2 : index
    %c0_16 = arith.constant 0 : index
    %8 = vector.load %arg1[%c0_14, %c0_15, %c2, %c0_16] : memref<1x10x10x32xf32, #tpu.memory_space<vmem>>, vector<1x8x8x32xf32>
    %9 = vector.shape_cast %8 : vector<1x8x8x32xf32> to vector<64x32xf32>
    %c0_17 = arith.constant 0 : index
    %c1_18 = arith.constant 1 : index
    %c0_19 = arith.constant 0 : index
    %c0_20 = arith.constant 0 : index
    %10 = vector.load %arg1[%c0_17, %c1_18, %c0_19, %c0_20] : memref<1x10x10x32xf32, #tpu.memory_space<vmem>>, vector<1x8x8x32xf32>
    %11 = vector.shape_cast %10 : vector<1x8x8x32xf32> to vector<64x32xf32>
    %c0_21 = arith.constant 0 : index
    %c1_22 = arith.constant 1 : index
    %c1_23 = arith.constant 1 : index
    %c0_24 = arith.constant 0 : index
    %12 = vector.load %arg1[%c0_21, %c1_22, %c1_23, %c0_24] : memref<1x10x10x32xf32, #tpu.memory_space<vmem>>, vector<1x8x8x32xf32>
    %13 = vector.shape_cast %12 : vector<1x8x8x32xf32> to vector<64x32xf32>
    %c0_25 = arith.constant 0 : index
    %c1_26 = arith.constant 1 : index
    %c2_27 = arith.constant 2 : index
    %c0_28 = arith.constant 0 : index
    %14 = vector.load %arg1[%c0_25, %c1_26, %c2_27, %c0_28] : memref<1x10x10x32xf32, #tpu.memory_space<vmem>>, vector<1x8x8x32xf32>
    %15 = vector.shape_cast %14 : vector<1x8x8x32xf32> to vector<64x32xf32>
    %c0_29 = arith.constant 0 : index
    %c2_30 = arith.constant 2 : index
    %c0_31 = arith.constant 0 : index
    %c0_32 = arith.constant 0 : index
    %16 = vector.load %arg1[%c0_29, %c2_30, %c0_31, %c0_32] : memref<1x10x10x32xf32, #tpu.memory_space<vmem>>, vector<1x8x8x32xf32>
    %17 = vector.shape_cast %16 : vector<1x8x8x32xf32> to vector<64x32xf32>
    %c0_33 = arith.constant 0 : index
    %c2_34 = arith.constant 2 : index
    %c1_35 = arith.constant 1 : index
    %c0_36 = arith.constant 0 : index
    %18 = vector.load %arg1[%c0_33, %c2_34, %c1_35, %c0_36] : memref<1x10x10x32xf32, #tpu.memory_space<vmem>>, vector<1x8x8x32xf32>
    %19 = vector.shape_cast %18 : vector<1x8x8x32xf32> to vector<64x32xf32>
    %c0_37 = arith.constant 0 : index
    %c2_38 = arith.constant 2 : index
    %c2_39 = arith.constant 2 : index
    %c0_40 = arith.constant 0 : index
    %20 = vector.load %arg1[%c0_37, %c2_38, %c2_39, %c0_40] : memref<1x10x10x32xf32, #tpu.memory_space<vmem>>, vector<1x8x8x32xf32>
    %21 = vector.shape_cast %20 : vector<1x8x8x32xf32> to vector<64x32xf32>
    %22 = tpu.concatenate %5, %7, %9, %11, %13, %15, %17, %19, %21 in 1 : vector<64x32xf32>, vector<64x32xf32>, vector<64x32xf32>, vector<64x32xf32>, vector<64x32xf32>, vector<64x32xf32>, vector<64x32xf32>, vector<64x32xf32>, vector<64x32xf32> -> vector<64x288xf32>
    %23 = arith.truncf %22 : vector<64x288xf32> to vector<64x288xbf16>
    %c0_41 = arith.constant 0 : index
    %c0_42 = arith.constant 0 : index
    %24 = vector.load %arg2[%c0_41, %c0_42] : memref<288x16xbf16, #tpu.memory_space<vmem>>, vector<288x16xbf16>
    %cst_43 = arith.constant dense<0.000000e+00> : vector<64x16xf32>
    %25 = tpu.matmul %23, %24, %cst_43 {dimension_numbers = #tpu.dot_dimension_numbers<[1], [0], [0], [1], [0, 0, 1, 1], [], []>} : vector<64x288xbf16>, vector<288x16xbf16>, vector<64x16xf32> -> vector<64x16xf32>
    %c0_44 = arith.constant 0 : index
    %c0_45 = arith.constant 0 : index
    %26 = vector.load %arg3[%c0_44, %c0_45] : memref<1x16xf32, #tpu.memory_space<vmem>>, vector<1x16xf32>
    %27 = vector.broadcast %26 : vector<1x16xf32> to vector<64x16xf32>
    %28 = arith.addf %25, %27 : vector<64x16xf32>
    %cst_46 = arith.constant 0.000000e+00 : f32
    %29 = vector.broadcast %cst_46 : f32 to vector<64x16xf32>
    %30 = arith.maximumf %28, %29 : vector<64x16xf32>
    %31 = vector.shape_cast %30 : vector<64x16xf32> to vector<1x8x8x16xf32>
    %c0_47 = arith.constant 0 : index
    %c0_48 = arith.constant 0 : index
    %c0_49 = arith.constant 0 : index
    %c0_50 = arith.constant 0 : index
    %32 = vector.load %arg7[%c0_47, %c0_48, %c0_49, %c0_50] : memref<1x9x16x16xf32, #tpu.memory_space<vmem>>, vector<1x8x8x16xf32>
    tpu.vector_store %arg7[%c0_47, %c0_48, %c0_49, %c0_50], %31 {strides = array<i32>} : memref<1x9x16x16xf32, #tpu.memory_space<vmem>>, vector<1x8x8x16xf32>,
    %c0_51 = arith.constant 0 : index
    %c0_52 = arith.constant 0 : index
    %c0_53 = arith.constant 0 : index
    %c0_54 = arith.constant 0 : index
    %33 = vector.load %arg7[%c0_51, %c0_52, %c0_53, %c0_54] : memref<1x9x16x16xf32, #tpu.memory_space<vmem>>, vector<1x8x8x16xf32>
    %34 = vector.shape_cast %33 : vector<1x8x8x16xf32> to vector<64x16xf32>
    %c0_55 = arith.constant 0 : index
    %c0_56 = arith.constant 0 : index
    %c1_57 = arith.constant 1 : index
    %c0_58 = arith.constant 0 : index
    %35 = vector.load %arg7[%c0_55, %c0_56, %c1_57, %c0_58] : memref<1x9x16x16xf32, #tpu.memory_space<vmem>>, vector<1x8x8x16xf32>
    %36 = vector.shape_cast %35 : vector<1x8x8x16xf32> to vector<64x16xf32>
    %c0_59 = arith.constant 0 : index
    %c1_60 = arith.constant 1 : index
    %c0_61 = arith.constant 0 : index
    %c0_62 = arith.constant 0 : index
    %37 = vector.load %arg7[%c0_59, %c1_60, %c0_61, %c0_62] : memref<1x9x16x16xf32, #tpu.memory_space<vmem>>, vector<1x8x8x16xf32>
    %38 = vector.shape_cast %37 : vector<1x8x8x16xf32> to vector<64x16xf32>
    %c0_63 = arith.constant 0 : index
    %c1_64 = arith.constant 1 : index
    %c1_65 = arith.constant 1 : index
    %c0_66 = arith.constant 0 : index
    %39 = vector.load %arg7[%c0_63, %c1_64, %c1_65, %c0_66] : memref<1x9x16x16xf32, #tpu.memory_space<vmem>>, vector<1x8x8x16xf32>
    %40 = vector.shape_cast %39 : vector<1x8x8x16xf32> to vector<64x16xf32>
    %41 = tpu.concatenate %34, %36, %38, %40 in 1 : vector<64x16xf32>, vector<64x16xf32>, vector<64x16xf32>, vector<64x16xf32> -> vector<64x64xf32>
    %42 = arith.truncf %41 : vector<64x64xf32> to vector<64x64xbf16>
    %c0_67 = arith.constant 0 : index
    %c0_68 = arith.constant 0 : index
    %43 = vector.load %arg4[%c0_67, %c0_68] : memref<64x64xbf16, #tpu.memory_space<vmem>>, vector<64x64xbf16>
    %cst_69 = arith.constant dense<0.000000e+00> : vector<64x64xf32>
    %44 = tpu.matmul %42, %43, %cst_69 {dimension_numbers = #tpu.dot_dimension_numbers<[1], [0], [0], [1], [0, 0, 1, 1], [], []>} : vector<64x64xbf16>, vector<64x64xbf16>, vector<64x64xf32> -> vector<64x64xf32>
    %c0_70 = arith.constant 0 : index
    %c0_71 = arith.constant 0 : index
    %45 = vector.load %arg5[%c0_70, %c0_71] : memref<1x64xf32, #tpu.memory_space<vmem>>, vector<1x64xf32>
    %46 = vector.broadcast %45 : vector<1x64xf32> to vector<64x64xf32>
    %47 = arith.addf %44, %46 : vector<64x64xf32>
    %cst_72 = arith.constant 0.000000e+00 : f32
    %48 = vector.broadcast %cst_72 : f32 to vector<64x64xf32>
    %49 = arith.maximumf %47, %48 : vector<64x64xf32>
    %c0_73 = arith.constant 0 : index
    %c0_74 = arith.constant 0 : index
    %50 = vector.load %arg6[%c0_73, %c0_74] : memref<64x64xf32, #tpu.memory_space<vmem>>, vector<64x64xf32>
    tpu.vector_store %arg6[%c0_73, %c0_74], %49 {strides = array<i32>} : memref<64x64xf32, #tpu.memory_space<vmem>>, vector<64x64xf32>,
    return
  }
  func.func @transform_0(%arg0: i32) -> (i32, i32, i32, i32) {
    %c0_i32 = arith.constant 0 : i32
    %c0_i32_0 = arith.constant 0 : i32
    %c0_i32_1 = arith.constant 0 : i32
    %c0_i32_2 = arith.constant 0 : i32
    return %arg0, %c0_i32, %c0_i32_0, %c0_i32_1 : i32, i32, i32, i32
  }
  func.func @transform_1(%arg0: i32) -> (i32, i32) {
    %c0_i32 = arith.constant 0 : i32
    %c0_i32_0 = arith.constant 0 : i32
    %c0_i32_1 = arith.constant 0 : i32
    return %c0_i32, %c0_i32_0 : i32, i32
  }
  func.func @transform_2(%arg0: i32) -> (i32, i32) {
    %c0_i32 = arith.constant 0 : i32
    %c0_i32_0 = arith.constant 0 : i32
    %c0_i32_1 = arith.constant 0 : i32
    return %c0_i32, %c0_i32_0 : i32, i32
  }
  func.func @transform_3(%arg0: i32) -> (i32, i32) {
    %c0_i32 = arith.constant 0 : i32
    %c0_i32_0 = arith.constant 0 : i32
    %c0_i32_1 = arith.constant 0 : i32
    return %c0_i32, %c0_i32_0 : i32, i32
  }
  func.func @transform_4(%arg0: i32) -> (i32, i32) {
    %c0_i32 = arith.constant 0 : i32
    %c0_i32_0 = arith.constant 0 : i32
    %c0_i32_1 = arith.constant 0 : i32
    return %c0_i32, %c0_i32_0 : i32, i32
  }
  func.func @transform_5(%arg0: i32) -> (i32, i32) {
    %c0_i32 = arith.constant 0 : i32
    %c0_i32_0 = arith.constant 0 : i32
    return %arg0, %c0_i32 : i32, i32
  }
}

module attributes {stable_mosaic.version = 11 : i64} {
  func.func @_conv_convt_kernel(%arg0: i32, %arg1: memref<1x18x18x16xf32, #tpu.memory_space<vmem>>, %arg2: memref<144x16xbf16, #tpu.memory_space<vmem>>, %arg3: memref<1x16xf32, #tpu.memory_space<vmem>>, %arg4: memref<64x12xbf16, #tpu.memory_space<vmem>>, %arg5: memref<1x12xf32, #tpu.memory_space<vmem>>, %arg6: memref<256x12xf32, #tpu.memory_space<vmem>>, %arg7: memref<1x17x24x16xf32, #tpu.memory_space<vmem>>) attributes {dimension_semantics = [#tpu.dimension_semantics<parallel>], iteration_bounds = array<i64: 2>, scalar_prefetch = 0 : i64, scratch_operands = 1 : i64, tpu.core_type = #tpu.core_type<tc>, window_params = [{transform_indices = @transform_0, window_bounds = array<i64: 1, 18, 18, 16>}, {pipeline_mode = #tpu.pipeline_mode<synchronous>, transform_indices = @transform_1, window_bounds = array<i64: 144, 16>}, {pipeline_mode = #tpu.pipeline_mode<synchronous>, transform_indices = @transform_2, window_bounds = array<i64: 1, 16>}, {pipeline_mode = #tpu.pipeline_mode<synchronous>, transform_indices = @transform_3, window_bounds = array<i64: 64, 12>}, {pipeline_mode = #tpu.pipeline_mode<synchronous>, transform_indices = @transform_4, window_bounds = array<i64: 1, 12>}, {transform_indices = @transform_5, window_bounds = array<i64: 256, 12>}]} {
    %cst = arith.constant 0.000000e+00 : f32
    %0 = vector.broadcast %cst : f32 to vector<1x1x24x16xf32>
    %c0 = arith.constant 0 : index
    %c16 = arith.constant 16 : index
    %c0_0 = arith.constant 0 : index
    %c0_1 = arith.constant 0 : index
    %1 = vector.load %arg7[%c0, %c16, %c0_0, %c0_1] : memref<1x17x24x16xf32, #tpu.memory_space<vmem>>, vector<1x1x24x16xf32>
    tpu.vector_store %arg7[%c0, %c16, %c0_0, %c0_1], %0 {strides = array<i32>} : memref<1x17x24x16xf32, #tpu.memory_space<vmem>>, vector<1x1x24x16xf32>,
    %cst_2 = arith.constant 0.000000e+00 : f32
    %2 = vector.broadcast %cst_2 : f32 to vector<1x16x8x16xf32>
    %c0_3 = arith.constant 0 : index
    %c0_4 = arith.constant 0 : index
    %c16_5 = arith.constant 16 : index
    %c0_6 = arith.constant 0 : index
    %3 = vector.load %arg7[%c0_3, %c0_4, %c16_5, %c0_6] : memref<1x17x24x16xf32, #tpu.memory_space<vmem>>, vector<1x16x8x16xf32>
    tpu.vector_store %arg7[%c0_3, %c0_4, %c16_5, %c0_6], %2 {strides = array<i32>} : memref<1x17x24x16xf32, #tpu.memory_space<vmem>>, vector<1x16x8x16xf32>,
    %c0_7 = arith.constant 0 : index
    %c0_8 = arith.constant 0 : index
    %c0_9 = arith.constant 0 : index
    %c0_10 = arith.constant 0 : index
    %4 = vector.load %arg1[%c0_7, %c0_8, %c0_9, %c0_10] : memref<1x18x18x16xf32, #tpu.memory_space<vmem>>, vector<1x16x16x16xf32>
    %5 = vector.shape_cast %4 : vector<1x16x16x16xf32> to vector<256x16xf32>
    %c0_11 = arith.constant 0 : index
    %c0_12 = arith.constant 0 : index
    %c1 = arith.constant 1 : index
    %c0_13 = arith.constant 0 : index
    %6 = vector.load %arg1[%c0_11, %c0_12, %c1, %c0_13] : memref<1x18x18x16xf32, #tpu.memory_space<vmem>>, vector<1x16x16x16xf32>
    %7 = vector.shape_cast %6 : vector<1x16x16x16xf32> to vector<256x16xf32>
    %c0_14 = arith.constant 0 : index
    %c0_15 = arith.constant 0 : index
    %c2 = arith.constant 2 : index
    %c0_16 = arith.constant 0 : index
    %8 = vector.load %arg1[%c0_14, %c0_15, %c2, %c0_16] : memref<1x18x18x16xf32, #tpu.memory_space<vmem>>, vector<1x16x16x16xf32>
    %9 = vector.shape_cast %8 : vector<1x16x16x16xf32> to vector<256x16xf32>
    %c0_17 = arith.constant 0 : index
    %c1_18 = arith.constant 1 : index
    %c0_19 = arith.constant 0 : index
    %c0_20 = arith.constant 0 : index
    %10 = vector.load %arg1[%c0_17, %c1_18, %c0_19, %c0_20] : memref<1x18x18x16xf32, #tpu.memory_space<vmem>>, vector<1x16x16x16xf32>
    %11 = vector.shape_cast %10 : vector<1x16x16x16xf32> to vector<256x16xf32>
    %c0_21 = arith.constant 0 : index
    %c1_22 = arith.constant 1 : index
    %c1_23 = arith.constant 1 : index
    %c0_24 = arith.constant 0 : index
    %12 = vector.load %arg1[%c0_21, %c1_22, %c1_23, %c0_24] : memref<1x18x18x16xf32, #tpu.memory_space<vmem>>, vector<1x16x16x16xf32>
    %13 = vector.shape_cast %12 : vector<1x16x16x16xf32> to vector<256x16xf32>
    %c0_25 = arith.constant 0 : index
    %c1_26 = arith.constant 1 : index
    %c2_27 = arith.constant 2 : index
    %c0_28 = arith.constant 0 : index
    %14 = vector.load %arg1[%c0_25, %c1_26, %c2_27, %c0_28] : memref<1x18x18x16xf32, #tpu.memory_space<vmem>>, vector<1x16x16x16xf32>
    %15 = vector.shape_cast %14 : vector<1x16x16x16xf32> to vector<256x16xf32>
    %c0_29 = arith.constant 0 : index
    %c2_30 = arith.constant 2 : index
    %c0_31 = arith.constant 0 : index
    %c0_32 = arith.constant 0 : index
    %16 = vector.load %arg1[%c0_29, %c2_30, %c0_31, %c0_32] : memref<1x18x18x16xf32, #tpu.memory_space<vmem>>, vector<1x16x16x16xf32>
    %17 = vector.shape_cast %16 : vector<1x16x16x16xf32> to vector<256x16xf32>
    %c0_33 = arith.constant 0 : index
    %c2_34 = arith.constant 2 : index
    %c1_35 = arith.constant 1 : index
    %c0_36 = arith.constant 0 : index
    %18 = vector.load %arg1[%c0_33, %c2_34, %c1_35, %c0_36] : memref<1x18x18x16xf32, #tpu.memory_space<vmem>>, vector<1x16x16x16xf32>
    %19 = vector.shape_cast %18 : vector<1x16x16x16xf32> to vector<256x16xf32>
    %c0_37 = arith.constant 0 : index
    %c2_38 = arith.constant 2 : index
    %c2_39 = arith.constant 2 : index
    %c0_40 = arith.constant 0 : index
    %20 = vector.load %arg1[%c0_37, %c2_38, %c2_39, %c0_40] : memref<1x18x18x16xf32, #tpu.memory_space<vmem>>, vector<1x16x16x16xf32>
    %21 = vector.shape_cast %20 : vector<1x16x16x16xf32> to vector<256x16xf32>
    %22 = tpu.concatenate %5, %7, %9, %11, %13, %15, %17, %19, %21 in 1 : vector<256x16xf32>, vector<256x16xf32>, vector<256x16xf32>, vector<256x16xf32>, vector<256x16xf32>, vector<256x16xf32>, vector<256x16xf32>, vector<256x16xf32>, vector<256x16xf32> -> vector<256x144xf32>
    %23 = arith.truncf %22 : vector<256x144xf32> to vector<256x144xbf16>
    %c0_41 = arith.constant 0 : index
    %c0_42 = arith.constant 0 : index
    %24 = vector.load %arg2[%c0_41, %c0_42] : memref<144x16xbf16, #tpu.memory_space<vmem>>, vector<144x16xbf16>
    %cst_43 = arith.constant dense<0.000000e+00> : vector<256x16xf32>
    %25 = tpu.matmul %23, %24, %cst_43 {dimension_numbers = #tpu.dot_dimension_numbers<[1], [0], [0], [1], [0, 0, 1, 1], [], []>} : vector<256x144xbf16>, vector<144x16xbf16>, vector<256x16xf32> -> vector<256x16xf32>
    %c0_44 = arith.constant 0 : index
    %c0_45 = arith.constant 0 : index
    %26 = vector.load %arg3[%c0_44, %c0_45] : memref<1x16xf32, #tpu.memory_space<vmem>>, vector<1x16xf32>
    %27 = vector.broadcast %26 : vector<1x16xf32> to vector<256x16xf32>
    %28 = arith.addf %25, %27 : vector<256x16xf32>
    %cst_46 = arith.constant 0.000000e+00 : f32
    %29 = vector.broadcast %cst_46 : f32 to vector<256x16xf32>
    %30 = arith.maximumf %28, %29 : vector<256x16xf32>
    %31 = vector.shape_cast %30 : vector<256x16xf32> to vector<1x16x16x16xf32>
    %c0_47 = arith.constant 0 : index
    %c0_48 = arith.constant 0 : index
    %c0_49 = arith.constant 0 : index
    %c0_50 = arith.constant 0 : index
    %32 = vector.load %arg7[%c0_47, %c0_48, %c0_49, %c0_50] : memref<1x17x24x16xf32, #tpu.memory_space<vmem>>, vector<1x16x16x16xf32>
    tpu.vector_store %arg7[%c0_47, %c0_48, %c0_49, %c0_50], %31 {strides = array<i32>} : memref<1x17x24x16xf32, #tpu.memory_space<vmem>>, vector<1x16x16x16xf32>,
    %c0_51 = arith.constant 0 : index
    %c0_52 = arith.constant 0 : index
    %c0_53 = arith.constant 0 : index
    %c0_54 = arith.constant 0 : index
    %33 = vector.load %arg7[%c0_51, %c0_52, %c0_53, %c0_54] : memref<1x17x24x16xf32, #tpu.memory_space<vmem>>, vector<1x16x16x16xf32>
    %34 = vector.shape_cast %33 : vector<1x16x16x16xf32> to vector<256x16xf32>
    %c0_55 = arith.constant 0 : index
    %c0_56 = arith.constant 0 : index
    %c1_57 = arith.constant 1 : index
    %c0_58 = arith.constant 0 : index
    %35 = vector.load %arg7[%c0_55, %c0_56, %c1_57, %c0_58] : memref<1x17x24x16xf32, #tpu.memory_space<vmem>>, vector<1x16x16x16xf32>
    %36 = vector.shape_cast %35 : vector<1x16x16x16xf32> to vector<256x16xf32>
    %c0_59 = arith.constant 0 : index
    %c1_60 = arith.constant 1 : index
    %c0_61 = arith.constant 0 : index
    %c0_62 = arith.constant 0 : index
    %37 = vector.load %arg7[%c0_59, %c1_60, %c0_61, %c0_62] : memref<1x17x24x16xf32, #tpu.memory_space<vmem>>, vector<1x16x16x16xf32>
    %38 = vector.shape_cast %37 : vector<1x16x16x16xf32> to vector<256x16xf32>
    %c0_63 = arith.constant 0 : index
    %c1_64 = arith.constant 1 : index
    %c1_65 = arith.constant 1 : index
    %c0_66 = arith.constant 0 : index
    %39 = vector.load %arg7[%c0_63, %c1_64, %c1_65, %c0_66] : memref<1x17x24x16xf32, #tpu.memory_space<vmem>>, vector<1x16x16x16xf32>
    %40 = vector.shape_cast %39 : vector<1x16x16x16xf32> to vector<256x16xf32>
    %41 = tpu.concatenate %34, %36, %38, %40 in 1 : vector<256x16xf32>, vector<256x16xf32>, vector<256x16xf32>, vector<256x16xf32> -> vector<256x64xf32>
    %42 = arith.truncf %41 : vector<256x64xf32> to vector<256x64xbf16>
    %c0_67 = arith.constant 0 : index
    %c0_68 = arith.constant 0 : index
    %43 = vector.load %arg4[%c0_67, %c0_68] : memref<64x12xbf16, #tpu.memory_space<vmem>>, vector<64x12xbf16>
    %cst_69 = arith.constant dense<0.000000e+00> : vector<256x12xf32>
    %44 = tpu.matmul %42, %43, %cst_69 {dimension_numbers = #tpu.dot_dimension_numbers<[1], [0], [0], [1], [0, 0, 1, 1], [], []>} : vector<256x64xbf16>, vector<64x12xbf16>, vector<256x12xf32> -> vector<256x12xf32>
    %c0_70 = arith.constant 0 : index
    %c0_71 = arith.constant 0 : index
    %45 = vector.load %arg5[%c0_70, %c0_71] : memref<1x12xf32, #tpu.memory_space<vmem>>, vector<1x12xf32>
    %46 = vector.broadcast %45 : vector<1x12xf32> to vector<256x12xf32>
    %47 = arith.addf %44, %46 : vector<256x12xf32>
    %cst_72 = arith.constant 0.000000e+00 : f32
    %48 = vector.broadcast %cst_72 : f32 to vector<256x12xf32>
    %49 = arith.subf %48, %47 : vector<256x12xf32>
    %50 = math.exp %49 : vector<256x12xf32>
    %cst_73 = arith.constant 1.000000e+00 : f32
    %51 = vector.broadcast %cst_73 : f32 to vector<256x12xf32>
    %52 = arith.addf %51, %50 : vector<256x12xf32>
    %53 = tpu.reciprocal %52 {approx = true} : vector<256x12xf32> -> vector<256x12xf32>
    %c0_74 = arith.constant 0 : index
    %c0_75 = arith.constant 0 : index
    %54 = vector.load %arg6[%c0_74, %c0_75] : memref<256x12xf32, #tpu.memory_space<vmem>>, vector<256x12xf32>
    tpu.vector_store %arg6[%c0_74, %c0_75], %53 {strides = array<i32>} : memref<256x12xf32, #tpu.memory_space<vmem>>, vector<256x12xf32>,
    return
  }
  func.func @transform_0(%arg0: i32) -> (i32, i32, i32, i32) {
    %c0_i32 = arith.constant 0 : i32
    %c0_i32_0 = arith.constant 0 : i32
    %c0_i32_1 = arith.constant 0 : i32
    %c0_i32_2 = arith.constant 0 : i32
    return %arg0, %c0_i32, %c0_i32_0, %c0_i32_1 : i32, i32, i32, i32
  }
  func.func @transform_1(%arg0: i32) -> (i32, i32) {
    %c0_i32 = arith.constant 0 : i32
    %c0_i32_0 = arith.constant 0 : i32
    %c0_i32_1 = arith.constant 0 : i32
    return %c0_i32, %c0_i32_0 : i32, i32
  }
  func.func @transform_2(%arg0: i32) -> (i32, i32) {
    %c0_i32 = arith.constant 0 : i32
    %c0_i32_0 = arith.constant 0 : i32
    %c0_i32_1 = arith.constant 0 : i32
    return %c0_i32, %c0_i32_0 : i32, i32
  }
  func.func @transform_3(%arg0: i32) -> (i32, i32) {
    %c0_i32 = arith.constant 0 : i32
    %c0_i32_0 = arith.constant 0 : i32
    %c0_i32_1 = arith.constant 0 : i32
    return %c0_i32, %c0_i32_0 : i32, i32
  }
  func.func @transform_4(%arg0: i32) -> (i32, i32) {
    %c0_i32 = arith.constant 0 : i32
    %c0_i32_0 = arith.constant 0 : i32
    %c0_i32_1 = arith.constant 0 : i32
    return %c0_i32, %c0_i32_0 : i32, i32
  }
  func.func @transform_5(%arg0: i32) -> (i32, i32) {
    %c0_i32 = arith.constant 0 : i32
    %c0_i32_0 = arith.constant 0 : i32
    return %arg0, %c0_i32 : i32, i32
  }
}

</mosaic_0001>

<bundles_post_ra>
// kernel: custom_ae_forward.2
= control target key start
LH: loop header
LB: loop body
LE: loop exit
PB: predicated region body
PF: predicated region fallthrough
CT: control target
= control target key end

     0   :  { %10 = vsyncpa [#allocation4], 0  ;;  %s2215_s0 = inlined_call_operand.vmem [shape: f32[2,10,10,32], index: 0, kind: input, shape index: {}]   ;;  %s2216_s1 = inlined_call_operand.hbm [shape: bf16[288,16], index: 1, kind: input, shape index: {}]   ;;  %s2217_s2 = inlined_call_operand.hbm [shape: f32[1,16], index: 2, kind: input, shape index: {}]   ;;  %s2218_s3 = inlined_call_operand.hbm [shape: bf16[64,64], index: 3, kind: input, shape index: {}]   ;;  %s2219_s4 = inlined_call_operand.vmem [shape: f32[1,64], index: 4, kind: input, shape index: {}]   ;;  %s2220_s5 = inlined_call_operand.vmem [shape: f32[128,64], index: 5, kind: output, shape index: {}]  }
   0x1   :  { %11 = vsyncpa [#allocation6], 0  ;;  %s1859_s18 = smov 0  }
   0x2 LB: > { %s1818_s19 = smov [#allocation5]   ;;  %s1865_s21 = sadd.s32 4294967295, %s1816_s18   ;;  %s1816_s18 = sphi %s1859_s18, %s17_s18  }
   0x3   : > { %s184_s20 = sshll.u32 %s1818_s19, 4  ;;  %p1298_p0 = scmp.ge.s32.totalorder %s1816_s18, 1  ;;  %s185_s20 = int_to_ptr.vmem [resolvable:$true] %s184_s20 }
   0x4   : > { %p158_p1 = scmp.lt.s32.totalorder %s1816_s18, 3  ;;  %p2221_p2 = scmp.eq.s32.totalorder %s1865_s21, 0 }
   0x5   : > { %s1819_s23 = smov [#allocation3]   ;;  %s1820_s26 = smov [#allocation7]  }
   0x6   : > { %p1870_p3 = pnand %p1298_p0, %p158_p1  ;;  %s170_s24 = sshll.u32 %s1819_s23, 4  ;;  %s171_s24 = int_to_ptr.vmem [resolvable:$true] %s170_s24 }
   0x7   : > { %s194_s27 = sshll.u32 %s1820_s26, 4  ;;  %s1735_s28 = scalar_lea.vmem %s185_s20, 16  ;;  %s1882_s27 = int_to_ptr.vmem [resolvable:$true] %s194_s27 }
   0x8   : > { %s2223_s22 = scalar_select %p1870_p3, 1, 0 }
   0x9   : > { %p1487_p4 = pneg %p1870_p3  ;;  %p1736_p7 = scmp.ne.s32.totalorder %s185_s20, %s1735_s28 }
   0xa   : > { %s1742_s29 = scalar_lea.vmem %s185_s20, 32  ;;  %p1743_p10 = scmp.lt.s32.totalorder %s185_s20, %s185_s20 }
   0xb   : > { %p1878_p5 = pnand %p2221_p2, %p1487_p4  ;;  %p1744_p11 = scmp.lt.s32.totalorder %s1742_s29, %s1735_s28 }
   0xd   : > { %p1726_p6 = pneg %p1878_p5  ;;  %p1745_p12 = por %p1744_p11, %p1743_p10 }
   0xf   : > { %p1738_p8 = pnand %p1736_p7, %p1726_p6 }
  0x11   : > { %p1739_p9 = pneg %p1738_p8 }
  0x13   : > { %p1746_p13 = pnand %p1745_p12, %p1739_p9 }
  0x15   : > { %1749 = shalt.err (!%p1746_p13)
}
  0x16   : > { %1493 = dma.hbm_to_vmem [thread:$0]  (!%p1878_p5), %s2217_s2, 16, %s185_s20, [#allocation6]  }
  0x17   : > { %s1761_s7 = scalar_lea.vmem %s171_s24, 2304  ;;  %p1769_p7 = scmp.lt.s32.totalorder %s171_s24, %s171_s24 }
  0x18   : > { %p1762_p0 = scmp.ne.s32.totalorder %s171_s24, %s1761_s7  ;;  %p1770_p8 = scmp.lt.s32.totalorder %s1761_s7, %s1761_s7 }
  0x1a   : > { %p1764_p1 = pnand %p1762_p0, %p1726_p6  ;;  %p1771_p2 = por %p1770_p8, %p1769_p7 }
  0x1c   : > { %p1765_p4 = pneg %p1764_p1 }
  0x1e   : > { %p1772_p3 = pnand %p1771_p2, %p1765_p4 }
  0x20   : > { %1775 = shalt.err (!%p1772_p3)
}
  0x21   : > { %s1821_s8 = smov 64   ;;  %s1822_s9 = smov 4  }
  0x22   : > { %1490 = dma.hbm_to_vmem [thread:$0]  (!%p1878_p5), %s2216_s1, 2304, %s171_s24, [#allocation4], %s1821_s8, %s1821_s8, %s1822_s9  }
  0x23   : > { %s1787_s12 = scalar_lea.vmem %s1882_s27, 512  ;;  %p1795_p2 = scmp.lt.s32.totalorder %s1882_s27, %s1882_s27 }
  0x24   : > { %p1788_p9 = scmp.ne.s32.totalorder %s1882_s27, %s1787_s12  ;;  %p1796_p3 = scmp.lt.s32.totalorder %s1787_s12, %s1787_s12 }
  0x26   : > { %p1790_p10 = pnand %p1788_p9, %p1726_p6  ;;  %p1797_p12 = por %p1796_p3, %p1795_p2 }
  0x28   : > { %p1791_p11 = pneg %p1790_p10 }
  0x2a   : > { %p1798_p13 = pnand %p1797_p12, %p1791_p11 }
  0x2c   : > { %1801 = shalt.err (!%p1798_p13)
}
  0x2d   : > { %1496 = dma.hbm_to_vmem [thread:$0]  (!%p1878_p5), %s2218_s3, 512, %s1882_s27, [#allocation6], %s1821_s8, %s1821_s8, %s1822_s9  }
  0x2e   : > { %p2225_p0 = scmp.ne.s32.totalorder %s2223_s22, 0 }
  0x2f   : > { %p2226_p1 = scmp.eq.s32.totalorder (!%p2225_p0), %s1865_s21, 0 }
  0x30   : > { %221 = sbr.rel (%p2225_p0) target bundleno = 782 (0x30e), region = 40 }
  0x35   : > { %1807 = dma.done.wait (%p2226_p1), [#allocation4], 2304   ;;  %p2227_p6 = pmov %p2226_p1 }
  0x36   : > { %p2228_p4 = pmov %p2226_p1 }
  0x37   : > { %1809 = vsyncadd (%p2227_p6), [#allocation4], 4294964992 }
  0x38   : > { %1811 = dma.done.wait (%p2228_p4), [#allocation6], 528   ;;  %p2229_p7 = pmov %p2226_p1 }
  0x39   : > { %p257_p8 = scmp.lt.s32.totalorder %s1865_s21, 1  ;;  %s1823_s22 = smov 64   ;;  %vm547_vm0 = vcmask 261120   ;;  %v1702_v19 = vld [vmem:[#allocation3 + $0x78] sm:$0xff]   ;;  %v1704_v24 = vld [vmem:[#allocation3 + $0x70] sm:$0xff]   ;;  %v1706_v26 = vld [vmem:[#allocation3 + $0x68] sm:$0xff]  }
  0x3a   : > { %1813 = vsyncadd (%p2229_p7), [#allocation6], 4294966768  ;;  %s1824_s23 = smov 32   ;;  %s1825_s24 = smov 96   ;;  %v1703_v22 = vld [vmem:[#allocation3 + $0x38] sm:$0xff]   ;;  %1392 = vmatprep.subr.bf16.mxu0 %v1702_v19  ;;  %v1705_v25 = vld [vmem:[#allocation3 + $0x30] sm:$0xff]  }
  0x3b   : > { %s258_s15 = scalar_select %p257_p8, %s1865_s21, 1  ;;  %1393 = vmatpush3.bf16.msra.mxu0 %v1703_v22  ;;  %v1707_v31 = vld [vmem:[#allocation3 + $0x28] sm:$0xff]   ;;  %v1708_v32 = vld [vmem:[#allocation3 + $0x60] sm:$0xff]   ;;  %v1710_v38 = vld [vmem:[#allocation3 + $0x58] sm:$0xff]   ;;  %vm556_vm1 = vcmask 523264   ;;  %vm565_vm2 = vcmask 785408  }
  0x3c   : > { %1394 = vmatprep.subr.bf16.mxu0 %v1704_v24  ;;  %v1709_v37 = vld [vmem:[#allocation3 + $0x20] sm:$0xff]   ;;  %v1711_v42 = vld [vmem:[#allocation3 + $0x18] sm:$0xff]   ;;  %v1717_v43 = vld [vmem:[#allocation3 + $0x88] sm:$0xff]   ;;  %vm270_vm3 = vcmask 130048   ;;  %s1827_s25 = smov 16   ;;  %s1828_s26 = smov 48  }
  0x3d   : > { %s1474_s16 = smul.u32 160, %s258_s15  ;;  %v1712_v44 = vld [vmem:[#allocation3 + $0x50] sm:$0xff]   ;;  %1446 = vmatprep.subr.bf16.mxu1 %v1717_v43  ;;  %v1719_v49 = vld [vmem:[#allocation3 + $0x80] sm:$0xff]   ;;  %v1714_v51 = vld [vmem:[#allocation3 + $0x48] sm:$0xff]   ;;  %vm1064_vm4 = vcmask 392192   ;;  %s1308_s27 = sshll.u32 %s1865_s21, 3 }
  0x3e   : > { %v1713_v48 = vld [vmem:[#allocation3 + $0x10] sm:$0xff]   ;;  %1447 = vmatpush3.bf16.msra.mxu1 %v1717_v43  ;;  %v1715_v58 = vld [vmem:[#allocation3 + $0x8] sm:$0xff]   ;;  %v1716_v59 = vld [vmem:[#allocation3 + $0x40] sm:$0xff]   ;;  %p263_p5 = scmp.lt.s32.totalorder %s1308_s27, 15 }
  0x3f   : > { %s1930_s20 = scalar_lea.vmem %s2215_s0, %s1474_s16  ;;  %1395 = vmatpush3.bf16.msra.mxu0 %v1705_v25  ;;  %1448 = vmatprep.subr.bf16.mxu1 %v1719_v49 }
  0x40   : > { %v1933_v0 = vld [vmem:[%s1930_s20 + $0x20] sm:$0xff]  ;;  %v1936_v1 = vld [vmem:[%s1930_s20 + $0x30] sm:$0xff]  ;;  %1396 = vmatprep.subr.bf16.mxu0 %v1706_v26  ;;  %s2231_s27 = smov (!%p263_p5, %s1308_s27), 15 }
  0x41   : > { %v1326_v2 = vld [vmem:[%s1930_s20 + $0x12] sm:$0xff]  ;;  %v1532_v3 = vpack.i.bf16 %v1936_v1, %v1933_v0  ;;  %v1327_v4 = vld [vmem:[%s1930_s20 + $0x22] sm:$0xff]  ;;  %s1309_s30 = sshll.u32 %s2231_s27, 3 }
  0x42   : > { %v297_v5 = vld [vmem:[%s1930_s20 + $0x2] sm:$0xff]  ;;  %v1522_v7 = vpack.i.bf16 %v1327_v4, %v1326_v2  ;;  %v1945_v8 = vld [vmem:[%s1930_s20 + $0x11] sm:$0xff]  ;;  %1449 = vmatpush3.bf16.msra.mxu1 %v1719_v49  ;;  %s266_s8 = scalar_lea.vmem %s2220_s5, %s1309_s30 }
  0x43   : > { %v289_v6 = vld [vmem:[%s1930_s20 + $0x1] sm:$0xff]  ;;  %1533 = vrot.lane.b32.xlu1 %v1532_v3, %s1823_s22  ;;  %v1537_v9 = vpack.i.bf16 %v1326_v2, %v297_v5  ;;  %v1951_v11 = vld [vmem:[%s1930_s20 + $0x10] sm:$0xff]  ;;  %1397 = vmatpush3.bf16.msra.mxu0 %v1707_v31 }
  0x44   : > { %1523 = vrot.lane.b32.xlu0 %v1522_v7, %s1824_s23  ;;  %v1527_v10 = vpack.i.bf16 %v1945_v8, %v289_v6  ;;  %v1954_v12 = vld [vmem:[%s1930_s20 + $0x21] sm:$0xff]  ;;  %v1957_v13 = vld [vmem:[%s1930_s20 + $0x31] sm:$0xff]  ;;  %v1547_v16 = vpack.i.bf16 %v1933_v0, %v1951_v11  ;;  %1398 = vmatprep.subr.bf16.mxu0 %v1708_v32 }
  0x45   : > { %v1328_v14 = vld [vmem:[%s1930_s20 + $0x32] sm:$0xff]  ;;  %v1542_v17 = vpack.i.bf16 %v1957_v13, %v1954_v12  ;;  %v1968_v18 = vld [vmem:[%s1930_s20 + $0x42] sm:$0xff] }
  0x46   : > { %v600_v15 = vpack.c.bf16 %v1328_v14, %v1327_v4  ;;  %v1972_v20 = vld [vmem:[%s1930_s20 + $0x40] sm:$0xff]  ;;  %v1975_v21 = vld [vmem:[%s1930_s20 + $0x50] sm:$0xff]  ;;  %v1552_v23 = vpack.i.bf16 %v1968_v18, %v1328_v14  ;;  %v1567_v27 = vpack.i.bf16 %v1328_v14, %v1327_v4 }
  0x47   : > { %1538 = vrot.lane.b32.xlu1 %v1537_v9, %s1823_s22  ;;  %v1981_v28 = vld [vmem:[%s1930_s20 + $0x41] sm:$0xff]  ;;  %v1562_v29 = vpack.i.bf16 %v1975_v21, %v1972_v20  ;;  %v1987_v30 = vld [vmem:[%s1930_s20 + $0x51] sm:$0xff]  ;;  %v1577_v33 = vpack.i.bf16 %v1972_v20, %v1936_v1  ;;  %1399 = vmatpush3.bf16.msra.mxu0 %v1709_v37 }
  0x48   : > { %1528 = vrot.lane.b32.xlu0 %v1527_v10, %s1824_s23  ;;  %1450 = vmatprep.mubr.msk.bf16.mxu1 %vm547_vm0, %v600_v15  ;;  %v1572_v34 = vpack.i.bf16 %v1987_v30, %v1981_v28  ;;  %v1330_v35 = vld [vmem:[%s1930_s20 + $0x52] sm:$0xff]  ;;  %v1331_v36 = vld [vmem:[%s1930_s20 + $0x62] sm:$0xff] }
  0x49   : > { %v1999_v39 = vld [vmem:[%s1930_s20 + $0x60] sm:$0xff]  ;;  %v2002_v40 = vld [vmem:[%s1930_s20 + $0x70] sm:$0xff]  ;;  %v1582_v41 = vpack.i.bf16 %v1331_v36, %v1330_v35  ;;  %1400 = vmatprep.subr.bf16.mxu0 %v1710_v38  ;;  %v1597_v45 = vpack.i.bf16 %v1330_v35, %v1968_v18  ;;  %v603_v54 = vpack.c.bf16 %v1330_v35, %v1968_v18 }
  0x4a   : > { %v2008_v46 = vld [vmem:[%s1930_s20 + $0x61] sm:$0xff]  ;;  %v2011_v47 = vld [vmem:[%s1930_s20 + $0x71] sm:$0xff]  ;;  %v1592_v50 = vpack.i.bf16 %v2002_v40, %v1999_v39  ;;  %v1607_v52 = vpack.i.bf16 %v1999_v39, %v1975_v21 }
  0x4b   : > { %1548 = vrot.lane.b32.xlu1 %v1547_v16, %s1825_s24  ;;  %1401 = vmatpush3.bf16.msra.mxu0 %v1711_v42  ;;  %v1332_v53 = vld [vmem:[%s1930_s20 + $0x72] sm:$0xff]  ;;  %v1602_v55 = vpack.i.bf16 %v2011_v47, %v2008_v46  ;;  %v1333_v57 = vld [vmem:[%s1930_s20 + $0x82] sm:$0xff] }
  0x4c   : > { %1543 = vrot.lane.b32.xlu0 %v1542_v17, %s1825_s24  ;;  %1402 = vmatprep.subr.bf16.mxu0 %v1712_v44  ;;  %v606_v56 = vpack.c.bf16 %v1332_v53, %v1331_v36  ;;  %v1612_v60 = vpack.i.bf16 %v1333_v57, %v1332_v53  ;;  %v1357_v61 = vld [vmem:[%s1930_s20 + $0x92] sm:$0xff]  ;;  %v1340_v62 = vld [vmem:[%s1930_s20 + $0x80] sm:$0xff]  ;;  %v1627_v3 = vpack.i.bf16 %v1332_v53, %v1331_v36 }
  0x4d   : > { %1451 = vmatmul.mubr.msk.bf16.vlgmr.msra.gmra.mxu1 %vm547_vm0, %v603_v54  ;;  %v1341_v63 = vld [vmem:[%s1930_s20 + $0x90] sm:$0xff]  ;;  %v609_v4 = vpack.c.bf16 %v1357_v61, %v1333_v57  ;;  %v2035_v6 = vld [vmem:[%s1930_s20 + $0x81] sm:$0xff]  ;;  %v1637_v9 = vpack.i.bf16 %v1340_v62, %v2002_v40 }
  0x4e   : > { %1454 = vmatprep.mubr.msk.bf16.mxu1 %vm547_vm0, %v606_v56  ;;  %v1718_v2 = vld [vmem:[#allocation3] sm:$0xff]   ;;  %v1622_v5 = vpack.i.bf16 %v1341_v63, %v1340_v62  ;;  %v281_v22 = vld [vmem:[%s1930_s20] sm:$0xff] }
  0x4f   : > { %1558 = vrot.lane.b32.xlu1 %v1542_v17, %s1824_s23  ;;  %1403 = vmatpush3.bf16.msra.mxu0 %v1713_v48  ;;  %v1349_v7 = vld [vmem:[%s1930_s20 + $0x91] sm:$0xff] }
  0x50   : > { %1553 = vrot.lane.b32.xlu0 %v1552_v23, %s1824_s23  ;;  %1404 = vmatprep.subr.bf16.mxu0 %v1714_v51  ;;  %v1632_v10 = vpack.i.bf16 %v1349_v7, %v2035_v6 }
  0x53   : > { %1568 = vrot.lane.b32.xlu1 %v1567_v27, %s1823_s22  ;;  %1405 = vmatpush3.bf16.msra.mxu0 %v1715_v58 }
  0x54   : > { %1563 = vrot.lane.b32.xlu0 %v1562_v29, %s1823_s22  ;;  %1406 = vmatprep.subr.bf16.mxu0 %v1716_v59 }
  0x55   : > { %1455 = vmatmul.mubr.msk.bf16.gmra.mxu1 %vm547_vm0, %v609_v4 }
  0x57   : > { %1578 = vrot.lane.b32.xlu1 %v1577_v33, %s1825_s24  ;;  %1407 = vmatpush3.bf16.msra.mxu0 %v1718_v2 }
  0x58   : > { %1573 = vrot.lane.b32.xlu0 %v1572_v34, %s1825_s24 }
  0x5b   : > { %1588 = vrot.lane.b32.xlu1 %v1572_v34, %s1824_s23 }
  0x5c   : > { %1583 = vrot.lane.b32.xlu0 %v1582_v41, %s1824_s23 }
  0x5f   : > { %1598 = vrot.lane.b32.xlu1 %v1597_v45, %s1823_s22 }
  0x60   : > { %1593 = vrot.lane.b32.xlu0 %v1592_v50, %s1823_s22 }
  0x63   : > { %1608 = vrot.lane.b32.xlu1 %v1607_v52, %s1825_s24 }
  0x64   : > { %1603 = vrot.lane.b32.xlu0 %v1602_v55, %s1825_s24 }
  0x67   : > { %1618 = vrot.lane.b32.xlu1 %v1602_v55, %s1824_s23 }
  0x68   : > { %1613 = vrot.lane.b32.xlu0 %v1612_v60, %s1824_s23 }
  0x6b   : > { %1628 = vrot.lane.b32.xlu1 %v1627_v3, %s1823_s22 }
  0x6c   : > { %1623 = vrot.lane.b32.xlu0 %v1622_v5, %s1823_s22 }
  0x6f   : > { %1638 = vrot.lane.b32.xlu1 %v1637_v9, %s1825_s24 }
  0x70   : > { %1633 = vrot.lane.b32.xlu0 %v1632_v10, %s1825_s24 }
  0xb5   : > { %v1534_v14 = vpop.permute.xlu1 %1533 }
  0xb6   : > { %v1524_v15 = vpop.permute.xlu0 %1523  ;;  %v1536_v27 = vunpack.i.h.bf16 %v1534_v14  ;;  %v1535_v29 = vunpack.i.l.bf16 %v1534_v14 }
  0xb7   : > { %v1526_v16 = vunpack.i.h.bf16 %v1524_v15  ;;  %v1525_v17 = vunpack.i.l.bf16 %v1524_v15 }
  0xb9   : > { %v1539_v18 = vpop.permute.xlu1 %1538  ;;  %v574_v34 = vsel %vm547_vm0, %v1945_v8, %v1525_v17  ;;  %v575_v35 = vsel %vm547_vm0, %v1954_v12, %v1526_v16 }
  0xba   : > { %v1529_v19 = vpop.permute.xlu0 %1528  ;;  %v1541_v23 = vunpack.i.h.bf16 %v1539_v18  ;;  %v1540_v24 = vunpack.i.l.bf16 %v1539_v18  ;;  %v582_v45 = vsel %vm556_vm1, %v574_v34, %v1535_v29 }
  0xbb   : > { %v1531_v25 = vunpack.i.h.bf16 %v1529_v19  ;;  %v1530_v26 = vunpack.i.l.bf16 %v1529_v19 }
  0xbd   : > { %v548_v31 = vsel %vm547_vm0, %v281_v22, %v1530_v26  ;;  %v549_v32 = vsel %vm547_vm0, %v1951_v11, %v1531_v25  ;;  %v1549_v33 = vpop.permute.xlu1 %1548  ;;  %v583_v11 = vsel %vm556_vm1, %v575_v35, %v1536_v27 }
  0xbe   : > { %v1551_v36 = vunpack.i.h.bf16 %v1549_v33  ;;  %v1550_v37 = vunpack.i.l.bf16 %v1549_v33  ;;  %v1544_v38 = vpop.permute.xlu0 %1543  ;;  %v557_v43 = vsel %vm556_vm1, %v548_v31, %v1540_v24  ;;  %v558_v44 = vsel %vm556_vm1, %v549_v32, %v1541_v23 }
  0xbf   : > { %v1546_v41 = vunpack.i.h.bf16 %v1544_v38  ;;  %v1545_v42 = vunpack.i.l.bf16 %v1544_v38 }
  0xc0   : > { %v566_v48 = vsel %vm565_vm2, %v557_v43, %v1550_v37  ;;  %v567_v8 = vsel %vm565_vm2, %v558_v44, %v1551_v36 }
  0xc1   : > { %v1559_v49 = vpop.permute.xlu1 %1558  ;;  %v590_v12 = vsel %vm565_vm2, %v582_v45, %v1545_v42  ;;  %v591_v50 = vsel %vm565_vm2, %v583_v11, %v1546_v41  ;;  %v598_v51 = vpack.c.bf16 %v567_v8, %v566_v48 }
  0xc2   : > { %v1554_v52 = vpop.permute.xlu0 %1553  ;;  %v599_v53 = vpack.c.bf16 %v591_v50, %v590_v12  ;;  %v1561_v54 = vunpack.i.h.bf16 %v1559_v49  ;;  %v1560_v55 = vunpack.i.l.bf16 %v1559_v49 }
  0xc3   : > { %v1556_v57 = vunpack.i.h.bf16 %v1554_v52  ;;  %v1555_v58 = vunpack.i.l.bf16 %v1554_v52 }
  0xc4   : > { %805 = vmatprep.mubr.bf16.mxu0 %v599_v53  ;;  %v550_v2 = vsel %vm547_vm0, %v1933_v0, %v1560_v55  ;;  %v551_v3 = vsel %vm547_vm0, %v1936_v1, %v1561_v54 }
  0xc5   : > { %806 = vmatmul.mubr.bf16.vlgmr.msra.gmra.mxu0 %v598_v51  ;;  %v1569_v56 = vpop.permute.xlu1 %1568  ;;  %v577_v5 = vsel %vm547_vm0, %v1981_v28, %v1556_v57  ;;  %v576_v7 = vsel %vm547_vm0, %v1957_v13, %v1555_v58 }
  0xc6   : > { %v1564_v59 = vpop.permute.xlu0 %1563  ;;  %v1571_v60 = vunpack.i.h.bf16 %v1569_v56  ;;  %v1570_v61 = vunpack.i.l.bf16 %v1569_v56 }
  0xc7   : > { %v1566_v62 = vunpack.i.h.bf16 %v1564_v59  ;;  %v1565_v63 = vunpack.i.l.bf16 %v1564_v59 }
  0xc8   : > { %v559_v15 = vsel %vm556_vm1, %v550_v2, %v1570_v61  ;;  %v560_v16 = vsel %vm556_vm1, %v551_v3, %v1571_v60 }
  0xc9   : > { %v1579_v4 = vpop.permute.xlu1 %1578  ;;  %v584_v0 = vsel %vm556_vm1, %v576_v7, %v1565_v63  ;;  %v585_v1 = vsel %vm556_vm1, %v577_v5, %v1566_v62 }
  0xca   : > { %v1581_v9 = vunpack.i.h.bf16 %v1579_v4  ;;  %v1580_v10 = vunpack.i.l.bf16 %v1579_v4  ;;  %v1574_v14 = vpop.permute.xlu0 %1573 }
  0xcb   : > { %v1576_v17 = vunpack.i.h.bf16 %v1574_v14  ;;  %v1575_v18 = vunpack.i.l.bf16 %v1574_v14 }
  0xcc   : > { %v568_v19 = vsel %vm565_vm2, %v559_v15, %v1580_v10  ;;  %v569_v28 = vsel %vm565_vm2, %v560_v16, %v1581_v9 }
  0xcd   : > { %v1589_v22 = vpop.permute.xlu1 %1588  ;;  %v592_v13 = vsel %vm565_vm2, %v584_v0, %v1575_v18  ;;  %v593_v23 = vsel %vm565_vm2, %v585_v1, %v1576_v17  ;;  %v601_v24 = vpack.c.bf16 %v569_v28, %v568_v19 }
  0xce   : > { %v1584_v25 = vpop.permute.xlu0 %1583  ;;  %v602_v26 = vpack.c.bf16 %v593_v23, %v592_v13  ;;  %v1591_v27 = vunpack.i.h.bf16 %v1589_v22  ;;  %v1590_v29 = vunpack.i.l.bf16 %v1589_v22 }
  0xcf   : > { %v1586_v32 = vunpack.i.h.bf16 %v1584_v25  ;;  %v1585_v33 = vunpack.i.l.bf16 %v1584_v25  ;;  %v1826_v25 = vmov 0.0  }
  0xd0   : > { %813 = vmatprep.mubr.bf16.mxu0 %v602_v26  ;;  %v552_v41 = vsel %vm547_vm0, %v1972_v20, %v1590_v29  ;;  %v553_v42 = vsel %vm547_vm0, %v1975_v21, %v1591_v27  ;;  %273 = vst.msk [vmem:[#allocation2 + $0x8] sm:$0xff] %vm270_vm3, %v1826_v25  ;;  %274 = vst.msk [vmem:[#allocation2 + $0x18] sm:$0xff] %vm270_vm3, %v1826_v25 }
  0xd1   : > { %814 = vmatmul.mubr.bf16.gmra.mxu0 %v601_v24  ;;  %v1599_v31 = vpop.permute.xlu1 %1598  ;;  %v579_v44 = vsel %vm547_vm0, %v2008_v46, %v1586_v32  ;;  %v578_v45 = vsel %vm547_vm0, %v1987_v30, %v1585_v33  ;;  %271 = vst.msk [vmem:[#allocation2 + $0x80] sm:$0xff] %vm270_vm3, %v1826_v25  ;;  %272 = vst.msk [vmem:[#allocation2 + $0x88] sm:$0xff] %vm270_vm3, %v1826_v25  ;;  %v2119_v32 = vld [vmem:[#allocation5] ss:$0 sm:$0xff] }
  0xd2   : > { %v1594_v34 = vpop.permute.xlu0 %1593  ;;  %v1601_v35 = vunpack.i.h.bf16 %v1599_v31  ;;  %v1600_v36 = vunpack.i.l.bf16 %v1599_v31  ;;  %275 = vst.msk [vmem:[#allocation2 + $0x28] sm:$0xff] %vm270_vm3, %v1826_v25  ;;  %276 = vst.msk [vmem:[#allocation2 + $0x38] sm:$0xff] %vm270_vm3, %v1826_v25 }
  0xd3   : > { %v1596_v37 = vunpack.i.h.bf16 %v1594_v34  ;;  %v1595_v38 = vunpack.i.l.bf16 %v1594_v34  ;;  %277 = vst.msk [vmem:[#allocation2 + $0x48] sm:$0xff] %vm270_vm3, %v1826_v25  ;;  %278 = vst.msk [vmem:[#allocation2 + $0x58] sm:$0xff] %vm270_vm3, %v1826_v25 }
  0xd4   : > { %v561_v49 = vsel %vm556_vm1, %v552_v41, %v1600_v36  ;;  %v562_v12 = vsel %vm556_vm1, %v553_v42, %v1601_v35  ;;  %279 = vst.msk [vmem:[#allocation2 + $0x68] sm:$0xff] %vm270_vm3, %v1826_v25  ;;  %280 = vst.msk [vmem:[#allocation2 + $0x78] sm:$0xff] %vm270_vm3, %v1826_v25 }
  0xd5   : > { %v1609_v43 = vpop.permute.xlu1 %1608  ;;  %v586_v20 = vsel %vm556_vm1, %v578_v45, %v1595_v38  ;;  %v587_v21 = vsel %vm556_vm1, %v579_v44, %v1596_v37 }
  0xd6   : > { %v1611_v11 = vunpack.i.h.bf16 %v1609_v43  ;;  %v1610_v48 = vunpack.i.l.bf16 %v1609_v43  ;;  %v1604_v8 = vpop.permute.xlu0 %1603 }
  0xd7   : > { %v1606_v50 = vunpack.i.h.bf16 %v1604_v8  ;;  %v1605_v51 = vunpack.i.l.bf16 %v1604_v8 }
  0xd8   : > { %v570_v52 = vsel %vm565_vm2, %v561_v49, %v1610_v48  ;;  %v571_v46 = vsel %vm565_vm2, %v562_v12, %v1611_v11 }
  0xd9   : > { %v1619_v53 = vpop.permute.xlu1 %1618  ;;  %v594_v30 = vsel %vm565_vm2, %v586_v20, %v1605_v51  ;;  %v595_v54 = vsel %vm565_vm2, %v587_v21, %v1606_v50  ;;  %v604_v55 = vpack.c.bf16 %v571_v46, %v570_v52 }
  0xda   : > { %v1614_v56 = vpop.permute.xlu0 %1613  ;;  %v605_v57 = vpack.c.bf16 %v595_v54, %v594_v30  ;;  %v1621_v58 = vunpack.i.h.bf16 %v1619_v53  ;;  %v1620_v59 = vunpack.i.l.bf16 %v1619_v53 }
  0xdb   : > { %v1616_v61 = vunpack.i.h.bf16 %v1614_v56  ;;  %v1615_v62 = vunpack.i.l.bf16 %v1614_v56 }
  0xdc   : > { %821 = vmatprep.mubr.bf16.mxu0 %v605_v57  ;;  %v554_v7 = vsel %vm547_vm0, %v1999_v39, %v1620_v59  ;;  %v555_v9 = vsel %vm547_vm0, %v2002_v40, %v1621_v58  ;;  %v1720_v57 = vld [vmem:[#allocation7 + $0x18] sm:$0xff]  }
  0xdd   : > { %822 = vmatmul.mubr.bf16.gmra.mxu0 %v604_v55  ;;  %v1629_v60 = vpop.permute.xlu1 %1628  ;;  %v581_v14 = vsel %vm547_vm0, %v2035_v6, %v1616_v61  ;;  %v580_v15 = vsel %vm547_vm0, %v2011_v47, %v1615_v62  ;;  %1458 = vmatprep.subr.bf16.mxu1 %v1720_v57 }
  0xde   : > { %v1624_v63 = vpop.permute.xlu0 %1623  ;;  %v1631_v2 = vunpack.i.h.bf16 %v1629_v60  ;;  %v1630_v3 = vunpack.i.l.bf16 %v1629_v60  ;;  %1459 = vmatpush3.bf16.msra.mxu1 %v1720_v57 }
  0xdf   : > { %v1626_v4 = vunpack.i.h.bf16 %v1624_v63  ;;  %v1625_v5 = vunpack.i.l.bf16 %v1624_v63  ;;  %v1721_v63 = vld [vmem:[#allocation7 + $0x10] sm:$0xff]  }
  0xe0   : > { %v563_v0 = vsel %vm556_vm1, %v554_v7, %v1630_v3  ;;  %v564_v1 = vsel %vm556_vm1, %v555_v9, %v1631_v2  ;;  %1460 = vmatprep.subr.bf16.mxu1 %v1721_v63 }
  0xe1   : > { %v1639_v10 = vpop.permute.xlu1 %1638  ;;  %v588_v39 = vsel %vm556_vm1, %v580_v15, %v1625_v5  ;;  %v589_v40 = vsel %vm556_vm1, %v581_v14, %v1626_v4 }
  0xe2   : > { %v1641_v16 = vunpack.i.h.bf16 %v1639_v10  ;;  %v1640_v17 = vunpack.i.l.bf16 %v1639_v10  ;;  %v1634_v18 = vpop.permute.xlu0 %1633  ;;  %1461 = vmatpush3.bf16.msra.mxu1 %v1721_v63 }
  0xe3   : > { %v1636_v19 = vunpack.i.h.bf16 %v1634_v18  ;;  %v1635_v28 = vunpack.i.l.bf16 %v1634_v18 }
  0xe4   : > { %v572_v22 = vsel %vm565_vm2, %v563_v0, %v1640_v17  ;;  %v573_v6 = vsel %vm565_vm2, %v564_v1, %v1641_v16  ;;  %v1722_v16 = vld [vmem:[#allocation7 + $0x8] sm:$0xff]  }
  0xe5   : > { %v596_v13 = vsel %vm565_vm2, %v588_v39, %v1635_v28  ;;  %v597_v47 = vsel %vm565_vm2, %v589_v40, %v1636_v19  ;;  %v607_v23 = vpack.c.bf16 %v573_v6, %v572_v22  ;;  %1462 = vmatprep.subr.bf16.mxu1 %v1722_v16  ;;  %v1723_v22 = vld [vmem:[#allocation7] sm:$0xff]  }
  0xe6   : > { %v608_v24 = vpack.c.bf16 %v597_v47, %v596_v13  ;;  %1463 = vmatpush3.bf16.msra.mxu1 %v1722_v16 }
  0xe7   : > { %1464 = vmatprep.subr.bf16.mxu1 %v1723_v22 }
  0xe8   : > { %829 = vmatprep.mubr.bf16.mxu0 %v608_v24 }
  0xe9   : > { %830 = vmatmul.mubr.bf16.gmra.mxu0 %v607_v23 }
  0xea   : > { %1465 = vmatpush3.bf16.msra.mxu1 %v1723_v22 }
 0x10d   : > { %v1452_v26 = vpop.f32.mrf.mxu1 }
 0x10f   : > { %v872_v29 = vpop.f32.mrf.mxu1 }
 0x111   : > { %v1453_v35 = vpop.f32.mrf.mxu1 }
 0x113   : > { %v875_v42 = vpop.f32.mrf.mxu1 }
 0x115   : > { %v1456_v52 = vpop.f32.mrf.mxu1 }
 0x117   : > { %v888_v59 = vpop.f32.mrf.mxu1 }
 0x119   : > { %v1457_v3 = vpop.f32.mrf.mxu1 }
 0x11b   : > { %v891_v17 = vpop.f32.mrf.mxu1 }
 0x185   : > { %v1408_v27 = vpop.f32.mrf.mxu0 }
 0x187   : > { %v1409_v31 = vpop.f32.mrf.mxu0 }
 0x188   : > { %v1410_v33 = vadd.f32 %v1409_v31, %v1408_v27 }
 0x189   : > { %v1411_v34 = vpop.f32.mrf.mxu0 }
 0x18a   : > { %v808_v36 = vadd.f32 %v1410_v33, %v2119_v32 }
 0x18b   : > { %v1412_v37 = vpop.f32.mrf.mxu0 }
 0x18c   : > { %v1413_v38 = vadd.f32 %v1412_v37, %v1411_v34  ;;  %v873_v41 = vadd.f32 %v872_v29, %v808_v36 }
 0x18e   : > { %v903_v43 = vmax.f32 %v873_v41, 0.0  ;;  %v811_v44 = vadd.f32 %v1413_v38, %v2119_v32 }
 0x190   : > { %911 = vst.msk [vmem:[#allocation2] sm:$0xff] %vm270_vm3, %v903_v43  ;;  %v876_v45 = vadd.f32 %v875_v42, %v811_v44 }
 0x191   : > { %v1414_v11 = vpop.f32.mrf.mxu0 }
 0x192   : > { %v904_v48 = vmax.f32 %v876_v45, 0.0 }
 0x193   : > { %v1415_v8 = vpop.f32.mrf.mxu0 }
 0x194   : > { %912 = vst.msk [vmem:[#allocation2 + $0x10] sm:$0xff] %vm270_vm3, %v904_v48  ;;  %v1416_v49 = vadd.f32 %v1415_v8, %v1414_v11 }
 0x195   : > { %v1417_v12 = vpop.f32.mrf.mxu0 }
 0x196   : > { %v816_v50 = vadd.f32 %v1416_v49, %v2119_v32 }
 0x197   : > { %v1418_v51 = vpop.f32.mrf.mxu0  ;;  %v927_v30 = vld [vmem:[#allocation2 + $0x1] sm:$0xff] }
 0x198   : > { %v881_v20 = vadd.f32 %v1452_v26, %v816_v50  ;;  %v1419_v21 = vadd.f32 %v1418_v51, %v1417_v12  ;;  %v943_v51 = vld [vmem:[#allocation2 + $0x80] sm:$0xff] }
 0x199   : > { %v919_v57 = vld [vmem:[#allocation2] sm:$0xff] }
 0x19a   : > { %v905_v46 = vmax.f32 %v881_v20, 0.0  ;;  %v819_v53 = vadd.f32 %v1419_v21, %v2119_v32  ;;  %v951_v21 = vld [vmem:[#allocation2 + $0x81] sm:$0xff] }
 0x19b   : > { %v928_v54 = vld [vmem:[#allocation2 + $0x11] sm:$0xff] }
 0x19c   : > { %913 = vst.msk [vmem:[#allocation2 + $0x20] sm:$0xff] %vm270_vm3, %v905_v46  ;;  %v884_v55 = vadd.f32 %v1453_v35, %v819_v53  ;;  %v1642_v56 = vpack.i.bf16 %v928_v54, %v927_v30  ;;  %v2131_v7 = vld [vmem:[#allocation2 + $0x10] sm:$0xff] }
 0x19d   : > { %v1420_v58 = vpop.f32.mrf.mxu0 }
 0x19e   : > { %v906_v60 = vmax.f32 %v884_v55, 0.0  ;;  %1643 = vrot.lane.b32.xlu0 %v1642_v56, %s1827_s25 }
 0x19f   : > { %v1421_v61 = vpop.f32.mrf.mxu0 }
 0x1a0   : > { %914 = vst.msk [vmem:[#allocation2 + $0x30] sm:$0xff] %vm270_vm3, %v906_v60  ;;  %v1422_v62 = vadd.f32 %v1421_v61, %v1420_v58 }
 0x1a1   : > { %v1423_v2 = vpop.f32.mrf.mxu0 }
 0x1a2   : > { %v824_v4 = vadd.f32 %v1422_v62, %v2119_v32 }
 0x1a3   : > { %v1424_v5 = vpop.f32.mrf.mxu0  ;;  %v2133_v9 = vld [vmem:[#allocation2 + $0x20] sm:$0xff] }
 0x1a4   : > { %v1425_v10 = vadd.f32 %v1424_v5, %v1423_v2  ;;  %v889_v14 = vadd.f32 %v888_v59, %v824_v4  ;;  %v1647_v15 = vpack.i.bf16 %v2133_v9, %v2131_v7  ;;  %v929_v18 = vld [vmem:[#allocation2 + $0x21] sm:$0xff] }
 0x1a5   : > { %v1652_v40 = vpack.i.bf16 %v929_v18, %v928_v54 }
 0x1a6   : > { %v907_v0 = vmax.f32 %v889_v14, 0.0  ;;  %1648 = vrot.lane.b32.xlu0 %v1647_v15, %s1824_s23  ;;  %v827_v1 = vadd.f32 %v1425_v10, %v2119_v32 }
 0x1a7   : > { %v930_v19 = vld [vmem:[#allocation2 + $0x31] sm:$0xff] }
 0x1a8   : > { %915 = vst.msk [vmem:[#allocation2 + $0x40] sm:$0xff] %vm270_vm3, %v907_v0  ;;  %v892_v28 = vadd.f32 %v891_v17, %v827_v1  ;;  %v1657_v39 = vpack.i.bf16 %v930_v19, %v929_v18  ;;  %v938_v27 = vld [vmem:[#allocation2 + $0x30] sm:$0xff] }
 0x1a9   : > { %v1426_v6 = vpop.f32.mrf.mxu0 }
 0x1aa   : > { %v908_v13 = vmax.f32 %v892_v28, 0.0  ;;  %1658 = vrot.lane.b32.xlu1 %v1657_v39, %s1827_s25  ;;  %1653 = vrot.lane.b32.xlu0 %v1652_v40, %s1828_s26 }
 0x1ab   : > { %v1427_v47 = vpop.f32.mrf.mxu0 }
 0x1ac   : > { %916 = vst.msk [vmem:[#allocation2 + $0x50] sm:$0xff] %vm270_vm3, %v908_v13  ;;  %v1428_v23 = vadd.f32 %v1427_v47, %v1426_v6 }
 0x1ad   : > { %v1429_v24 = vpop.f32.mrf.mxu0 }
 0x1ae   : > { %v832_v25 = vadd.f32 %v1428_v23, %v2119_v32 }
 0x1af   : > { %v1430_v26 = vpop.f32.mrf.mxu0  ;;  %v2144_v29 = vld [vmem:[#allocation2 + $0x40] sm:$0xff] }
 0x1b0   : > { %v897_v31 = vadd.f32 %v1456_v52, %v832_v25  ;;  %v1431_v33 = vadd.f32 %v1430_v26, %v1429_v24  ;;  %v1662_v34 = vpack.i.bf16 %v2144_v29, %v938_v27  ;;  %v947_v35 = vld [vmem:[#allocation2 + $0x41] sm:$0xff] }
 0x1b1   : > { %v1667_v42 = vpack.i.bf16 %v947_v35, %v930_v19 }
 0x1b2   : > { %v909_v36 = vmax.f32 %v897_v31, 0.0  ;;  %v835_v37 = vadd.f32 %v1431_v33, %v2119_v32  ;;  %1663 = vrot.lane.b32.xlu1 %v1662_v34, %s1824_s23 }
 0x1b3   : > { %v932_v38 = vld [vmem:[#allocation2 + $0x51] sm:$0xff] }
 0x1b4   : > { %917 = vst.msk [vmem:[#allocation2 + $0x60] sm:$0xff] %vm270_vm3, %v909_v36  ;;  %v900_v41 = vadd.f32 %v1457_v3, %v835_v37  ;;  %v1672_v43 = vpack.i.bf16 %v932_v38, %v947_v35  ;;  %v940_v45 = vld [vmem:[#allocation2 + $0x50] sm:$0xff] }
 0x1b6   : > { %v910_v44 = vmax.f32 %v900_v41, 0.0  ;;  %1668 = vrot.lane.b32.xlu1 %v1667_v42, %s1828_s26  ;;  %1673 = vrot.lane.b32.xlu0 %v1672_v43, %s1827_s25 }
 0x1b8   : > { %918 = vst.msk [vmem:[#allocation2 + $0x70] sm:$0xff] %vm270_vm3, %v910_v44 }
 0x1bb   : > { %v2153_v11 = vld [vmem:[#allocation2 + $0x60] sm:$0xff] }
 0x1bc   : > { %v1677_v32 = vpack.i.bf16 %v2153_v11, %v940_v45  ;;  %v933_v48 = vld [vmem:[#allocation2 + $0x61] sm:$0xff] }
 0x1bd   : > { %v1692_v12 = vpack.i.bf16 %v933_v48, %v932_v38 }
 0x1be   : > { %1678 = vrot.lane.b32.xlu0 %v1677_v32, %s1824_s23 }
 0x1bf   : > { %v934_v8 = vld [vmem:[#allocation2 + $0x71] sm:$0xff] }
 0x1c0   : > { %v1682_v49 = vpack.i.bf16 %v934_v8, %v933_v48  ;;  %v2157_v50 = vld [vmem:[#allocation2 + $0x70] sm:$0xff]  ;;  %v1697_v52 = vpack.i.bf16 %v951_v21, %v934_v8 }
 0x1c1   : > { %v1687_v20 = vpack.i.bf16 %v943_v51, %v2157_v50 }
 0x1c2   : > { %1683 = vrot.lane.b32.xlu1 %v1682_v49, %s1827_s25  ;;  %1693 = vrot.lane.b32.xlu0 %v1692_v12, %s1828_s26 }
 0x1c6   : > { %1688 = vrot.lane.b32.xlu1 %v1687_v20, %s1824_s23 }
 0x1ca   : > { %1698 = vrot.lane.b32.xlu1 %v1697_v52, %s1828_s26 }
 0x210   : > { %v1644_v46 = vpop.permute.xlu0 %1643 }
 0x211   : > { %v1646_v30 = vunpack.i.h.bf16 %v1644_v46  ;;  %v1645_v54 = vunpack.i.l.bf16 %v1644_v46 }
 0x213   : > { %v1049_v59 = vsel %vm270_vm3, %v2131_v7, %v1646_v30  ;;  %v1048_v60 = vsel %vm270_vm3, %v919_v57, %v1645_v54 }
 0x218   : > { %v1649_v53 = vpop.permute.xlu0 %1648 }
 0x219   : > { %v1651_v55 = vunpack.i.h.bf16 %v1649_v53  ;;  %v1650_v56 = vunpack.i.l.bf16 %v1649_v53 }
 0x21b   : > { %v1056_v63 = vsel %vm547_vm0, %v1048_v60, %v1650_v56  ;;  %v1057_v2 = vsel %vm547_vm0, %v1049_v59, %v1651_v55 }
 0x21c   : > { %v1654_v58 = vpop.permute.xlu0 %1653  ;;  %v1659_v5 = vpop.permute.xlu1 %1658 }
 0x21d   : > { %v1656_v61 = vunpack.i.h.bf16 %v1654_v58  ;;  %v1655_v62 = vunpack.i.l.bf16 %v1654_v58  ;;  %v1661_v15 = vunpack.i.h.bf16 %v1659_v5  ;;  %v1660_v16 = vunpack.i.l.bf16 %v1659_v5 }
 0x21f   : > { %v1065_v3 = vsel %vm1064_vm4, %v1056_v63, %v1655_v62  ;;  %v1066_v4 = vsel %vm1064_vm4, %v1057_v2, %v1656_v61  ;;  %v1051_v0 = vsel %vm270_vm3, %v938_v27, %v1661_v15  ;;  %v1050_v1 = vsel %vm270_vm3, %v2133_v9, %v1660_v16 }
 0x220   : > { %v1073_v10 = vpack.c.bf16 %v1066_v4, %v1065_v3 }
 0x222   : > { %1466 = vmatprep.mubr.msk.bf16.mxu1 %vm556_vm1, %v1073_v10 }
 0x224   : > { %v1664_v14 = vpop.permute.xlu1 %1663 }
 0x225   : > { %v1666_v7 = vunpack.i.h.bf16 %v1664_v14  ;;  %v1665_v17 = vunpack.i.l.bf16 %v1664_v14 }
 0x227   : > { %v1058_v39 = vsel %vm547_vm0, %v1050_v1, %v1665_v17  ;;  %v1059_v40 = vsel %vm547_vm0, %v1051_v0, %v1666_v7 }
 0x228   : > { %v1669_v18 = vpop.permute.xlu1 %1668  ;;  %v1674_v47 = vpop.permute.xlu0 %1673 }
 0x229   : > { %v1671_v19 = vunpack.i.h.bf16 %v1669_v18  ;;  %v1670_v28 = vunpack.i.l.bf16 %v1669_v18  ;;  %v1676_v24 = vunpack.i.h.bf16 %v1674_v47  ;;  %v1675_v25 = vunpack.i.l.bf16 %v1674_v47 }
 0x22b   : > { %v1067_v22 = vsel %vm1064_vm4, %v1058_v39, %v1670_v28  ;;  %v1068_v6 = vsel %vm1064_vm4, %v1059_v40, %v1671_v19  ;;  %v1053_v33 = vsel %vm270_vm3, %v940_v45, %v1676_v24  ;;  %v1052_v34 = vsel %vm270_vm3, %v2144_v29, %v1675_v25 }
 0x22c   : > { %v1074_v13 = vpack.c.bf16 %v1068_v6, %v1067_v22 }
 0x22e   : > { %1467 = vmatmul.mubr.msk.bf16.vlgmr.msra.gmra.mxu1 %vm556_vm1, %v1074_v13 }
 0x230   : > { %v1679_v23 = vpop.permute.xlu0 %1678 }
 0x231   : > { %v1681_v26 = vunpack.i.h.bf16 %v1679_v23  ;;  %v1680_v27 = vunpack.i.l.bf16 %v1679_v23 }
 0x233   : > { %v1060_v37 = vsel %vm547_vm0, %v1052_v34, %v1680_v27  ;;  %v1061_v38 = vsel %vm547_vm0, %v1053_v33, %v1681_v26 }
 0x234   : > { %v1684_v9 = vpop.permute.xlu1 %1683  ;;  %v1694_v31 = vpop.permute.xlu0 %1693 }
 0x235   : > { %v1696_v35 = vunpack.i.h.bf16 %v1694_v31  ;;  %v1695_v36 = vunpack.i.l.bf16 %v1694_v31  ;;  %v1686_v32 = vunpack.i.h.bf16 %v1684_v9  ;;  %v1685_v48 = vunpack.i.l.bf16 %v1684_v9 }
 0x237   : > { %v1069_v41 = vsel %vm1064_vm4, %v1060_v37, %v1695_v36  ;;  %v1070_v42 = vsel %vm1064_vm4, %v1061_v38, %v1696_v35  ;;  %v1055_v49 = vsel %vm270_vm3, %v2157_v50, %v1686_v32  ;;  %v1054_v12 = vsel %vm270_vm3, %v2153_v11, %v1685_v48  ;;  %v1381_v11 = vld [vmem:[%s2219_s4] ss:$0 sm:$0xff] }
 0x238   : > { %v1075_v43 = vpack.c.bf16 %v1070_v42, %v1069_v41  ;;  %v1689_v44 = vpop.permute.xlu1 %1688 }
 0x239   : > { %v1691_v8 = vunpack.i.h.bf16 %v1689_v44  ;;  %v1690_v45 = vunpack.i.l.bf16 %v1689_v44 }
 0x23a   : > { %1470 = vmatprep.mubr.msk.bf16.mxu1 %vm556_vm1, %v1075_v43 }
 0x23b   : > { %v1063_v21 = vsel %vm547_vm0, %v1055_v49, %v1691_v8  ;;  %v1062_v52 = vsel %vm547_vm0, %v1054_v12, %v1690_v45 }
 0x23c   : > { %v1699_v29 = vpop.permute.xlu1 %1698 }
 0x23d   : > { %v1701_v51 = vunpack.i.h.bf16 %v1699_v29  ;;  %v1700_v20 = vunpack.i.l.bf16 %v1699_v29 }
 0x23f   : > { %v1071_v46 = vsel %vm1064_vm4, %v1062_v52, %v1700_v20  ;;  %v1072_v53 = vsel %vm1064_vm4, %v1063_v21, %v1701_v51 }
 0x240   : > { %v1076_v30 = vpack.c.bf16 %v1072_v53, %v1071_v46 }
 0x242   : > { %1471 = vmatmul.mubr.msk.bf16.gmra.mxu1 %vm556_vm1, %v1076_v30 }
 0x2ee   : > { %v1468_v50 = vpop.f32.mrf.mxu1 }
 0x2ef   : > { %v1171_v54 = vadd.f32 %v1468_v50, %v1381_v11 }
 0x2f0   : > { %v1162_v55 = vpop.f32.mrf.mxu1 }
 0x2f1   : > { %v1195_v56 = vmax.f32 %v1171_v54, 0.0  ;;  %v1163_v57 = vadd.f32 %v1381_v11, %v1162_v55 }
 0x2f2   : > { %v1469_v58 = vpop.f32.mrf.mxu1 }
 0x2f3   : > { %1203 = vst.msk [vmem:[%s266_s8 + $0x10] sm:$0xff] %vm556_vm1, %v1195_v56  ;;  %v1193_v59 = vmax.f32 %v1163_v57, 0.0  ;;  %v1174_v60 = vadd.f32 %v1469_v58, %v1381_v11 }
 0x2f4   : > { %v1165_v61 = vpop.f32.mrf.mxu1 }
 0x2f5   : > { %1201 = vst.msk [vmem:[%s266_s8] sm:$0xff] %vm556_vm1, %v1193_v59  ;;  %v1196_v62 = vmax.f32 %v1174_v60, 0.0  ;;  %v1166_v63 = vadd.f32 %v1381_v11, %v1165_v61 }
 0x2f7   : > { %1204 = vst.msk [vmem:[%s266_s8 + $0x18] sm:$0xff] %vm556_vm1, %v1196_v62  ;;  %v1194_v2 = vmax.f32 %v1166_v63, 0.0 }
 0x2f9   : > { %1202 = vst.msk [vmem:[%s266_s8 + $0x8] sm:$0xff] %vm556_vm1, %v1194_v2 }
 0x302   : > { %v1472_v3 = vpop.f32.mrf.mxu1 }
 0x303   : > { %v1187_v4 = vadd.f32 %v1472_v3, %v1381_v11 }
 0x304   : > { %v1178_v5 = vpop.f32.mrf.mxu1 }
 0x305   : > { %v1199_v10 = vmax.f32 %v1187_v4, 0.0  ;;  %v1179_v14 = vadd.f32 %v1381_v11, %v1178_v5 }
 0x306   : > { %v1473_v15 = vpop.f32.mrf.mxu1 }
 0x307   : > { %1207 = vst.msk [vmem:[%s266_s8 + $0x30] sm:$0xff] %vm556_vm1, %v1199_v10  ;;  %v1197_v16 = vmax.f32 %v1179_v14, 0.0  ;;  %v1190_v7 = vadd.f32 %v1473_v15, %v1381_v11 }
 0x308   : > { %v1181_v17 = vpop.f32.mrf.mxu1 }
 0x309   : > { %1205 = vst.msk [vmem:[%s266_s8 + $0x20] sm:$0xff] %vm556_vm1, %v1197_v16  ;;  %v1200_v18 = vmax.f32 %v1190_v7, 0.0  ;;  %v1182_v0 = vadd.f32 %v1381_v11, %v1181_v17 }
 0x30b   : > { %1208 = vst.msk [vmem:[%s266_s8 + $0x38] sm:$0xff] %vm556_vm1, %v1200_v18  ;;  %v1198_v1 = vmax.f32 %v1182_v0, 0.0 }
 0x30d   : > { %1206 = vst.msk [vmem:[%s266_s8 + $0x28] sm:$0xff] %vm556_vm1, %v1198_v1 }
 0x30e PF: > { %s17_s18 = sadd.s32 1, %s1816_s18  }
 0x30f   : > { %p14_p9 = scmp.ge.s32.totalorder %s17_s18, 4  }
 0x311   :  { %16 = sbr.rel (!%p14_p9) target bundleno = 2 (0x2), region = 87 }
 0x316   :  { %1231 = vsyncpa [#allocation4], 1 }
 0x317   :  { %1233 = vsyncpa [#allocation4 + $0x1], 1 }
 0x318   :  { %1234 = vsyncpa [#allocation6], 1 }

// kernel: custom_ae_forward.3
= control target key start
LH: loop header
LB: loop body
LE: loop exit
PB: predicated region body
PF: predicated region fallthrough
CT: control target
= control target key end

     0   :  { %s4503_s18 = smov 0   ;;  %s5786_s0 = inlined_call_operand.vmem [shape: f32[2,18,18,16], index: 0, kind: input, shape index: {}]   ;;  %s5787_s1 = inlined_call_operand.vmem [shape: bf16[144,16], index: 1, kind: input, shape index: {}]   ;;  %s5788_s2 = inlined_call_operand.vmem [shape: f32[1,16], index: 2, kind: input, shape index: {}]   ;;  %s5789_s3 = inlined_call_operand.vmem [shape: bf16[64,12], index: 3, kind: input, shape index: {}]   ;;  %s5790_s4 = inlined_call_operand.vmem [shape: f32[1,12], index: 4, kind: input, shape index: {}]   ;;  %s5791_s5 = inlined_call_operand.vmem [shape: f32[512,12], index: 5, kind: output, shape index: {}]  }
   0x1 LB: > { %s4509_s19 = sadd.s32 4294967295, %s4462_s18   ;;  %p3174_p0 = scmp.ge.s32.totalorder %s4462_s18, 1  ;;  %s4462_s18 = sphi %s4503_s18, %s15_s18  }
   0x2   : > { %p187_p1 = scmp.lt.s32.totalorder %s4462_s18, 3 }
   0x4   : > { %p188_p2 = pnand %p3174_p0, %p187_p1 }
   0x5   : > { %p215_p3 = scmp.lt.s32.totalorder (!%p188_p2), %s4509_s19, 1  ;;  %s4465_s6 = smov (!%p188_p2), 48  }
   0x6   : > { %191 = sbr.rel (%p188_p2) target bundleno = 980 (0x3d4), region = 40  ;;  %s4466_s9 = smov (!%p188_p2), 16  }
   0x7   : > { %s4467_s10 = smov (!%p188_p2), 64   ;;  %s4468_s13 = smov (!%p188_p2), 32  }
   0x8   : > { %s4469_s14 = smov (!%p188_p2), 96   ;;  %s4470_s17 = smov (!%p188_p2), 80  }
   0x9   : > { %s4471_s20 = smov (!%p188_p2), 112  }
   0xb   : > { %v4315_v0 = vld [vmem:[%s5787_s1 + $0x38] sm:$0xff]   ;;  %v4464_v1 = vmov 0   ;;  %s216_s22 = scalar_select %p215_p3, %s4509_s19, 1  ;;  %v4316_v2 = vld [vmem:[%s5787_s1 + $0x30] sm:$0xff]   ;;  %v4317_v3 = vld [vmem:[%s5787_s1 + $0x28] sm:$0xff]   ;;  %vm228_vm0 = vcmask 130048  }
   0xc   : > { %1823 = vmatprep.subr.bf16.mxu0 %v4464_v1  ;;  %3479 = vmatprep.subr.bf16.mxu1 %v4464_v1  ;;  %v4318_v15 = vld [vmem:[%s5787_s1 + $0x20] sm:$0xff]   ;;  %v4319_v25 = vld [vmem:[%s5787_s1 + $0x18] sm:$0xff]   ;;  %v4320_v29 = vld [vmem:[%s5787_s1 + $0x10] sm:$0xff]   ;;  %vm1466_vm1 = vcmask 261120   ;;  %vm1499_vm2 = vcmask 392192   ;;  %vm1532_vm3 = vcmask 523264  }
   0xd   : > { %1824 = vmatpush1.bf16.msra.mxu0 %v4315_v0  ;;  %3488 = vmatpush1.bf16.msra.mxu1 %v4315_v0  ;;  %s3497_s25 = smul.u32 432, %s216_s22  ;;  %v4321_v39 = vld [vmem:[%s5787_s1 + $0x8] sm:$0xff]   ;;  %v4322_v41 = vld [vmem:[%s5787_s1] sm:$0xff]   ;;  %vm1565_vm4 = vcmask 654336   ;;  %vm1598_vm5 = vcmask 785408   ;;  %vm1631_vm6 = vcmask 916480  }
   0xe   : > { %1825 = vmatprep.subr.bf16.mxu0 %v4464_v1  ;;  %3480 = vmatprep.subr.bf16.mxu1 %v4464_v1  ;;  %v4323_v43 = vld [vmem:[%s5787_s1 + $0x40] sm:$0xff]   ;;  %vm3081_vm7 = vcmask 97280  }
   0xf   : > { %s4528_s28 = scalar_lea.vmem %s5786_s0, %s3497_s25 }
  0x10   : > { %v4534_v4 = vld [vmem:[%s4528_s28 + $0x18] sm:$0xff]  ;;  %v4537_v5 = vld [vmem:[%s4528_s28 + $0x20] sm:$0xff]  ;;  %v281_v8 = vld [vmem:[%s4528_s28 + $0x9] sm:$0xff] }
  0x11   : > { %1826 = vmatpush1.bf16.msra.mxu0 %v4316_v2  ;;  %3489 = vmatpush1.bf16.msra.mxu1 %v4316_v2  ;;  %v280_v6 = vld [vmem:[%s4528_s28 + $0x1] sm:$0xff]  ;;  %v3525_v7 = vpack.i.bf16 %v4537_v5, %v4534_v4  ;;  %v3210_v9 = vld [vmem:[%s4528_s28 + $0x19] sm:$0xff]  ;;  %v313_v13 = vld [vmem:[%s4528_s28 + $0xa] sm:$0xff] }
  0x12   : > { %1827 = vmatprep.subr.bf16.mxu0 %v4464_v1  ;;  %3481 = vmatprep.subr.bf16.mxu1 %v4464_v1  ;;  %v3211_v10 = vld [vmem:[%s4528_s28 + $0x21] sm:$0xff]  ;;  %v3515_v11 = vpack.i.bf16 %v281_v8, %v280_v6  ;;  %v4555_v17 = vld [vmem:[%s4528_s28 + $0x30] sm:$0xff]  ;;  %v4558_v18 = vld [vmem:[%s4528_s28 + $0x38] sm:$0xff] }
  0x13   : > { %v312_v12 = vld [vmem:[%s4528_s28 + $0x2] sm:$0xff]  ;;  %3526 = vrot.lane.b32.xlu1 %v3525_v7, %s4465_s6  ;;  %v3530_v14 = vpack.i.bf16 %v3211_v10, %v3210_v9  ;;  %v3242_v19 = vld [vmem:[%s4528_s28 + $0x1a] sm:$0xff]  ;;  %v3244_v21 = vld [vmem:[%s4528_s28 + $0x32] sm:$0xff]  ;;  %v3540_v24 = vpack.i.bf16 %v4558_v18, %v4555_v17 }
  0x14   : > { %3516 = vrot.lane.b32.xlu0 %v3515_v11, %s4466_s9  ;;  %v3520_v16 = vpack.i.bf16 %v313_v13, %v312_v12  ;;  %v3243_v20 = vld [vmem:[%s4528_s28 + $0x22] sm:$0xff]  ;;  %v3245_v22 = vld [vmem:[%s4528_s28 + $0x3a] sm:$0xff]  ;;  %v3306_v27 = vld [vmem:[%s4528_s28 + $0x31] sm:$0xff] }
  0x15   : > { %1828 = vmatpush1.bf16.msra.mxu0 %v4317_v3  ;;  %3490 = vmatpush1.bf16.msra.mxu1 %v4317_v3  ;;  %v1665_v23 = vpack.c.bf16 %v3245_v22, %v3244_v21  ;;  %v3535_v26 = vpack.i.bf16 %v3243_v20, %v3242_v19  ;;  %v3307_v28 = vld [vmem:[%s4528_s28 + $0x39] sm:$0xff]  ;;  %v4589_v31 = vld [vmem:[%s4528_s28 + $0x4a] sm:$0xff]  ;;  %v3570_v34 = vpack.i.bf16 %v3245_v22, %v3244_v21  ;;  %v4635_v46 = vld [vmem:[%s4528_s28 + $0x62] sm:$0xff] }
  0x16   : > { %1829 = vmatprep.subr.bf16.mxu0 %v4464_v1  ;;  %3482 = vmatprep.subr.bf16.mxu1 %v4464_v1  ;;  %v3545_v30 = vpack.i.bf16 %v3307_v28, %v3306_v27  ;;  %v4592_v32 = vld [vmem:[%s4528_s28 + $0x52] sm:$0xff]  ;;  %v3308_v35 = vld [vmem:[%s4528_s28 + $0x49] sm:$0xff]  ;;  %v4626_v44 = vld [vmem:[%s4528_s28 + $0x60] sm:$0xff] }
  0x17   : > { %3531 = vrot.lane.b32.xlu1 %v3530_v14, %s4467_s10  ;;  %3380 = vmatprep.mubr.msk.bf16.mxu0 %vm228_vm0, %v1665_v23  ;;  %v1667_v33 = vpack.c.bf16 %v4592_v32, %v4589_v31  ;;  %v3309_v36 = vld [vmem:[%s4528_s28 + $0x51] sm:$0xff]  ;;  %v4602_v37 = vld [vmem:[%s4528_s28 + $0x48] sm:$0xff]  ;;  %v3605_v50 = vpack.i.bf16 %v4592_v32, %v4589_v31  ;;  %v4655_v54 = vld [vmem:[%s4528_s28 + $0x7a] sm:$0xff] }
  0x18   : > { %3521 = vrot.lane.b32.xlu0 %v3520_v16, %s4468_s13  ;;  %v4605_v38 = vld [vmem:[%s4528_s28 + $0x50] sm:$0xff]  ;;  %v3580_v40 = vpack.i.bf16 %v3309_v36, %v3308_v35  ;;  %v4629_v45 = vld [vmem:[%s4528_s28 + $0x68] sm:$0xff]  ;;  %v3312_v58 = vld [vmem:[%s4528_s28 + $0x79] sm:$0xff] }
  0x19   : > { %1830 = vmatpush1.bf16.msra.mxu0 %v4318_v15  ;;  %3491 = vmatpush1.bf16.msra.mxu1 %v4318_v15  ;;  %v3575_v42 = vpack.i.bf16 %v4605_v38, %v4602_v37  ;;  %v4638_v47 = vld [vmem:[%s4528_s28 + $0x6a] sm:$0xff]  ;;  %v3610_v49 = vpack.i.bf16 %v4629_v45, %v4626_v44  ;;  %v3310_v51 = vld [vmem:[%s4528_s28 + $0x61] sm:$0xff]  ;;  %v4669_v60 = vld [vmem:[%s4528_s28 + $0x78] sm:$0xff] }
  0x1a   : > { %1831 = vmatprep.subr.bf16.mxu0 %v4464_v1  ;;  %3483 = vmatprep.subr.bf16.mxu1 %v4464_v1  ;;  %v1669_v48 = vpack.c.bf16 %v4638_v47, %v4635_v46  ;;  %v3311_v52 = vld [vmem:[%s4528_s28 + $0x69] sm:$0xff]  ;;  %v3640_v57 = vpack.i.bf16 %v4638_v47, %v4635_v46  ;;  %v3313_v59 = vld [vmem:[%s4528_s28 + $0x81] sm:$0xff]  ;;  %v4685_v2 = vld [vmem:[%s4528_s28 + $0x92] sm:$0xff] }
  0x1b   : > { %3541 = vrot.lane.b32.xlu1 %v3540_v24, %s4469_s14  ;;  %v3615_v53 = vpack.i.bf16 %v3311_v52, %v3310_v51  ;;  %v4658_v55 = vld [vmem:[%s4528_s28 + $0x82] sm:$0xff]  ;;  %v3650_v62 = vpack.i.bf16 %v3313_v59, %v3312_v58  ;;  %v3282_v0 = vld [vmem:[%s4528_s28 + $0x90] sm:$0xff]  ;;  %v4688_v3 = vld [vmem:[%s4528_s28 + $0x9a] sm:$0xff] }
  0x1c   : > { %3536 = vrot.lane.b32.xlu0 %v3535_v26, %s4470_s17  ;;  %v1671_v56 = vpack.c.bf16 %v4658_v55, %v4655_v54  ;;  %v4672_v61 = vld [vmem:[%s4528_s28 + $0x80] sm:$0xff]  ;;  %v1673_v6 = vpack.c.bf16 %v4688_v3, %v4685_v2  ;;  %v3675_v8 = vpack.i.bf16 %v4658_v55, %v4655_v54  ;;  %v3314_v9 = vld [vmem:[%s4528_s28 + $0x91] sm:$0xff]  ;;  %v3710_v15 = vpack.i.bf16 %v4688_v3, %v4685_v2  ;;  %v3316_v16 = vld [vmem:[%s4528_s28 + $0xa9] sm:$0xff] }
  0x1d   : > { %1832 = vmatpush1.bf16.msra.mxu0 %v4319_v25  ;;  %3492 = vmatpush1.bf16.msra.mxu1 %v4319_v25  ;;  %v3645_v63 = vpack.i.bf16 %v4672_v61, %v4669_v60  ;;  %v3315_v10 = vld [vmem:[%s4528_s28 + $0x99] sm:$0xff]  ;;  %v4703_v12 = vld [vmem:[%s4528_s28 + $0xaa] sm:$0xff]  ;;  %v3318_v28 = vld [vmem:[%s4528_s28 + $0xc1] sm:$0xff] }
  0x1e   : > { %1833 = vmatprep.subr.bf16.mxu0 %v4464_v1  ;;  %3484 = vmatprep.subr.bf16.mxu1 %v4464_v1  ;;  %v3685_v11 = vpack.i.bf16 %v3315_v10, %v3314_v9  ;;  %v4706_v13 = vld [vmem:[%s4528_s28 + $0xb2] sm:$0xff]  ;;  %v3284_v20 = vld [vmem:[%s4528_s28 + $0xa8] sm:$0xff] }
  0x1f   : > { %3551 = vrot.lane.b32.xlu1 %v3530_v14, %s4466_s9  ;;  %v1675_v14 = vpack.c.bf16 %v4706_v13, %v4703_v12  ;;  %v3317_v19 = vld [vmem:[%s4528_s28 + $0xb1] sm:$0xff]  ;;  %v3287_v25 = vld [vmem:[%s4528_s28 + $0xc8] sm:$0xff]  ;;  %v3745_v27 = vpack.i.bf16 %v4706_v13, %v4703_v12  ;;  %v3323_v10 = vld [vmem:[%s4528_s28 + $0xf9] sm:$0xff] }
  0x20   : > { %3546 = vrot.lane.b32.xlu0 %v3545_v30, %s4471_s20  ;;  %v3285_v21 = vld [vmem:[%s4528_s28 + $0xb0] sm:$0xff]  ;;  %v3720_v22 = vpack.i.bf16 %v3317_v19, %v3316_v16  ;;  %v3291_v51 = vld [vmem:[%s4528_s28 + $0xf8] sm:$0xff]  ;;  %v336_v31 = vld [vmem:[%s4528_s28 + $0x122] sm:$0xff] }
  0x21   : > { %1834 = vmatpush1.bf16.msra.mxu0 %v4320_v29  ;;  %3493 = vmatpush1.bf16.msra.mxu1 %v4320_v29  ;;  %v3715_v23 = vpack.i.bf16 %v3285_v21, %v3284_v20  ;;  %v3319_v29 = vld [vmem:[%s4528_s28 + $0xc9] sm:$0xff]  ;;  %v3322_v9 = vld [vmem:[%s4528_s28 + $0xf1] sm:$0xff] }
  0x22   : > { %1835 = vmatprep.subr.bf16.mxu0 %v4464_v1  ;;  %3485 = vmatprep.subr.bf16.mxu1 %v4464_v1  ;;  %v3257_v35 = vld [vmem:[%s4528_s28 + $0xca] sm:$0xff]  ;;  %v3267_v46 = vld [vmem:[%s4528_s28 + $0x142] sm:$0xff] }
  0x23   : > { %3561 = vrot.lane.b32.xlu1 %v3540_v24, %s4465_s6  ;;  %v3286_v24 = vld [vmem:[%s4528_s28 + $0xc0] sm:$0xff]  ;;  %v337_v32 = vld [vmem:[%s4528_s28 + $0x12a] sm:$0xff] }
  0x24   : > { %3556 = vrot.lane.b32.xlu0 %v3535_v26, %s4468_s13  ;;  %v3750_v26 = vpack.i.bf16 %v3287_v25, %v3286_v24  ;;  %v4876_v47 = vld [vmem:[%s4528_s28 + $0x10a] sm:$0xff] }
  0x25   : > { %1836 = vmatpush1.bf16.msra.mxu0 %v4321_v39  ;;  %3494 = vmatpush1.bf16.msra.mxu1 %v4321_v39  ;;  %v3320_v39 = vld [vmem:[%s4528_s28 + $0xd9] sm:$0xff] }
  0x26   : > { %1837 = vmatprep.subr.bf16.mxu0 %v4464_v1  ;;  %3486 = vmatprep.subr.bf16.mxu1 %v4464_v1 }
  0x27   : > { %3571 = vrot.lane.b32.xlu1 %v3570_v34, %s4470_s17 }
  0x28   : > { %3566 = vrot.lane.b32.xlu0 %v3545_v30, %s4467_s10 }
  0x29   : > { %1838 = vmatpush1.bf16.msra.mxu0 %v4322_v41  ;;  %3495 = vmatpush1.bf16.msra.mxu1 %v4322_v41  ;;  %v3288_v41 = vld [vmem:[%s4528_s28 + $0xd8] sm:$0xff] }
  0x2a   : > { %1853 = vmatprep.subr.bf16.mxu0 %v4464_v1  ;;  %3487 = vmatprep.subr.bf16.mxu1 %v4464_v1  ;;  %v3283_v1 = vld [vmem:[%s4528_s28 + $0x98] sm:$0xff] }
  0x2b   : > { %3581 = vrot.lane.b32.xlu1 %v3580_v40, %s4471_s20  ;;  %v3680_v7 = vpack.i.bf16 %v3283_v1, %v3282_v0  ;;  %v249_v0 = vld [vmem:[%s4528_s28 + $0x8] sm:$0xff] }
  0x2c   : > { %3576 = vrot.lane.b32.xlu0 %v3575_v42, %s4469_s14 }
  0x2d   : > { %1854 = vmatpush2.bf16.msra.mxu0 %v4323_v43  ;;  %3496 = vmatpush2.bf16.msra.mxu1 %v4323_v43 }
  0x2f   : > { %3591 = vrot.lane.b32.xlu1 %v3570_v34, %s4468_s13  ;;  %v3256_v34 = vld [vmem:[%s4528_s28 + $0xc2] sm:$0xff] }
  0x30   : > { %3586 = vrot.lane.b32.xlu0 %v3545_v30, %s4466_s9  ;;  %v3755_v30 = vpack.i.bf16 %v3319_v29, %v3318_v28  ;;  %v3780_v36 = vpack.i.bf16 %v3257_v35, %v3256_v34 }
  0x33   : > { %3601 = vrot.lane.b32.xlu1 %v3580_v40, %s4467_s10 }
  0x34   : > { %3596 = vrot.lane.b32.xlu0 %v3575_v42, %s4465_s6  ;;  %v3289_v42 = vld [vmem:[%s4528_s28 + $0xe0] sm:$0xff] }
  0x37   : > { %3611 = vrot.lane.b32.xlu1 %v3610_v49, %s4469_s14 }
  0x38   : > { %3606 = vrot.lane.b32.xlu0 %v3605_v50, %s4470_s17 }
  0x3b   : > { %3621 = vrot.lane.b32.xlu1 %v3580_v40, %s4466_s9  ;;  %v3321_v40 = vld [vmem:[%s4528_s28 + $0xe1] sm:$0xff] }
  0x3c   : > { %3616 = vrot.lane.b32.xlu0 %v3615_v53, %s4471_s20  ;;  %v3790_v43 = vpack.i.bf16 %v3321_v40, %v3320_v39 }
  0x3f   : > { %3631 = vrot.lane.b32.xlu1 %v3610_v49, %s4465_s6  ;;  %v3785_v49 = vpack.i.bf16 %v3289_v42, %v3288_v41 }
  0x40   : > { %3626 = vrot.lane.b32.xlu0 %v3605_v50, %s4468_s13  ;;  %v3290_v50 = vld [vmem:[%s4528_s28 + $0xf0] sm:$0xff] }
  0x41   : > { %v3820_v1 = vpack.i.bf16 %v3291_v51, %v3290_v50  ;;  %v4785_v50 = vld [vmem:[%s4528_s28 + $0xfa] sm:$0xff] }
  0x43   : > { %3641 = vrot.lane.b32.xlu1 %v3640_v57, %s4470_s17 }
  0x44   : > { %3636 = vrot.lane.b32.xlu0 %v3615_v53, %s4467_s10 }
  0x47   : > { %3651 = vrot.lane.b32.xlu1 %v3650_v62, %s4471_s20 }
  0x48   : > { %3646 = vrot.lane.b32.xlu0 %v3645_v63, %s4469_s14 }
  0x4b   : > { %3661 = vrot.lane.b32.xlu1 %v3640_v57, %s4468_s13  ;;  %v4756_v57 = vld [vmem:[%s4528_s28 + $0xe2] sm:$0xff] }
  0x4c   : > { %3656 = vrot.lane.b32.xlu0 %v3615_v53, %s4466_s9  ;;  %v4753_v53 = vld [vmem:[%s4528_s28 + $0xda] sm:$0xff] }
  0x4f   : > { %3671 = vrot.lane.b32.xlu1 %v3650_v62, %s4467_s10 }
  0x50   : > { %3666 = vrot.lane.b32.xlu0 %v3645_v63, %s4465_s6  ;;  %v248_v63 = vld [vmem:[%s4528_s28] sm:$0xff] }
  0x53   : > { %3681 = vrot.lane.b32.xlu1 %v3680_v7, %s4469_s14 }
  0x54   : > { %3676 = vrot.lane.b32.xlu0 %v3675_v8, %s4470_s17 }
  0x57   : > { %3691 = vrot.lane.b32.xlu1 %v3650_v62, %s4466_s9 }
  0x58   : > { %3686 = vrot.lane.b32.xlu0 %v3685_v11, %s4471_s20 }
  0x5b   : > { %3701 = vrot.lane.b32.xlu1 %v3680_v7, %s4465_s6  ;;  %v3815_v7 = vpack.i.bf16 %v4756_v57, %v4753_v53 }
  0x5c   : > { %3696 = vrot.lane.b32.xlu0 %v3675_v8, %s4468_s13 }
  0x5f   : > { %3711 = vrot.lane.b32.xlu1 %v3710_v15, %s4470_s17 }
  0x60   : > { %3706 = vrot.lane.b32.xlu0 %v3685_v11, %s4467_s10 }
  0x63   : > { %3721 = vrot.lane.b32.xlu1 %v3720_v22, %s4471_s20 }
  0x64   : > { %3716 = vrot.lane.b32.xlu0 %v3715_v23, %s4469_s14 }
  0x67   : > { %3731 = vrot.lane.b32.xlu1 %v3710_v15, %s4468_s13 }
  0x68   : > { %3726 = vrot.lane.b32.xlu0 %v3685_v11, %s4466_s9 }
  0x6b   : > { %3741 = vrot.lane.b32.xlu1 %v3720_v22, %s4467_s10 }
  0x6c   : > { %3736 = vrot.lane.b32.xlu0 %v3715_v23, %s4465_s6  ;;  %v4770_v23 = vpack.i.bf16 %v3323_v10, %v3322_v9 }
  0x6f   : > { %3751 = vrot.lane.b32.xlu1 %v3750_v26, %s4469_s14 }
  0x70   : > { %3746 = vrot.lane.b32.xlu0 %v3745_v27, %s4470_s17 }
  0x73   : > { %3761 = vrot.lane.b32.xlu1 %v3720_v22, %s4466_s9 }
  0x74   : > { %3756 = vrot.lane.b32.xlu0 %v3755_v30, %s4471_s20 }
  0x77   : > { %3771 = vrot.lane.b32.xlu1 %v3750_v26, %s4465_s6 }
  0x78   : > { %3766 = vrot.lane.b32.xlu0 %v3745_v27, %s4468_s13 }
  0x7b   : > { %3781 = vrot.lane.b32.xlu1 %v3780_v36, %s4470_s17 }
  0x7c   : > { %3776 = vrot.lane.b32.xlu0 %v3755_v30, %s4467_s10 }
  0x7f   : > { %3791 = vrot.lane.b32.xlu1 %v3790_v43, %s4471_s20 }
  0x80   : > { %3786 = vrot.lane.b32.xlu0 %v3785_v49, %s4469_s14 }
  0x83   : > { %3801 = vrot.lane.b32.xlu1 %v3780_v36, %s4468_s13 }
  0x84   : > { %3796 = vrot.lane.b32.xlu0 %v3755_v30, %s4466_s9 }
  0x85   : > { %v3527_v52 = vpop.permute.xlu1 %3526 }
  0x86   : > { %v3517_v58 = vpop.permute.xlu0 %3516  ;;  %v3529_v21 = vunpack.i.h.bf16 %v3527_v52  ;;  %v3528_v22 = vunpack.i.l.bf16 %v3527_v52 }
  0x87   : > { %v3519_v59 = vunpack.i.h.bf16 %v3517_v58  ;;  %v3518_v62 = vunpack.i.l.bf16 %v3517_v58  ;;  %3811 = vrot.lane.b32.xlu1 %v3790_v43, %s4467_s10 }
  0x88   : > { %3806 = vrot.lane.b32.xlu0 %v3785_v49, %s4465_s6  ;;  %v4782_v49 = vld [vmem:[%s4528_s28 + $0xf2] sm:$0xff] }
  0x89   : > { %v3532_v8 = vpop.permute.xlu1 %3531  ;;  %v1434_v11 = vsel %vm228_vm0, %v248_v63, %v3518_v62  ;;  %v1435_v15 = vsel %vm228_vm0, %v249_v0, %v3519_v59  ;;  %v4792_v63 = vpack.i.bf16 %v4785_v50, %v4782_v49  ;;  %v3324_v0 = vld [vmem:[%s4528_s28 + $0x109] sm:$0xff] }
  0x8a   : > { %v3522_v16 = vpop.permute.xlu0 %3521  ;;  %v3534_v24 = vunpack.i.h.bf16 %v3532_v8  ;;  %v3533_v25 = vunpack.i.l.bf16 %v3532_v8 }
  0x8b   : > { %v3524_v19 = vunpack.i.h.bf16 %v3522_v16  ;;  %v3523_v20 = vunpack.i.l.bf16 %v3522_v16  ;;  %3821 = vrot.lane.b32.xlu1 %v3820_v1, %s4469_s14  ;;  %v3292_v16 = vld [vmem:[%s4528_s28 + $0x108] sm:$0xff] }
  0x8c   : > { %3816 = vrot.lane.b32.xlu0 %v3815_v7, %s4470_s17 }
  0x8d   : > { %v1467_v26 = vsel %vm1466_vm1, %v1434_v11, %v3523_v20  ;;  %v1468_v27 = vsel %vm1466_vm1, %v1435_v15, %v3524_v19  ;;  %v3542_v28 = vpop.permute.xlu1 %3541  ;;  %v3325_v15 = vld [vmem:[%s4528_s28 + $0x111] sm:$0xff] }
  0x8e   : > { %v1500_v29 = vsel %vm1499_vm2, %v1467_v26, %v3528_v22  ;;  %v1501_v30 = vsel %vm1499_vm2, %v1468_v27, %v3529_v21  ;;  %v3537_v34 = vpop.permute.xlu0 %3536  ;;  %v3544_v41 = vunpack.i.h.bf16 %v3542_v28  ;;  %v3543_v42 = vunpack.i.l.bf16 %v3542_v28  ;;  %v3293_v19 = vld [vmem:[%s4528_s28 + $0x110] sm:$0xff] }
  0x8f   : > { %v3539_v35 = vunpack.i.h.bf16 %v3537_v34  ;;  %v3538_v36 = vunpack.i.l.bf16 %v3537_v34  ;;  %v1533_v39 = vsel %vm1532_vm3, %v1500_v29, %v3533_v25  ;;  %v1534_v40 = vsel %vm1532_vm3, %v1501_v30, %v3534_v24  ;;  %3831 = vrot.lane.b32.xlu1 %v3790_v43, %s4466_s9 }
  0x90   : > { %3826 = vrot.lane.b32.xlu0 %v4770_v23, %s4471_s20  ;;  %v4807_v27 = vpack.i.bf16 %v3293_v19, %v3292_v16  ;;  %v4837_v16 = vpack.i.bf16 %v337_v32, %v336_v31 }
  0x91   : > { %v1566_v51 = vsel %vm1565_vm4, %v1533_v39, %v3538_v36  ;;  %v1567_v52 = vsel %vm1565_vm4, %v1534_v40, %v3539_v35  ;;  %v3552_v58 = vpop.permute.xlu1 %3551  ;;  %v304_v35 = vld [vmem:[%s4528_s28 + $0x121] sm:$0xff]  ;;  %v305_v36 = vld [vmem:[%s4528_s28 + $0x129] sm:$0xff] }
  0x92   : > { %v3547_v43 = vpop.permute.xlu0 %3546  ;;  %v3554_v8 = vunpack.i.h.bf16 %v3552_v58  ;;  %v3553_v9 = vunpack.i.l.bf16 %v3552_v58  ;;  %v1599_v10 = vsel %vm1598_vm5, %v1566_v51, %v3543_v42  ;;  %v1600_v11 = vsel %vm1598_vm5, %v1567_v52, %v3544_v41 }
  0x93   : > { %v3549_v59 = vunpack.i.h.bf16 %v3547_v43  ;;  %v3548_v62 = vunpack.i.l.bf16 %v3547_v43  ;;  %3841 = vrot.lane.b32.xlu1 %v3820_v1, %s4465_s6  ;;  %v4825_v51 = vpack.i.bf16 %v305_v36, %v304_v35 }
  0x94   : > { %3836 = vrot.lane.b32.xlu0 %v3815_v7, %s4468_s13  ;;  %v4805_v7 = vpack.i.bf16 %v3325_v15, %v3324_v0  ;;  %v1436_v28 = vsel %vm228_vm0, %v4534_v4, %v3553_v9  ;;  %v1437_v29 = vsel %vm228_vm0, %v4537_v5, %v3554_v8 }
  0x95   : > { %v3562_v20 = vpop.permute.xlu1 %3561  ;;  %v1632_v1 = vsel %vm1631_vm6, %v1599_v10, %v3548_v62  ;;  %v1633_v21 = vsel %vm1631_vm6, %v1600_v11, %v3549_v59 }
  0x96   : > { %v3557_v22 = vpop.permute.xlu0 %3556  ;;  %v1664_v24 = vpack.c.bf16 %v1633_v21, %v1632_v1  ;;  %v3564_v30 = vunpack.i.h.bf16 %v3562_v20  ;;  %v3563_v34 = vunpack.i.l.bf16 %v3562_v20  ;;  %v3202_v1 = vld [vmem:[%s4528_s28 + $0x138] sm:$0xff]  ;;  %v3203_v21 = vld [vmem:[%s4528_s28 + $0x140] sm:$0xff] }
  0x97   : > { %v3559_v25 = vunpack.i.h.bf16 %v3557_v22  ;;  %v3558_v26 = vunpack.i.l.bf16 %v3557_v22  ;;  %3851 = vrot.lane.b32.xlu1 %v4792_v63, %s4470_s17  ;;  %v4851_v36 = vpack.i.bf16 %v3203_v21, %v3202_v1 }
  0x98   : > { %3846 = vrot.lane.b32.xlu0 %v4770_v23, %s4467_s10  ;;  %1856 = vmatmul.mubr.bf16.vlgmr.msra.gmra.mxu0 %v1664_v24 }
  0x99   : > { %v1469_v39 = vsel %vm1466_vm1, %v1436_v28, %v3558_v26  ;;  %v1470_v40 = vsel %vm1466_vm1, %v1437_v29, %v3559_v25  ;;  %v3572_v41 = vpop.permute.xlu1 %3571  ;;  %3381 = vmatprep.mubr.msk.bf16.mxu0 %vm228_vm0, %v1667_v33 }
  0x9a   : > { %v3567_v4 = vpop.permute.xlu0 %3566  ;;  %v3574_v52 = vunpack.i.h.bf16 %v3572_v41  ;;  %v3573_v58 = vunpack.i.l.bf16 %v3572_v41  ;;  %v1502_v43 = vsel %vm1499_vm2, %v1469_v39, %v3563_v34  ;;  %v1503_v59 = vsel %vm1499_vm2, %v1470_v40, %v3564_v30  ;;  %v3234_v40 = vld [vmem:[%s4528_s28 + $0x139] sm:$0xff]  ;;  %v3235_v41 = vld [vmem:[%s4528_s28 + $0x141] sm:$0xff] }
  0x9b   : > { %v3569_v5 = vunpack.i.h.bf16 %v3567_v4  ;;  %v3568_v42 = vunpack.i.l.bf16 %v3567_v4  ;;  %3861 = vrot.lane.b32.xlu1 %v4805_v7, %s4471_s20 }
  0x9c   : > { %3856 = vrot.lane.b32.xlu0 %v4807_v27, %s4469_s14 }
  0x9d   : > { %v1535_v33 = vsel %vm1532_vm3, %v1502_v43, %v3568_v42  ;;  %v1536_v62 = vsel %vm1532_vm3, %v1503_v59, %v3569_v5  ;;  %v3582_v0 = vpop.permute.xlu1 %3581 }
  0x9e   : > { %v3584_v8 = vunpack.i.h.bf16 %v3582_v0  ;;  %v3583_v9 = vunpack.i.l.bf16 %v3582_v0  ;;  %v3577_v10 = vpop.permute.xlu0 %3576  ;;  %v1568_v19 = vsel %vm1565_vm4, %v1535_v33, %v3573_v58  ;;  %v1569_v20 = vsel %vm1565_vm4, %v1536_v62, %v3574_v52 }
  0x9f   : > { %v3579_v11 = vunpack.i.h.bf16 %v3577_v10  ;;  %v3578_v15 = vunpack.i.l.bf16 %v3577_v10  ;;  %3871 = vrot.lane.b32.xlu1 %v4825_v51, %s4466_s9 }
  0xa0   : > { %3866 = vrot.lane.b32.xlu0 %v4770_v23, %s4466_s9 }
  0xa1   : > { %v3592_v22 = vpop.permute.xlu1 %3591  ;;  %v1601_v24 = vsel %vm1598_vm5, %v1568_v19, %v3578_v15  ;;  %v1602_v25 = vsel %vm1598_vm5, %v1569_v20, %v3579_v11  ;;  %v3299_v15 = vld [vmem:[%s4528_s28 + $0x158] sm:$0xff]  ;;  %v4894_v20 = vld [vmem:[%s4528_s28 + $0x120] sm:$0xff] }
  0xa2   : > { %v3587_v26 = vpop.permute.xlu0 %3586  ;;  %v1634_v28 = vsel %vm1631_vm6, %v1601_v24, %v3583_v9  ;;  %v1635_v29 = vsel %vm1631_vm6, %v1602_v25, %v3584_v8  ;;  %v3594_v23 = vunpack.i.h.bf16 %v3592_v22  ;;  %v3593_v39 = vunpack.i.l.bf16 %v3592_v22  ;;  %v4901_v25 = vld [vmem:[%s4528_s28 + $0x128] sm:$0xff] }
  0xa3   : > { %v3589_v30 = vunpack.i.h.bf16 %v3587_v26  ;;  %v3588_v34 = vunpack.i.l.bf16 %v3587_v26  ;;  %3881 = vrot.lane.b32.xlu1 %v4837_v16, %s4468_s13  ;;  %v1666_v35 = vpack.c.bf16 %v1635_v29, %v1634_v28  ;;  %v4904_v26 = vld [vmem:[%s4528_s28 + $0x152] sm:$0xff]  ;;  %v4907_v28 = vld [vmem:[%s4528_s28 + $0x15a] sm:$0xff] }
  0xa4   : > { %3876 = vrot.lane.b32.xlu0 %v4792_v63, %s4468_s13  ;;  %v4867_v63 = vpack.i.bf16 %v3235_v41, %v3234_v40 }
  0xa5   : > { %v1438_v4 = vsel %vm228_vm0, %v4555_v17, %v3588_v34  ;;  %v1439_v5 = vsel %vm228_vm0, %v4558_v18, %v3589_v30  ;;  %1864 = vmatmul.mubr.bf16.gmra.mxu0 %v1666_v35  ;;  %v3602_v42 = vpop.permute.xlu1 %3601  ;;  %v3266_v17 = vld [vmem:[%s4528_s28 + $0x13a] sm:$0xff]  ;;  %v1689_v35 = vpack.c.bf16 %v4907_v28, %v4904_v26 }
  0xa6   : > { %v3597_v52 = vpop.permute.xlu0 %3596  ;;  %3382 = vmatprep.mubr.msk.bf16.mxu0 %vm228_vm0, %v1669_v48  ;;  %v3604_v59 = vunpack.i.h.bf16 %v3602_v42  ;;  %v3603_v18 = vunpack.i.l.bf16 %v3602_v42  ;;  %v1471_v31 = vsel %vm1466_vm1, %v1438_v4, %v3593_v39  ;;  %v1472_v32 = vsel %vm1466_vm1, %v1439_v5, %v3594_v23  ;;  %v4879_v48 = vld [vmem:[%s4528_s28 + $0x112] sm:$0xff] }
  0xa7   : > { %v3599_v58 = vunpack.i.h.bf16 %v3597_v52  ;;  %v3598_v43 = vunpack.i.l.bf16 %v3597_v52  ;;  %3891 = vrot.lane.b32.xlu1 %v4851_v36, %s4465_s6  ;;  %v4885_v11 = vpack.i.bf16 %v3267_v46, %v3266_v17  ;;  %v4891_v19 = vpack.i.bf16 %v4879_v48, %v4876_v47  ;;  %3392 = vmatprep.mubr.msk.bf16.mxu1 %vm228_vm0, %v1689_v35  ;;  %v3331_v17 = vld [vmem:[%s4528_s28 + $0x159] sm:$0xff] }
  0xa8   : > { %3886 = vrot.lane.b32.xlu0 %v4807_v27, %s4465_s6  ;;  %v3298_v27 = vld [vmem:[%s4528_s28 + $0x150] sm:$0xff]  ;;  %v4919_v4 = vpack.i.bf16 %v4901_v25, %v4894_v20 }
  0xa9   : > { %v1504_v33 = vsel %vm1499_vm2, %v1471_v31, %v3598_v43  ;;  %v1505_v62 = vsel %vm1499_vm2, %v1472_v32, %v3599_v58  ;;  %v3612_v0 = vpop.permute.xlu1 %3611  ;;  %v4915_v41 = vpack.i.bf16 %v3299_v15, %v3298_v27  ;;  %v3330_v43 = vld [vmem:[%s4528_s28 + $0x151] sm:$0xff] }
  0xaa   : > { %v3607_v8 = vpop.permute.xlu0 %3606  ;;  %v3614_v1 = vunpack.i.h.bf16 %v3612_v0  ;;  %v3613_v21 = vunpack.i.l.bf16 %v3612_v0  ;;  %v1537_v22 = vsel %vm1532_vm3, %v1504_v33, %v3603_v18  ;;  %v1538_v24 = vsel %vm1532_vm3, %v1505_v62, %v3604_v59 }
  0xab   : > { %v3609_v9 = vunpack.i.h.bf16 %v3607_v8  ;;  %v3608_v10 = vunpack.i.l.bf16 %v3607_v8  ;;  %3901 = vrot.lane.b32.xlu1 %v4867_v63, %s4467_s10  ;;  %v4932_v0 = vpack.i.bf16 %v3331_v17, %v3330_v43 }
  0xac   : > { %3896 = vrot.lane.b32.xlu0 %v4805_v7, %s4467_s10 }
  0xad   : > { %v1570_v29 = vsel %vm1565_vm4, %v1537_v22, %v3608_v10  ;;  %v1571_v30 = vsel %vm1565_vm4, %v1538_v24, %v3609_v9  ;;  %v3622_v34 = vpop.permute.xlu1 %3621 }
  0xae   : > { %v3617_v23 = vpop.permute.xlu0 %3616  ;;  %v3624_v5 = vunpack.i.h.bf16 %v3622_v34  ;;  %v3623_v42 = vunpack.i.l.bf16 %v3622_v34  ;;  %v1603_v52 = vsel %vm1598_vm5, %v1570_v29, %v3613_v21  ;;  %v1604_v58 = vsel %vm1598_vm5, %v1571_v30, %v3614_v1 }
  0xaf   : > { %v3619_v39 = vunpack.i.h.bf16 %v3617_v23  ;;  %v3618_v40 = vunpack.i.l.bf16 %v3617_v23  ;;  %3911 = vrot.lane.b32.xlu1 %v4885_v11, %s4470_s17 }
  0xb0   : > { %3906 = vrot.lane.b32.xlu0 %v4891_v19, %s4470_s17  ;;  %v1440_v8 = vsel %vm228_vm0, %v4602_v37, %v3623_v42  ;;  %v1441_v9 = vsel %vm228_vm0, %v4605_v38, %v3624_v5 }
  0xb1   : > { %v3632_v59 = vpop.permute.xlu1 %3631  ;;  %v1636_v18 = vsel %vm1631_vm6, %v1603_v52, %v3618_v40  ;;  %v1637_v31 = vsel %vm1631_vm6, %v1604_v58, %v3619_v39 }
  0xb2   : > { %v3627_v32 = vpop.permute.xlu0 %3626  ;;  %v1668_v46 = vpack.c.bf16 %v1637_v31, %v1636_v18  ;;  %v3634_v10 = vunpack.i.h.bf16 %v3632_v59  ;;  %v3633_v27 = vunpack.i.l.bf16 %v3632_v59 }
  0xb3   : > { %v3629_v33 = vunpack.i.h.bf16 %v3627_v32  ;;  %v3628_v62 = vunpack.i.l.bf16 %v3627_v32  ;;  %3921 = vrot.lane.b32.xlu1 %v4915_v41, %s4469_s14 }
  0xb4   : > { %1872 = vmatmul.mubr.bf16.gmra.mxu0 %v1668_v46  ;;  %3916 = vrot.lane.b32.xlu0 %v4919_v4, %s4469_s14 }
  0xb5   : > { %v1473_v15 = vsel %vm1466_vm1, %v1440_v8, %v3628_v62  ;;  %v1474_v1 = vsel %vm1466_vm1, %v1441_v9, %v3629_v33  ;;  %v3642_v21 = vpop.permute.xlu1 %3641  ;;  %3383 = vmatprep.mubr.msk.bf16.mxu0 %vm228_vm0, %v1671_v56 }
  0xb6   : > { %v3637_v37 = vpop.permute.xlu0 %3636  ;;  %v3644_v38 = vunpack.i.h.bf16 %v3642_v21  ;;  %v3643_v29 = vunpack.i.l.bf16 %v3642_v21  ;;  %v1506_v30 = vsel %vm1499_vm2, %v1473_v15, %v3633_v27  ;;  %v1507_v34 = vsel %vm1499_vm2, %v1474_v1, %v3634_v10 }
  0xb7   : > { %v3639_v22 = vunpack.i.h.bf16 %v3637_v37  ;;  %v3638_v24 = vunpack.i.l.bf16 %v3637_v37  ;;  %3931 = vrot.lane.b32.xlu1 %v4932_v0, %s4471_s20 }
  0xb8   : > { %3926 = vrot.lane.b32.xlu0 %v4825_v51, %s4471_s20 }
  0xb9   : > { %v1539_v35 = vsel %vm1532_vm3, %v1506_v30, %v3638_v24  ;;  %v1540_v54 = vsel %vm1532_vm3, %v1507_v34, %v3639_v22  ;;  %v3652_v55 = vpop.permute.xlu1 %3651  ;;  %v3300_v30 = vld [vmem:[%s4528_s28 + $0x168] sm:$0xff]  ;;  %v3301_v34 = vld [vmem:[%s4528_s28 + $0x170] sm:$0xff] }
  0xba   : > { %v3654_v56 = vunpack.i.h.bf16 %v3652_v55  ;;  %v3653_v23 = vunpack.i.l.bf16 %v3652_v55  ;;  %v3647_v39 = vpop.permute.xlu0 %3646  ;;  %v1572_v42 = vsel %vm1565_vm4, %v1539_v35, %v3643_v29  ;;  %v1573_v52 = vsel %vm1565_vm4, %v1540_v54, %v3644_v38 }
  0xbb   : > { %v3649_v40 = vunpack.i.h.bf16 %v3647_v39  ;;  %v3648_v5 = vunpack.i.l.bf16 %v3647_v39  ;;  %3941 = vrot.lane.b32.xlu1 %v4867_v63, %s4466_s9 }
  0xbc   : > { %3936 = vrot.lane.b32.xlu0 %v4805_v7, %s4466_s9 }
  0xbd   : > { %v3662_v58 = vpop.permute.xlu1 %3661  ;;  %v1605_v43 = vsel %vm1598_vm5, %v1572_v42, %v3648_v5  ;;  %v1606_v17 = vsel %vm1598_vm5, %v1573_v52, %v3649_v40  ;;  %v3332_v52 = vld [vmem:[%s4528_s28 + $0x169] sm:$0xff] }
  0xbe   : > { %v3657_v59 = vpop.permute.xlu0 %3656  ;;  %v1638_v18 = vsel %vm1631_vm6, %v1605_v43, %v3653_v23  ;;  %v1639_v31 = vsel %vm1631_vm6, %v1606_v17, %v3654_v56  ;;  %v3664_v62 = vunpack.i.h.bf16 %v3662_v58  ;;  %v3663_v8 = vunpack.i.l.bf16 %v3662_v58 }
  0xbf   : > { %v3659_v32 = vunpack.i.h.bf16 %v3657_v59  ;;  %v3658_v46 = vunpack.i.l.bf16 %v3657_v59  ;;  %3951 = vrot.lane.b32.xlu1 %v4885_v11, %s4468_s13  ;;  %v1670_v33 = vpack.c.bf16 %v1639_v31, %v1638_v18  ;;  %v4997_v23 = vpack.i.bf16 %v3301_v34, %v3300_v30  ;;  %v5043_v30 = vld [vmem:[%s4528_s28 + $0x16a] sm:$0xff]  ;;  %v5046_v34 = vld [vmem:[%s4528_s28 + $0x172] sm:$0xff] }
  0xc0   : > { %3946 = vrot.lane.b32.xlu0 %v4891_v19, %s4468_s13 }
  0xc1   : > { %v1442_v7 = vsel %vm228_vm0, %v4626_v44, %v3658_v46  ;;  %v1443_v9 = vsel %vm228_vm0, %v4629_v45, %v3659_v32  ;;  %1880 = vmatmul.mubr.bf16.gmra.mxu0 %v1670_v33  ;;  %v3672_v10 = vpop.permute.xlu1 %3671 }
  0xc2   : > { %v3667_v27 = vpop.permute.xlu0 %3666  ;;  %3384 = vmatprep.mubr.msk.bf16.mxu0 %vm228_vm0, %v1673_v6  ;;  %v3674_v19 = vunpack.i.h.bf16 %v3672_v10  ;;  %v3673_v1 = vunpack.i.l.bf16 %v3672_v10  ;;  %v1475_v44 = vsel %vm1466_vm1, %v1442_v7, %v3663_v8  ;;  %v1476_v45 = vsel %vm1466_vm1, %v1443_v9, %v3664_v62 }
  0xc3   : > { %v3669_v11 = vunpack.i.h.bf16 %v3667_v27  ;;  %v3668_v15 = vunpack.i.l.bf16 %v3667_v27  ;;  %3961 = vrot.lane.b32.xlu1 %v4915_v41, %s4465_s6  ;;  %v3980_v41 = vpack.i.bf16 %v4907_v28, %v4904_v26 }
  0xc4   : > { %3956 = vrot.lane.b32.xlu0 %v4919_v4, %s4465_s6 }
  0xc5   : > { %v1508_v2 = vsel %vm1499_vm2, %v1475_v44, %v3668_v15  ;;  %v1509_v3 = vsel %vm1499_vm2, %v1476_v45, %v3669_v11  ;;  %v3682_v6 = vpop.permute.xlu1 %3681 }
  0xc6   : > { %v3677_v21 = vpop.permute.xlu0 %3676  ;;  %v3684_v24 = vunpack.i.h.bf16 %v3682_v6  ;;  %v3683_v38 = vunpack.i.l.bf16 %v3682_v6  ;;  %v1541_v29 = vsel %vm1532_vm3, %v1508_v2, %v3673_v1  ;;  %v1542_v4 = vsel %vm1532_vm3, %v1509_v3, %v3674_v19  ;;  %v3350_v6 = vld [vmem:[%s4528_s28 + $0xc2] sm:$0xff] }
  0xc7   : > { %v3679_v37 = vunpack.i.h.bf16 %v3677_v21  ;;  %v3678_v22 = vunpack.i.l.bf16 %v3677_v21  ;;  %3971 = vrot.lane.b32.xlu1 %v4932_v0, %s4467_s10  ;;  %v3351_v21 = vld [vmem:[%s4528_s28 + $0xca] sm:$0xff] }
  0xc8   : > { %3966 = vrot.lane.b32.xlu0 %v4825_v51, %s4467_s10  ;;  %v3333_v51 = vld [vmem:[%s4528_s28 + $0x171] sm:$0xff] }
  0xc9   : > { %v1574_v35 = vsel %vm1565_vm4, %v1541_v29, %v3678_v22  ;;  %v1575_v54 = vsel %vm1565_vm4, %v1542_v4, %v3679_v37  ;;  %v3692_v55 = vpop.permute.xlu1 %3691  ;;  %v5009_v46 = vpack.i.bf16 %v3333_v51, %v3332_v52  ;;  %v3302_v22 = vld [vmem:[%s4528_s28 + $0x180] sm:$0xff]  ;;  %v5058_v52 = vpack.i.bf16 %v5046_v34, %v5043_v30 }
  0xca   : > { %v3687_v56 = vpop.permute.xlu0 %3686  ;;  %v3694_v39 = vunpack.i.h.bf16 %v3692_v55  ;;  %v3693_v40 = vunpack.i.l.bf16 %v3692_v55  ;;  %v1607_v5 = vsel %vm1598_vm5, %v1574_v35, %v3683_v38  ;;  %v1608_v42 = vsel %vm1598_vm5, %v1575_v54, %v3684_v24  ;;  %v3303_v24 = vld [vmem:[%s4528_s28 + $0x188] sm:$0xff]  ;;  %v260_v35 = vld [vmem:[%s4528_s28 + $0x90] sm:$0xff]  ;;  %v261_v54 = vld [vmem:[%s4528_s28 + $0x98] sm:$0xff] }
  0xcb   : > { %v3689_v26 = vunpack.i.h.bf16 %v3687_v56  ;;  %v3688_v28 = vunpack.i.l.bf16 %v3687_v56  ;;  %3981 = vrot.lane.b32.xlu1 %v3980_v41, %s4470_s17  ;;  %v1677_v56 = vpack.c.bf16 %v3351_v21, %v3350_v6  ;;  %v3334_v51 = vld [vmem:[%s4528_s28 + $0x181] sm:$0xff]  ;;  %v3304_v21 = vld [vmem:[%s4528_s28 + $0x198] sm:$0xff] }
  0xcc   : > { %3976 = vrot.lane.b32.xlu0 %v4837_v16, %s4470_s17  ;;  %v1444_v33 = vsel %vm228_vm0, %v4669_v60, %v3693_v40  ;;  %v1445_v16 = vsel %vm228_vm0, %v4672_v61, %v3694_v39  ;;  %v4030_v40 = vpack.i.bf16 %v3303_v24, %v3302_v22 }
  0xcd   : > { %v3702_v58 = vpop.permute.xlu1 %3701  ;;  %v1640_v43 = vsel %vm1631_vm6, %v1607_v5, %v3688_v28  ;;  %v1641_v17 = vsel %vm1631_vm6, %v1608_v42, %v3689_v26 }
  0xce   : > { %v3697_v59 = vpop.permute.xlu0 %3696  ;;  %v1672_v18 = vpack.c.bf16 %v1641_v17, %v1640_v43  ;;  %v3704_v62 = vunpack.i.h.bf16 %v3702_v58  ;;  %v3703_v8 = vunpack.i.l.bf16 %v3702_v58  ;;  %v3335_v58 = vld [vmem:[%s4528_s28 + $0x189] sm:$0xff] }
  0xcf   : > { %v3699_v31 = vunpack.i.h.bf16 %v3697_v59  ;;  %v3698_v32 = vunpack.i.l.bf16 %v3697_v59  ;;  %3991 = vrot.lane.b32.xlu1 %v4997_v23, %s4469_s14 }
  0xd0   : > { %1888 = vmatmul.mubr.bf16.gmra.mxu0 %v1672_v18  ;;  %3986 = vrot.lane.b32.xlu0 %v4851_v36, %s4469_s14 }
  0xd1   : > { %v1477_v7 = vsel %vm1466_vm1, %v1444_v33, %v3698_v32  ;;  %v1478_v9 = vsel %vm1466_vm1, %v1445_v16, %v3699_v31  ;;  %v3712_v10 = vpop.permute.xlu1 %3711  ;;  %3385 = vmatprep.mubr.msk.bf16.mxu0 %vm228_vm0, %v1675_v14 }
  0xd2   : > { %v3707_v60 = vpop.permute.xlu0 %3706  ;;  %v3714_v11 = vunpack.i.h.bf16 %v3712_v10  ;;  %v3713_v36 = vunpack.i.l.bf16 %v3712_v10  ;;  %v1510_v15 = vsel %vm1499_vm2, %v1477_v7, %v3703_v8  ;;  %v1511_v19 = vsel %vm1499_vm2, %v1478_v9, %v3704_v62 }
  0xd3   : > { %v3709_v27 = vunpack.i.h.bf16 %v3707_v60  ;;  %v3708_v61 = vunpack.i.l.bf16 %v3707_v60  ;;  %4001 = vrot.lane.b32.xlu1 %v5009_v46, %s4471_s20  ;;  %v4472_v60 = vmov 0.0  }
  0xd4   : > { %3996 = vrot.lane.b32.xlu0 %v4867_v63, %s4471_s20  ;;  %232 = vst.msk [vmem:[#allocation2 + $0x10] sm:$0xff] %vm228_vm0, %v4472_v60  ;;  %229 = vst.msk [vmem:[#allocation2 + $0x180] sm:$0xff] %vm228_vm0, %v4472_v60 }
  0xd5   : > { %v1543_v12 = vsel %vm1532_vm3, %v1510_v15, %v3708_v61  ;;  %v1544_v13 = vsel %vm1532_vm3, %v1511_v19, %v3709_v27  ;;  %v3722_v14 = vpop.permute.xlu1 %3721  ;;  %230 = vst.msk [vmem:[#allocation2 + $0x188] sm:$0xff] %vm228_vm0, %v4472_v60  ;;  %231 = vst.msk [vmem:[#allocation2 + $0x190] sm:$0xff] %vm228_vm0, %v4472_v60 }
  0xd6   : > { %v3724_v1 = vunpack.i.h.bf16 %v3722_v14  ;;  %v3723_v44 = vunpack.i.l.bf16 %v3722_v14  ;;  %v3717_v45 = vpop.permute.xlu0 %3716  ;;  %v1576_v63 = vsel %vm1565_vm4, %v1543_v12, %v3713_v36  ;;  %v1577_v37 = vsel %vm1565_vm4, %v1544_v13, %v3714_v11  ;;  %233 = vst.msk [vmem:[#allocation2 + $0x28] sm:$0xff] %vm228_vm0, %v4472_v60  ;;  %234 = vst.msk [vmem:[#allocation2 + $0x40] sm:$0xff] %vm228_vm0, %v4472_v60  ;;  %v5100_v13 = vld [vmem:[%s4528_s28 + $0x182] sm:$0xff]  ;;  %v5103_v14 = vld [vmem:[%s4528_s28 + $0x18a] sm:$0xff] }
  0xd7   : > { %v3719_v2 = vunpack.i.h.bf16 %v3717_v45  ;;  %v3718_v3 = vunpack.i.l.bf16 %v3717_v45  ;;  %4011 = vrot.lane.b32.xlu1 %v3980_v41, %s4468_s13  ;;  %235 = vst.msk [vmem:[#allocation2 + $0x58] sm:$0xff] %vm228_vm0, %v4472_v60  ;;  %236 = vst.msk [vmem:[#allocation2 + $0x70] sm:$0xff] %vm228_vm0, %v4472_v60  ;;  %v4060_v6 = vpack.i.bf16 %v5103_v14, %v5100_v13 }
  0xd8   : > { %4006 = vrot.lane.b32.xlu0 %v4932_v0, %s4466_s9  ;;  %237 = vst.msk [vmem:[#allocation2 + $0x88] sm:$0xff] %vm228_vm0, %v4472_v60  ;;  %238 = vst.msk [vmem:[#allocation2 + $0xa0] sm:$0xff] %vm228_vm0, %v4472_v60 }
  0xd9   : > { %v3732_v38 = vpop.permute.xlu1 %3731  ;;  %v1609_v29 = vsel %vm1598_vm5, %v1576_v63, %v3718_v3  ;;  %v1610_v4 = vsel %vm1598_vm5, %v1577_v37, %v3719_v2  ;;  %239 = vst.msk [vmem:[#allocation2 + $0xb8] sm:$0xff] %vm228_vm0, %v4472_v60  ;;  %240 = vst.msk [vmem:[#allocation2 + $0xd0] sm:$0xff] %vm228_vm0, %v4472_v60 }
  0xda   : > { %v3727_v41 = vpop.permute.xlu0 %3726  ;;  %v1642_v55 = vsel %vm1631_vm6, %v1609_v29, %v3723_v44  ;;  %v1643_v0 = vsel %vm1631_vm6, %v1610_v4, %v3724_v1  ;;  %v3734_v5 = vunpack.i.h.bf16 %v3732_v38  ;;  %v3733_v42 = vunpack.i.l.bf16 %v3732_v38  ;;  %241 = vst.msk [vmem:[#allocation2 + $0xe8] sm:$0xff] %vm228_vm0, %v4472_v60  ;;  %242 = vst.msk [vmem:[#allocation2 + $0x100] sm:$0xff] %vm228_vm0, %v4472_v60  ;;  %v3305_v38 = vld [vmem:[%s4528_s28 + $0x1a0] sm:$0xff] }
  0xdb   : > { %v3729_v26 = vunpack.i.h.bf16 %v3727_v41  ;;  %v3728_v28 = vunpack.i.l.bf16 %v3727_v41  ;;  %v1674_v39 = vpack.c.bf16 %v1643_v0, %v1642_v55  ;;  %4021 = vrot.lane.b32.xlu1 %v5009_v46, %s4467_s10  ;;  %243 = vst.msk [vmem:[#allocation2 + $0x118] sm:$0xff] %vm228_vm0, %v4472_v60  ;;  %244 = vst.msk [vmem:[#allocation2 + $0x130] sm:$0xff] %vm228_vm0, %v4472_v60  ;;  %v3336_v29 = vld [vmem:[%s4528_s28 + $0x199] sm:$0xff]  ;;  %v3337_v4 = vld [vmem:[%s4528_s28 + $0x1a1] sm:$0xff] }
  0xdc   : > { %4016 = vrot.lane.b32.xlu0 %v4997_v23, %s4465_s6  ;;  %v5066_v23 = vpack.i.bf16 %v3335_v58, %v3334_v51  ;;  %245 = vst.msk [vmem:[#allocation2 + $0x148] sm:$0xff] %vm228_vm0, %v4472_v60  ;;  %246 = vst.msk [vmem:[#allocation2 + $0x160] sm:$0xff] %vm228_vm0, %v4472_v60  ;;  %v262_v41 = vld [vmem:[%s4528_s28 + $0xa8] sm:$0xff] }
  0xdd   : > { %v1446_v43 = vsel %vm228_vm0, %v260_v35, %v3728_v28  ;;  %v1447_v17 = vsel %vm228_vm0, %v261_v54, %v3729_v26  ;;  %1896 = vmatmul.mubr.bf16.gmra.mxu0 %v1674_v39  ;;  %v3742_v59 = vpop.permute.xlu1 %3741  ;;  %247 = vst.msk [vmem:[#allocation2 + $0x178] sm:$0xff] %vm228_vm0, %v4472_v60  ;;  %v263_v35 = vld [vmem:[%s4528_s28 + $0xb0] sm:$0xff] }
  0xde   : > { %v3737_v18 = vpop.permute.xlu0 %3736  ;;  %3386 = vmatprep.mubr.msk.bf16.mxu0 %vm228_vm0, %v1677_v56  ;;  %v3744_v31 = vunpack.i.h.bf16 %v3742_v59  ;;  %v3743_v16 = vunpack.i.l.bf16 %v3742_v59  ;;  %v1479_v62 = vsel %vm1466_vm1, %v1446_v43, %v3733_v42  ;;  %v1480_v8 = vsel %vm1466_vm1, %v1447_v17, %v3734_v5 }
  0xdf   : > { %v3739_v32 = vunpack.i.h.bf16 %v3737_v18  ;;  %v3738_v33 = vunpack.i.l.bf16 %v3737_v18  ;;  %4031 = vrot.lane.b32.xlu1 %v4030_v40, %s4469_s14  ;;  %v1679_v56 = vpack.c.bf16 %v4756_v57, %v4753_v53  ;;  %v4065_v5 = vpack.i.bf16 %v3305_v38, %v3304_v21 }
  0xe0   : > { %4026 = vrot.lane.b32.xlu0 %v5058_v52, %s4470_s17  ;;  %v4070_v42 = vpack.i.bf16 %v3337_v4, %v3336_v29 }
  0xe1   : > { %v1512_v7 = vsel %vm1499_vm2, %v1479_v62, %v3738_v33  ;;  %v1513_v9 = vsel %vm1499_vm2, %v1480_v8, %v3739_v32  ;;  %v3752_v10 = vpop.permute.xlu1 %3751 }
  0xe2   : > { %v3747_v27 = vpop.permute.xlu0 %3746  ;;  %v3754_v36 = vunpack.i.h.bf16 %v3752_v10  ;;  %v3753_v15 = vunpack.i.l.bf16 %v3752_v10  ;;  %v1545_v19 = vsel %vm1532_vm3, %v1512_v7, %v3743_v16  ;;  %v1546_v12 = vsel %vm1532_vm3, %v1513_v9, %v3744_v31 }
  0xe3   : > { %v3749_v61 = vunpack.i.h.bf16 %v3747_v27  ;;  %v3748_v11 = vunpack.i.l.bf16 %v3747_v27  ;;  %4041 = vrot.lane.b32.xlu1 %v5009_v46, %s4466_s9 }
  0xe4   : > { %4036 = vrot.lane.b32.xlu0 %v5066_v23, %s4471_s20 }
  0xe5   : > { %v1578_v1 = vsel %vm1565_vm4, %v1545_v19, %v3748_v11  ;;  %v1579_v46 = vsel %vm1565_vm4, %v1546_v12, %v3749_v61  ;;  %v3762_v44 = vpop.permute.xlu1 %3761 }
  0xe6   : > { %v3757_v45 = vpop.permute.xlu0 %3756  ;;  %v3764_v63 = vunpack.i.h.bf16 %v3762_v44  ;;  %v3763_v37 = vunpack.i.l.bf16 %v3762_v44  ;;  %v1611_v22 = vsel %vm1598_vm5, %v1578_v1, %v3753_v15  ;;  %v1612_v24 = vsel %vm1598_vm5, %v1579_v46, %v3754_v36  ;;  %v264_v46 = vld [vmem:[%s4528_s28 + $0xc0] sm:$0xff]  ;;  %v265_v44 = vld [vmem:[%s4528_s28 + $0xc8] sm:$0xff] }
  0xe7   : > { %v3759_v2 = vunpack.i.h.bf16 %v3757_v45  ;;  %v3758_v3 = vunpack.i.l.bf16 %v3757_v45  ;;  %4051 = vrot.lane.b32.xlu1 %v4030_v40, %s4465_s6 }
  0xe8   : > { %4046 = vrot.lane.b32.xlu0 %v5058_v52, %s4468_s13  ;;  %v1448_v52 = vsel %vm228_vm0, %v262_v41, %v3763_v37  ;;  %v1449_v51 = vsel %vm228_vm0, %v263_v35, %v3764_v63 }
  0xe9   : > { %v3772_v54 = vpop.permute.xlu1 %3771  ;;  %v1644_v55 = vsel %vm1631_vm6, %v1611_v22, %v3758_v3  ;;  %v1645_v0 = vsel %vm1631_vm6, %v1612_v24, %v3759_v2  ;;  %v1681_v3 = vpack.c.bf16 %v4785_v50, %v4782_v49 }
  0xea   : > { %v3767_v26 = vpop.permute.xlu0 %3766  ;;  %v1676_v28 = vpack.c.bf16 %v1645_v0, %v1644_v55  ;;  %v3774_v58 = vunpack.i.h.bf16 %v3772_v54  ;;  %v3773_v43 = vunpack.i.l.bf16 %v3772_v54 }
  0xeb   : > { %v3769_v39 = vunpack.i.h.bf16 %v3767_v26  ;;  %v3768_v40 = vunpack.i.l.bf16 %v3767_v26  ;;  %4061 = vrot.lane.b32.xlu1 %v4060_v6, %s4470_s17 }
  0xec   : > { %1904 = vmatmul.mubr.bf16.gmra.mxu0 %v1676_v28  ;;  %4056 = vrot.lane.b32.xlu0 %v5066_v23, %s4467_s10 }
  0xed   : > { %v1481_v53 = vsel %vm1466_vm1, %v1448_v52, %v3768_v40  ;;  %v1482_v57 = vsel %vm1466_vm1, %v1449_v51, %v3769_v39  ;;  %v3782_v17 = vpop.permute.xlu1 %3781  ;;  %3387 = vmatprep.mubr.msk.bf16.mxu0 %vm228_vm0, %v1679_v56 }
  0xee   : > { %v3777_v59 = vpop.permute.xlu0 %3776  ;;  %v3784_v32 = vunpack.i.h.bf16 %v3782_v17  ;;  %v3783_v33 = vunpack.i.l.bf16 %v3782_v17  ;;  %v1514_v16 = vsel %vm1499_vm2, %v1481_v53, %v3773_v43  ;;  %v1515_v62 = vsel %vm1499_vm2, %v1482_v57, %v3774_v58 }
  0xef   : > { %v3779_v18 = vunpack.i.h.bf16 %v3777_v59  ;;  %v3778_v31 = vunpack.i.l.bf16 %v3777_v59  ;;  %4071 = vrot.lane.b32.xlu1 %v4070_v42, %s4471_s20 }
  0xf0   : > { %4066 = vrot.lane.b32.xlu0 %v4065_v5, %s4469_s14 }
  0xf1   : > { %v1547_v23 = vsel %vm1532_vm3, %v1514_v16, %v3778_v31  ;;  %v1548_v8 = vsel %vm1532_vm3, %v1515_v62, %v3779_v18  ;;  %v3792_v7 = vpop.permute.xlu1 %3791  ;;  %v266_v16 = vld [vmem:[%s4528_s28 + $0xd8] sm:$0xff]  ;;  %v267_v62 = vld [vmem:[%s4528_s28 + $0xe0] sm:$0xff] }
  0xf2   : > { %v3794_v9 = vunpack.i.h.bf16 %v3792_v7  ;;  %v3793_v10 = vunpack.i.l.bf16 %v3792_v7  ;;  %v3787_v60 = vpop.permute.xlu0 %3786  ;;  %v1580_v11 = vsel %vm1565_vm4, %v1547_v23, %v3783_v33  ;;  %v1581_v36 = vsel %vm1565_vm4, %v1548_v8, %v3784_v32 }
  0xf3   : > { %v3789_v27 = vunpack.i.h.bf16 %v3787_v60  ;;  %v3788_v61 = vunpack.i.l.bf16 %v3787_v60 }
  0xf5   : > { %v3802_v15 = vpop.permute.xlu1 %3801  ;;  %v1613_v19 = vsel %vm1598_vm5, %v1580_v11, %v3788_v61  ;;  %v1614_v12 = vsel %vm1598_vm5, %v1581_v36, %v3789_v27 }
  0xf6   : > { %v3797_v1 = vpop.permute.xlu0 %3796  ;;  %v1646_v45 = vsel %vm1631_vm6, %v1613_v19, %v3793_v10  ;;  %v1647_v2 = vsel %vm1631_vm6, %v1614_v12, %v3794_v9  ;;  %v3804_v37 = vunpack.i.h.bf16 %v3802_v15  ;;  %v3803_v22 = vunpack.i.l.bf16 %v3802_v15 }
  0xf7   : > { %v3799_v6 = vunpack.i.h.bf16 %v3797_v1  ;;  %v3798_v21 = vunpack.i.l.bf16 %v3797_v1  ;;  %v1678_v63 = vpack.c.bf16 %v1647_v2, %v1646_v45  ;;  %v1683_v9 = vpack.c.bf16 %v4879_v48, %v4876_v47 }
  0xf9   : > { %v1450_v24 = vsel %vm228_vm0, %v264_v46, %v3798_v21  ;;  %v1451_v38 = vsel %vm228_vm0, %v265_v44, %v3799_v6  ;;  %1912 = vmatmul.mubr.bf16.gmra.mxu0 %v1678_v63  ;;  %v3812_v29 = vpop.permute.xlu1 %3811 }
  0xfa   : > { %v3807_v4 = vpop.permute.xlu0 %3806  ;;  %3388 = vmatprep.mubr.msk.bf16.mxu0 %vm228_vm0, %v1681_v3  ;;  %v3814_v54 = vunpack.i.h.bf16 %v3812_v29  ;;  %v3813_v55 = vunpack.i.l.bf16 %v3812_v29  ;;  %v1483_v49 = vsel %vm1466_vm1, %v1450_v24, %v3803_v22  ;;  %v1484_v50 = vsel %vm1466_vm1, %v1451_v38, %v3804_v37 }
  0xfb   : > { %v3809_v41 = vunpack.i.h.bf16 %v3807_v4  ;;  %v3808_v35 = vunpack.i.l.bf16 %v3807_v4 }
  0xfd   : > { %v1516_v0 = vsel %vm1499_vm2, %v1483_v49, %v3808_v35  ;;  %v1517_v56 = vsel %vm1499_vm2, %v1484_v50, %v3809_v41  ;;  %v3822_v26 = vpop.permute.xlu1 %3821  ;;  %v3358_v41 = vld [vmem:[%s4528_s28 + $0x122] sm:$0xff]  ;;  %v3359_v35 = vld [vmem:[%s4528_s28 + $0x12a] sm:$0xff] }
  0xfe   : > { %v3817_v28 = vpop.permute.xlu0 %3816  ;;  %v3824_v5 = vunpack.i.h.bf16 %v3822_v26  ;;  %v3823_v42 = vunpack.i.l.bf16 %v3822_v26  ;;  %v1549_v52 = vsel %vm1532_vm3, %v1516_v0, %v3813_v55  ;;  %v1550_v51 = vsel %vm1532_vm3, %v1517_v56, %v3814_v54 }
  0xff   : > { %v3819_v39 = vunpack.i.h.bf16 %v3817_v28  ;;  %v3818_v40 = vunpack.i.l.bf16 %v3817_v28 }
 0x101   : > { %v1582_v58 = vsel %vm1565_vm4, %v1549_v52, %v3818_v40  ;;  %v1583_v43 = vsel %vm1565_vm4, %v1550_v51, %v3819_v39  ;;  %v3832_v53 = vpop.permute.xlu1 %3831  ;;  %v1685_v39 = vpack.c.bf16 %v3359_v35, %v3358_v41 }
 0x102   : > { %v3827_v57 = vpop.permute.xlu0 %3826  ;;  %v3834_v18 = vunpack.i.h.bf16 %v3832_v53  ;;  %v3833_v31 = vunpack.i.l.bf16 %v3832_v53  ;;  %v1615_v32 = vsel %vm1598_vm5, %v1582_v58, %v3823_v42  ;;  %v1616_v33 = vsel %vm1598_vm5, %v1583_v43, %v3824_v5  ;;  %v268_v58 = vld [vmem:[%s4528_s28 + $0xf0] sm:$0xff]  ;;  %v269_v43 = vld [vmem:[%s4528_s28 + $0xf8] sm:$0xff] }
 0x103   : > { %v3829_v17 = vunpack.i.h.bf16 %v3827_v57  ;;  %v3828_v59 = vunpack.i.l.bf16 %v3827_v57 }
 0x104   : > { %v1452_v11 = vsel %vm228_vm0, %v266_v16, %v3833_v31  ;;  %v1453_v36 = vsel %vm228_vm0, %v267_v62, %v3834_v18 }
 0x105   : > { %v3842_v23 = vpop.permute.xlu1 %3841  ;;  %v1648_v8 = vsel %vm1631_vm6, %v1615_v32, %v3828_v59  ;;  %v1649_v7 = vsel %vm1631_vm6, %v1616_v33, %v3829_v17 }
 0x106   : > { %v3837_v10 = vpop.permute.xlu0 %3836  ;;  %v1680_v60 = vpack.c.bf16 %v1649_v7, %v1648_v8  ;;  %v3844_v15 = vunpack.i.h.bf16 %v3842_v23  ;;  %v3843_v19 = vunpack.i.l.bf16 %v3842_v23 }
 0x107   : > { %v3839_v27 = vunpack.i.h.bf16 %v3837_v10  ;;  %v3838_v61 = vunpack.i.l.bf16 %v3837_v10 }
 0x108   : > { %1920 = vmatmul.mubr.bf16.gmra.mxu0 %v1680_v60 }
 0x109   : > { %v1485_v12 = vsel %vm1466_vm1, %v1452_v11, %v3838_v61  ;;  %v1486_v1 = vsel %vm1466_vm1, %v1453_v36, %v3839_v27  ;;  %v3852_v46 = vpop.permute.xlu1 %3851  ;;  %3389 = vmatprep.mubr.msk.bf16.mxu0 %vm228_vm0, %v1683_v9 }
 0x10a   : > { %v3847_v47 = vpop.permute.xlu0 %3846  ;;  %v3854_v45 = vunpack.i.h.bf16 %v3852_v46  ;;  %v3853_v2 = vunpack.i.l.bf16 %v3852_v46  ;;  %v1518_v3 = vsel %vm1499_vm2, %v1485_v12, %v3843_v19  ;;  %v1519_v6 = vsel %vm1499_vm2, %v1486_v1, %v3844_v15 }
 0x10b   : > { %v3849_v48 = vunpack.i.h.bf16 %v3847_v47  ;;  %v3848_v44 = vunpack.i.l.bf16 %v3847_v47 }
 0x10d   : > { %v1551_v21 = vsel %vm1532_vm3, %v1518_v3, %v3848_v44  ;;  %v1552_v63 = vsel %vm1532_vm3, %v1519_v6, %v3849_v48  ;;  %v3862_v37 = vpop.permute.xlu1 %3861 }
 0x10e   : > { %v3864_v22 = vunpack.i.h.bf16 %v3862_v37  ;;  %v3863_v24 = vunpack.i.l.bf16 %v3862_v37  ;;  %v3857_v38 = vpop.permute.xlu0 %3856  ;;  %v1584_v54 = vsel %vm1565_vm4, %v1551_v21, %v3853_v2  ;;  %v1585_v55 = vsel %vm1565_vm4, %v1552_v63, %v3854_v45 }
 0x10f   : > { %v3859_v29 = vunpack.i.h.bf16 %v3857_v38  ;;  %v3858_v4 = vunpack.i.l.bf16 %v3857_v38 }
 0x111   : > { %v1617_v49 = vsel %vm1598_vm5, %v1584_v54, %v3858_v4  ;;  %v1618_v50 = vsel %vm1598_vm5, %v1585_v55, %v3859_v29  ;;  %v3872_v0 = vpop.permute.xlu1 %3871 }
 0x112   : > { %v1650_v56 = vsel %vm1631_vm6, %v1617_v49, %v3863_v24  ;;  %v1651_v26 = vsel %vm1631_vm6, %v1618_v50, %v3864_v22  ;;  %v3867_v28 = vpop.permute.xlu0 %3866  ;;  %v3874_v10 = vunpack.i.h.bf16 %v3872_v0  ;;  %v3873_v60 = vunpack.i.l.bf16 %v3872_v0 }
 0x113   : > { %v1682_v40 = vpack.c.bf16 %v1651_v26, %v1650_v56  ;;  %v3869_v42 = vunpack.i.h.bf16 %v3867_v28  ;;  %v3868_v52 = vunpack.i.l.bf16 %v3867_v28 }
 0x114   : > { %v1458_v45 = vsel %vm228_vm0, %v4894_v20, %v3873_v60  ;;  %v1459_v2 = vsel %vm228_vm0, %v4901_v25, %v3874_v10  ;;  %v270_v10 = vld [vmem:[%s4528_s28 + $0x108] sm:$0xff]  ;;  %v271_v60 = vld [vmem:[%s4528_s28 + $0x110] sm:$0xff] }
 0x115   : > { %1928 = vmatmul.mubr.bf16.gmra.mxu0 %v1682_v40  ;;  %v3882_v5 = vpop.permute.xlu1 %3881  ;;  %v1454_v59 = vsel %vm228_vm0, %v268_v58, %v3868_v52  ;;  %v1455_v18 = vsel %vm228_vm0, %v269_v43, %v3869_v42  ;;  %v3360_v52 = vld [vmem:[%s4528_s28 + $0x13a] sm:$0xff] }
 0x116   : > { %v3877_v51 = vpop.permute.xlu0 %3876  ;;  %3390 = vmatprep.mubr.msk.bf16.mxu0 %vm228_vm0, %v1685_v39  ;;  %v3884_v11 = vunpack.i.h.bf16 %v3882_v5  ;;  %v3883_v36 = vunpack.i.l.bf16 %v3882_v5 }
 0x117   : > { %v3879_v57 = vunpack.i.h.bf16 %v3877_v51  ;;  %v3878_v17 = vunpack.i.l.bf16 %v3877_v51  ;;  %v3361_v51 = vld [vmem:[%s4528_s28 + $0x142] sm:$0xff] }
 0x118   : > { %v1491_v21 = vsel %vm1466_vm1, %v1458_v45, %v3883_v36  ;;  %v1492_v63 = vsel %vm1466_vm1, %v1459_v2, %v3884_v11 }
 0x119   : > { %v3892_v53 = vpop.permute.xlu1 %3891  ;;  %v1487_v62 = vsel %vm1466_vm1, %v1454_v59, %v3878_v17  ;;  %v1488_v23 = vsel %vm1466_vm1, %v1455_v18, %v3879_v57  ;;  %v1691_v18 = vpack.c.bf16 %v5046_v34, %v5043_v30 }
 0x11a   : > { %v3887_v31 = vpop.permute.xlu0 %3886  ;;  %v3894_v19 = vunpack.i.h.bf16 %v3892_v53  ;;  %v3893_v12 = vunpack.i.l.bf16 %v3892_v53 }
 0x11b   : > { %v3889_v32 = vunpack.i.h.bf16 %v3887_v31  ;;  %v3888_v33 = vunpack.i.l.bf16 %v3887_v31 }
 0x11c   : > { %v1524_v38 = vsel %vm1499_vm2, %v1491_v21, %v3893_v12  ;;  %v1525_v29 = vsel %vm1499_vm2, %v1492_v63, %v3894_v19 }
 0x11d   : > { %v3902_v16 = vpop.permute.xlu1 %3901  ;;  %v1520_v27 = vsel %vm1499_vm2, %v1487_v62, %v3888_v33  ;;  %v1521_v61 = vsel %vm1499_vm2, %v1488_v23, %v3889_v32  ;;  %v1687_v62 = vpack.c.bf16 %v3361_v51, %v3360_v52 }
 0x11e   : > { %v3897_v8 = vpop.permute.xlu0 %3896  ;;  %v3904_v3 = vunpack.i.h.bf16 %v3902_v16  ;;  %v3903_v6 = vunpack.i.l.bf16 %v3902_v16 }
 0x11f   : > { %v3899_v7 = vunpack.i.h.bf16 %v3897_v8  ;;  %v3898_v9 = vunpack.i.l.bf16 %v3897_v8 }
 0x120   : > { %v1557_v49 = vsel %vm1532_vm3, %v1524_v38, %v3903_v6  ;;  %v1558_v50 = vsel %vm1532_vm3, %v1525_v29, %v3904_v3 }
 0x121   : > { %v3912_v15 = vpop.permute.xlu1 %3911  ;;  %v1553_v46 = vsel %vm1532_vm3, %v1520_v27, %v3898_v9  ;;  %v1554_v47 = vsel %vm1532_vm3, %v1521_v61, %v3899_v7 }
 0x122   : > { %v3907_v1 = vpop.permute.xlu0 %3906  ;;  %v3914_v37 = vunpack.i.h.bf16 %v3912_v15  ;;  %v3913_v22 = vunpack.i.l.bf16 %v3912_v15 }
 0x123   : > { %v3909_v48 = vunpack.i.h.bf16 %v3907_v1  ;;  %v3908_v44 = vunpack.i.l.bf16 %v3907_v1 }
 0x124   : > { %v1590_v0 = vsel %vm1565_vm4, %v1557_v49, %v3913_v22  ;;  %v1591_v56 = vsel %vm1565_vm4, %v1558_v50, %v3914_v37  ;;  %v274_v37 = vld [vmem:[%s4528_s28 + $0x138] sm:$0xff]  ;;  %v275_v22 = vld [vmem:[%s4528_s28 + $0x140] sm:$0xff] }
 0x125   : > { %v3922_v24 = vpop.permute.xlu1 %3921  ;;  %v1586_v4 = vsel %vm1565_vm4, %v1553_v46, %v3908_v44  ;;  %v1587_v20 = vsel %vm1565_vm4, %v1554_v47, %v3909_v48 }
 0x126   : > { %v3917_v41 = vpop.permute.xlu0 %3916  ;;  %v3924_v25 = vunpack.i.h.bf16 %v3922_v24  ;;  %v3923_v35 = vunpack.i.l.bf16 %v3922_v24 }
 0x127   : > { %v3919_v54 = vunpack.i.h.bf16 %v3917_v41  ;;  %v3918_v55 = vunpack.i.l.bf16 %v3917_v41 }
 0x128   : > { %v1623_v58 = vsel %vm1598_vm5, %v1590_v0, %v3923_v35  ;;  %v1624_v43 = vsel %vm1598_vm5, %v1591_v56, %v3924_v25 }
 0x129   : > { %v3932_v26 = vpop.permute.xlu1 %3931  ;;  %v1619_v40 = vsel %vm1598_vm5, %v1586_v4, %v3918_v55  ;;  %v1620_v5 = vsel %vm1598_vm5, %v1587_v20, %v3919_v54 }
 0x12a   : > { %v3934_v28 = vunpack.i.h.bf16 %v3932_v26  ;;  %v3933_v39 = vunpack.i.l.bf16 %v3932_v26  ;;  %v3927_v42 = vpop.permute.xlu0 %3926 }
 0x12b   : > { %v3929_v53 = vunpack.i.h.bf16 %v3927_v42  ;;  %v3928_v57 = vunpack.i.l.bf16 %v3927_v42 }
 0x12c   : > { %v1656_v17 = vsel %vm1631_vm6, %v1623_v58, %v3933_v39  ;;  %v1657_v59 = vsel %vm1631_vm6, %v1624_v43, %v3934_v28 }
 0x12d   : > { %v3942_v31 = vpop.permute.xlu1 %3941  ;;  %v1688_v32 = vpack.c.bf16 %v1657_v59, %v1656_v17  ;;  %v1652_v33 = vsel %vm1631_vm6, %v1619_v40, %v3928_v57  ;;  %v1653_v16 = vsel %vm1631_vm6, %v1620_v5, %v3929_v53 }
 0x12e   : > { %v3937_v23 = vpop.permute.xlu0 %3936  ;;  %v1684_v8 = vpack.c.bf16 %v1653_v16, %v1652_v33  ;;  %v3944_v3 = vunpack.i.h.bf16 %v3942_v31  ;;  %v3943_v6 = vunpack.i.l.bf16 %v3942_v31 }
 0x12f   : > { %1952 = vmatmul.mubr.bf16.vlgmr.msra.gmra.mxu1 %v1688_v32  ;;  %v3939_v9 = vunpack.i.h.bf16 %v3937_v23  ;;  %v3938_v30 = vunpack.i.l.bf16 %v3937_v23 }
 0x130   : > { %1936 = vmatmul.mubr.bf16.gmra.mxu0 %v1684_v8  ;;  %3393 = vmatprep.mubr.msk.bf16.mxu1 %vm228_vm0, %v1691_v18  ;;  %v1460_v49 = vsel %vm228_vm0, %v274_v37, %v3943_v6  ;;  %v1461_v50 = vsel %vm228_vm0, %v275_v22, %v3944_v3 }
 0x131   : > { %v3952_v7 = vpop.permute.xlu1 %3951  ;;  %3391 = vmatprep.mubr.msk.bf16.mxu0 %vm228_vm0, %v1687_v62  ;;  %v1456_v36 = vsel %vm228_vm0, %v270_v10, %v3938_v30  ;;  %v1457_v15 = vsel %vm228_vm0, %v271_v60, %v3939_v9 }
 0x132   : > { %v3947_v34 = vpop.permute.xlu0 %3946  ;;  %v3954_v24 = vunpack.i.h.bf16 %v3952_v7  ;;  %v3953_v38 = vunpack.i.l.bf16 %v3952_v7 }
 0x133   : > { %v3949_v61 = vunpack.i.h.bf16 %v3947_v34  ;;  %v3948_v11 = vunpack.i.l.bf16 %v3947_v34 }
 0x134   : > { %v1493_v26 = vsel %vm1466_vm1, %v1460_v49, %v3953_v38  ;;  %v1494_v28 = vsel %vm1466_vm1, %v1461_v50, %v3954_v24 }
 0x135   : > { %v3962_v27 = vpop.permute.xlu1 %3961  ;;  %v1489_v47 = vsel %vm1466_vm1, %v1456_v36, %v3948_v11  ;;  %v1490_v48 = vsel %vm1466_vm1, %v1457_v15, %v3949_v61  ;;  %v1693_v11 = vpack.c.bf16 %v5103_v14, %v5100_v13 }
 0x136   : > { %v3957_v19 = vpop.permute.xlu0 %3956  ;;  %v3964_v4 = vunpack.i.h.bf16 %v3962_v27  ;;  %v3963_v20 = vunpack.i.l.bf16 %v3962_v27 }
 0x137   : > { %v3959_v12 = vunpack.i.h.bf16 %v3957_v19  ;;  %v3958_v1 = vunpack.i.l.bf16 %v3957_v19 }
 0x138   : > { %v1526_v42 = vsel %vm1499_vm2, %v1493_v26, %v3963_v20  ;;  %v1527_v52 = vsel %vm1499_vm2, %v1494_v28, %v3964_v4 }
 0x139   : > { %v3972_v46 = vpop.permute.xlu1 %3971  ;;  %v1522_v21 = vsel %vm1499_vm2, %v1489_v47, %v3958_v1  ;;  %v1523_v63 = vsel %vm1499_vm2, %v1490_v48, %v3959_v12  ;;  %v276_v47 = vld [vmem:[%s4528_s28 + $0x150] sm:$0xff]  ;;  %v277_v48 = vld [vmem:[%s4528_s28 + $0x158] sm:$0xff] }
 0x13a   : > { %v3967_v44 = vpop.permute.xlu0 %3966  ;;  %v3974_v0 = vunpack.i.h.bf16 %v3972_v46  ;;  %v3973_v56 = vunpack.i.l.bf16 %v3972_v46 }
 0x13b   : > { %v3969_v45 = vunpack.i.h.bf16 %v3967_v44  ;;  %v3968_v2 = vunpack.i.l.bf16 %v3967_v44 }
 0x13c   : > { %v1559_v18 = vsel %vm1532_vm3, %v1526_v42, %v3973_v56  ;;  %v1560_v31 = vsel %vm1532_vm3, %v1527_v52, %v3974_v0 }
 0x13d   : > { %v3982_v29 = vpop.permute.xlu1 %3981  ;;  %v1555_v25 = vsel %vm1532_vm3, %v1522_v21, %v3968_v2  ;;  %v1556_v35 = vsel %vm1532_vm3, %v1523_v63, %v3969_v45 }
 0x13e   : > { %v3977_v41 = vpop.permute.xlu0 %3976  ;;  %v3984_v39 = vunpack.i.h.bf16 %v3982_v29  ;;  %v3983_v40 = vunpack.i.l.bf16 %v3982_v29 }
 0x13f   : > { %v3979_v54 = vunpack.i.h.bf16 %v3977_v41  ;;  %v3978_v55 = vunpack.i.l.bf16 %v3977_v41 }
 0x140   : > { %v1592_v32 = vsel %vm1565_vm4, %v1559_v18, %v3983_v40  ;;  %v1593_v33 = vsel %vm1565_vm4, %v1560_v31, %v3984_v39  ;;  %v3368_v39 = vld [vmem:[%s4528_s28 + $0x19a] sm:$0xff]  ;;  %v3369_v40 = vld [vmem:[%s4528_s28 + $0x1a2] sm:$0xff] }
 0x141   : > { %v3992_v5 = vpop.permute.xlu1 %3991  ;;  %v1588_v51 = vsel %vm1565_vm4, %v1555_v25, %v3978_v55  ;;  %v1589_v58 = vsel %vm1565_vm4, %v1556_v35, %v3979_v54  ;;  %v1695_v31 = vpack.c.bf16 %v3369_v40, %v3368_v39 }
 0x142   : > { %v3987_v43 = vpop.permute.xlu0 %3986  ;;  %v3994_v53 = vunpack.i.h.bf16 %v3992_v5  ;;  %v3993_v57 = vunpack.i.l.bf16 %v3992_v5  ;;  %v5275_v5 = vld [vmem:[%s5788_s2] ss:$0 sm:$0xff] }
 0x143   : > { %v3989_v17 = vunpack.i.h.bf16 %v3987_v43  ;;  %v3988_v59 = vunpack.i.l.bf16 %v3987_v43 }
 0x144   : > { %v1625_v30 = vsel %vm1598_vm5, %v1592_v32, %v3993_v57  ;;  %v1626_v34 = vsel %vm1598_vm5, %v1593_v33, %v3994_v53  ;;  %v278_v53 = vld [vmem:[%s4528_s28 + $0x168] sm:$0xff] }
 0x145   : > { %v4002_v16 = vpop.permute.xlu1 %4001  ;;  %v1621_v8 = vsel %vm1598_vm5, %v1588_v51, %v3988_v59  ;;  %v1622_v7 = vsel %vm1598_vm5, %v1589_v58, %v3989_v17  ;;  %v279_v59 = vld [vmem:[%s4528_s28 + $0x170] sm:$0xff] }
 0x146   : > { %v4004_v62 = vunpack.i.h.bf16 %v4002_v16  ;;  %v4003_v23 = vunpack.i.l.bf16 %v4002_v16  ;;  %v3997_v9 = vpop.permute.xlu0 %3996 }
 0x147   : > { %v3999_v10 = vunpack.i.h.bf16 %v3997_v9  ;;  %v3998_v60 = vunpack.i.l.bf16 %v3997_v9 }
 0x148   : > { %v1658_v27 = vsel %vm1631_vm6, %v1625_v30, %v4003_v23  ;;  %v1659_v61 = vsel %vm1631_vm6, %v1626_v34, %v4004_v62 }
 0x149   : > { %v1690_v36 = vpack.c.bf16 %v1659_v61, %v1658_v27  ;;  %v1654_v15 = vsel %vm1631_vm6, %v1621_v8, %v3998_v60  ;;  %v1655_v19 = vsel %vm1631_vm6, %v1622_v7, %v3999_v10  ;;  %v4012_v12 = vpop.permute.xlu1 %4011 }
 0x14a   : > { %v1686_v1 = vpack.c.bf16 %v1655_v19, %v1654_v15  ;;  %v4007_v46 = vpop.permute.xlu0 %4006  ;;  %v4014_v44 = vunpack.i.h.bf16 %v4012_v12  ;;  %v4013_v45 = vunpack.i.l.bf16 %v4012_v12 }
 0x14b   : > { %1960 = vmatmul.mubr.bf16.gmra.mxu1 %v1690_v36  ;;  %v4009_v2 = vunpack.i.h.bf16 %v4007_v46  ;;  %v4008_v3 = vunpack.i.l.bf16 %v4007_v46 }
 0x14c   : > { %1944 = vmatmul.mubr.bf16.gmra.mxu0 %v1686_v1  ;;  %3394 = vmatprep.mubr.msk.bf16.mxu1 %vm228_vm0, %v1693_v11 }
 0x14d   : > { %v1462_v13 = vsel %vm228_vm0, %v276_v47, %v4008_v3  ;;  %v1463_v14 = vsel %vm228_vm0, %v277_v48, %v4009_v2  ;;  %v4022_v6 = vpop.permute.xlu1 %4021 }
 0x14e   : > { %v1495_v21 = vsel %vm1466_vm1, %v1462_v13, %v4013_v45  ;;  %v1496_v63 = vsel %vm1466_vm1, %v1463_v14, %v4014_v44  ;;  %v4017_v37 = vpop.permute.xlu0 %4016  ;;  %v4024_v22 = vunpack.i.h.bf16 %v4022_v6  ;;  %v4023_v24 = vunpack.i.l.bf16 %v4022_v6 }
 0x14f   : > { %v4019_v38 = vunpack.i.h.bf16 %v4017_v37  ;;  %v4018_v29 = vunpack.i.l.bf16 %v4017_v37 }
 0x151   : > { %v1528_v4 = vsel %vm1499_vm2, %v1495_v21, %v4018_v29  ;;  %v1529_v20 = vsel %vm1499_vm2, %v1496_v63, %v4019_v38  ;;  %v4032_v41 = vpop.permute.xlu1 %4031 }
 0x152   : > { %v1561_v25 = vsel %vm1532_vm3, %v1528_v4, %v4023_v24  ;;  %v1562_v35 = vsel %vm1532_vm3, %v1529_v20, %v4024_v22  ;;  %v4027_v54 = vpop.permute.xlu0 %4026  ;;  %v4034_v55 = vunpack.i.h.bf16 %v4032_v41  ;;  %v4033_v49 = vunpack.i.l.bf16 %v4032_v41 }
 0x153   : > { %v4029_v50 = vunpack.i.h.bf16 %v4027_v54  ;;  %v4028_v0 = vunpack.i.l.bf16 %v4027_v54 }
 0x155   : > { %v1594_v56 = vsel %vm1565_vm4, %v1561_v25, %v4028_v0  ;;  %v1595_v26 = vsel %vm1565_vm4, %v1562_v35, %v4029_v50  ;;  %v4042_v28 = vpop.permute.xlu1 %4041 }
 0x156   : > { %v1627_v42 = vsel %vm1598_vm5, %v1594_v56, %v4033_v49  ;;  %v1628_v52 = vsel %vm1598_vm5, %v1595_v26, %v4034_v55  ;;  %v4037_v51 = vpop.permute.xlu0 %4036  ;;  %v4044_v58 = vunpack.i.h.bf16 %v4042_v28  ;;  %v4043_v43 = vunpack.i.l.bf16 %v4042_v28 }
 0x157   : > { %v4039_v57 = vunpack.i.h.bf16 %v4037_v51  ;;  %v4038_v17 = vunpack.i.l.bf16 %v4037_v51 }
 0x158   : > { %v1857_v18 = vpop.f32.mrf.mxu0  ;;  %v1464_v33 = vsel %vm228_vm0, %v278_v53, %v4043_v43  ;;  %v1465_v7 = vsel %vm228_vm0, %v279_v59, %v4044_v58 }
 0x159   : > { %v1858_v32 = vadd.f32 %v5275_v5, %v1857_v18  ;;  %v4052_v16 = vpop.permute.xlu1 %4051  ;;  %v1660_v62 = vsel %vm1631_vm6, %v1627_v42, %v4038_v17  ;;  %v1661_v23 = vsel %vm1631_vm6, %v1628_v52, %v4039_v57 }
 0x15a   : > { %v1859_v8 = vpop.f32.mrf.mxu0  ;;  %v4047_v9 = vpop.permute.xlu0 %4046  ;;  %v4054_v30 = vunpack.i.h.bf16 %v4052_v16  ;;  %v4053_v34 = vunpack.i.l.bf16 %v4052_v16  ;;  %v1692_v10 = vpack.c.bf16 %v1661_v23, %v1660_v62 }
 0x15b   : > { %v1984_v60 = vmax.f32 %v1858_v32, 0.0  ;;  %v4049_v27 = vunpack.i.h.bf16 %v4047_v9  ;;  %v4048_v61 = vunpack.i.l.bf16 %v4047_v9 }
 0x15c   : > { %v1860_v11 = vpop.f32.mrf.mxu0  ;;  %1968 = vmatmul.mubr.bf16.gmra.mxu1 %v1692_v10 }
 0x15d   : > { %2016 = vst.msk [vmem:[#allocation2] sm:$0xff] %vm228_vm0, %v1984_v60  ;;  %v1861_v36 = vadd.f32 %v5275_v5, %v1860_v11  ;;  %v1497_v15 = vsel %vm1466_vm1, %v1464_v33, %v4048_v61  ;;  %v1498_v19 = vsel %vm1466_vm1, %v1465_v7, %v4049_v27  ;;  %v4062_v12 = vpop.permute.xlu1 %4061  ;;  %3395 = vmatprep.mubr.msk.bf16.mxu1 %vm228_vm0, %v1695_v31 }
 0x15e   : > { %v1862_v1 = vpop.f32.mrf.mxu0  ;;  %v1530_v46 = vsel %vm1499_vm2, %v1497_v15, %v4053_v34  ;;  %v1531_v47 = vsel %vm1499_vm2, %v1498_v19, %v4054_v30  ;;  %v4057_v48 = vpop.permute.xlu0 %4056  ;;  %v4064_v44 = vunpack.i.h.bf16 %v4062_v12  ;;  %v4063_v45 = vunpack.i.l.bf16 %v4062_v12 }
 0x15f   : > { %v1985_v2 = vmax.f32 %v1861_v36, 0.0  ;;  %v4059_v3 = vunpack.i.h.bf16 %v4057_v48  ;;  %v4058_v13 = vunpack.i.l.bf16 %v4057_v48 }
 0x161   : > { %2017 = vst.msk [vmem:[#allocation2 + $0x8] sm:$0xff] %vm228_vm0, %v1985_v2  ;;  %v1563_v14 = vsel %vm1532_vm3, %v1530_v46, %v4058_v13  ;;  %v1564_v6 = vsel %vm1532_vm3, %v1531_v47, %v4059_v3  ;;  %v4072_v21 = vpop.permute.xlu1 %4071 }
 0x162   : > { %v1596_v63 = vsel %vm1565_vm4, %v1563_v14, %v4063_v45  ;;  %v1597_v37 = vsel %vm1565_vm4, %v1564_v6, %v4064_v44  ;;  %v4067_v22 = vpop.permute.xlu0 %4066  ;;  %v4074_v24 = vunpack.i.h.bf16 %v4072_v21  ;;  %v4073_v38 = vunpack.i.l.bf16 %v4072_v21 }
 0x163   : > { %v4069_v29 = vunpack.i.h.bf16 %v4067_v22  ;;  %v4068_v4 = vunpack.i.l.bf16 %v4067_v22 }
 0x165   : > { %v1865_v20 = vpop.f32.mrf.mxu0  ;;  %v1629_v41 = vsel %vm1598_vm5, %v1596_v63, %v4068_v4  ;;  %v1630_v25 = vsel %vm1598_vm5, %v1597_v37, %v4069_v29 }
 0x166   : > { %v1866_v35 = vadd.f32 %v5275_v5, %v1865_v20  ;;  %v1662_v54 = vsel %vm1631_vm6, %v1629_v41, %v4073_v38  ;;  %v1663_v55 = vsel %vm1631_vm6, %v1630_v25, %v4074_v24 }
 0x167   : > { %v1867_v49 = vpop.f32.mrf.mxu0  ;;  %v1694_v50 = vpack.c.bf16 %v1663_v55, %v1662_v54 }
 0x168   : > { %v1986_v0 = vmax.f32 %v1866_v35, 0.0  ;;  %v2080_v56 = vld [vmem:[#allocation2 + $0x1] sm:$0xff]  ;;  %v2081_v26 = vld [vmem:[#allocation2 + $0x9] sm:$0xff] }
 0x169   : > { %v1868_v28 = vpop.f32.mrf.mxu0  ;;  %v4075_v39 = vpack.i.bf16 %v2081_v26, %v2080_v56  ;;  %1976 = vmatmul.mubr.bf16.gmra.mxu1 %v1694_v50 }
 0x16a   : > { %2018 = vst.msk [vmem:[#allocation2 + $0x18] sm:$0xff] %vm228_vm0, %v1986_v0  ;;  %v1869_v40 = vadd.f32 %v5275_v5, %v1868_v28 }
 0x16b   : > { %v1870_v42 = vpop.f32.mrf.mxu0  ;;  %4076 = vrot.lane.b32.xlu0 %v4075_v39, %s4466_s9 }
 0x16c   : > { %v1987_v52 = vmax.f32 %v1869_v40, 0.0 }
 0x16e   : > { %2019 = vst.msk [vmem:[#allocation2 + $0x20] sm:$0xff] %vm228_vm0, %v1987_v52 }
 0x174   : > { %v1873_v51 = vpop.f32.mrf.mxu0 }
 0x175   : > { %v1874_v58 = vadd.f32 %v5275_v5, %v1873_v51 }
 0x176   : > { %v1875_v43 = vpop.f32.mrf.mxu0 }
 0x177   : > { %v1988_v53 = vmax.f32 %v1874_v58, 0.0 }
 0x178   : > { %v1876_v57 = vpop.f32.mrf.mxu0 }
 0x179   : > { %2020 = vst.msk [vmem:[#allocation2 + $0x30] sm:$0xff] %vm228_vm0, %v1988_v53  ;;  %v1877_v17 = vadd.f32 %v5275_v5, %v1876_v57 }
 0x17a   : > { %v1878_v59 = vpop.f32.mrf.mxu0 }
 0x17b   : > { %v1989_v18 = vmax.f32 %v1877_v17, 0.0 }
 0x17d   : > { %2021 = vst.msk [vmem:[#allocation2 + $0x38] sm:$0xff] %vm228_vm0, %v1989_v18 }
 0x181   : > { %v1881_v31 = vpop.f32.mrf.mxu0 }
 0x182   : > { %v1882_v32 = vadd.f32 %v5275_v5, %v1881_v31 }
 0x183   : > { %v1883_v33 = vpop.f32.mrf.mxu0 }
 0x184   : > { %v1990_v16 = vmax.f32 %v1882_v32, 0.0 }
 0x185   : > { %v1884_v62 = vpop.f32.mrf.mxu0 }
 0x186   : > { %2022 = vst.msk [vmem:[#allocation2 + $0x48] sm:$0xff] %vm228_vm0, %v1990_v16  ;;  %v1885_v23 = vadd.f32 %v5275_v5, %v1884_v62 }
 0x187   : > { %v1886_v8 = vpop.f32.mrf.mxu0 }
 0x188   : > { %v1991_v7 = vmax.f32 %v1885_v23, 0.0 }
 0x18a   : > { %2023 = vst.msk [vmem:[#allocation2 + $0x50] sm:$0xff] %vm228_vm0, %v1991_v7 }
 0x190   : > { %v1889_v9 = vpop.f32.mrf.mxu0 }
 0x191   : > { %v1890_v30 = vadd.f32 %v5275_v5, %v1889_v9 }
 0x192   : > { %v1891_v34 = vpop.f32.mrf.mxu0 }
 0x193   : > { %v1992_v10 = vmax.f32 %v1890_v30, 0.0 }
 0x194   : > { %v1892_v60 = vpop.f32.mrf.mxu0 }
 0x195   : > { %2024 = vst.msk [vmem:[#allocation2 + $0x60] sm:$0xff] %vm228_vm0, %v1992_v10  ;;  %v1893_v27 = vadd.f32 %v5275_v5, %v1892_v60 }
 0x196   : > { %v1894_v61 = vpop.f32.mrf.mxu0 }
 0x197   : > { %v1993_v11 = vmax.f32 %v1893_v27, 0.0 }
 0x199   : > { %2025 = vst.msk [vmem:[#allocation2 + $0x68] sm:$0xff] %vm228_vm0, %v1993_v11  ;;  %v5353_v11 = vld [vmem:[#allocation2 + $0x20] sm:$0xff] }
 0x19d   : > { %v1897_v36 = vpop.f32.mrf.mxu0 }
 0x19e   : > { %v1898_v15 = vadd.f32 %v5275_v5, %v1897_v36  ;;  %v4324_v36 = vld [vmem:[%s5789_s3 + $0x18] sm:$0xff]  }
 0x19f   : > { %v1899_v19 = vpop.f32.mrf.mxu0  ;;  %3439 = vmatprep.subr.bf16.mxu1 %v4324_v36 }
 0x1a0   : > { %v1994_v12 = vmax.f32 %v1898_v15, 0.0  ;;  %v5360_v15 = vld [vmem:[#allocation2 + $0x18] sm:$0xff]  ;;  %3440 = vmatpush3.bf16.msra.mxu1 %v4324_v36 }
 0x1a1   : > { %v1900_v1 = vpop.f32.mrf.mxu0  ;;  %v4100_v19 = vpack.i.bf16 %v5353_v11, %v5360_v15 }
 0x1a2   : > { %2026 = vst.msk [vmem:[#allocation2 + $0x78] sm:$0xff] %vm228_vm0, %v1994_v12  ;;  %v1901_v46 = vadd.f32 %v5275_v5, %v1900_v1  ;;  %v2082_v12 = vld [vmem:[#allocation2 + $0x19] sm:$0xff]  ;;  %v2083_v1 = vld [vmem:[#allocation2 + $0x21] sm:$0xff] }
 0x1a3   : > { %v1902_v47 = vpop.f32.mrf.mxu0 }
 0x1a4   : > { %v1995_v48 = vmax.f32 %v1901_v46, 0.0  ;;  %v4095_v46 = vpack.i.bf16 %v2083_v1, %v2082_v12 }
 0x1a6   : > { %2027 = vst.msk [vmem:[#allocation2 + $0x80] sm:$0xff] %vm228_vm0, %v1995_v48 }
 0x1ac   : > { %v1905_v44 = vpop.f32.mrf.mxu0 }
 0x1ad   : > { %v1906_v45 = vadd.f32 %v5275_v5, %v1905_v44 }
 0x1ae   : > { %v1907_v2 = vpop.f32.mrf.mxu0 }
 0x1af   : > { %v1996_v3 = vmax.f32 %v1906_v45, 0.0 }
 0x1b0   : > { %v1908_v13 = vpop.f32.mrf.mxu0 }
 0x1b1   : > { %2028 = vst.msk [vmem:[#allocation2 + $0x90] sm:$0xff] %vm228_vm0, %v1996_v3  ;;  %v1909_v14 = vadd.f32 %v5275_v5, %v1908_v13 }
 0x1b2   : > { %v1910_v6 = vpop.f32.mrf.mxu0 }
 0x1b3   : > { %v1997_v21 = vmax.f32 %v1909_v14, 0.0 }
 0x1b5   : > { %2029 = vst.msk [vmem:[#allocation2 + $0x98] sm:$0xff] %vm228_vm0, %v1997_v21 }
 0x1b9   : > { %v1913_v63 = vpop.f32.mrf.mxu0 }
 0x1ba   : > { %v1914_v37 = vadd.f32 %v5275_v5, %v1913_v63 }
 0x1bb   : > { %v1915_v22 = vpop.f32.mrf.mxu0 }
 0x1bc   : > { %v1998_v24 = vmax.f32 %v1914_v37, 0.0 }
 0x1bd   : > { %v1916_v38 = vpop.f32.mrf.mxu0 }
 0x1be   : > { %2030 = vst.msk [vmem:[#allocation2 + $0xa8] sm:$0xff] %vm228_vm0, %v1998_v24  ;;  %v1917_v29 = vadd.f32 %v5275_v5, %v1916_v38  ;;  %v4325_v24 = vld [vmem:[%s5789_s3 + $0x10] sm:$0xff]  }
 0x1bf   : > { %v1918_v4 = vpop.f32.mrf.mxu0  ;;  %3441 = vmatprep.subr.bf16.mxu1 %v4325_v24 }
 0x1c0   : > { %v1999_v20 = vmax.f32 %v1917_v29, 0.0  ;;  %3442 = vmatpush3.bf16.msra.mxu1 %v4325_v24 }
 0x1c2   : > { %2031 = vst.msk [vmem:[#allocation2 + $0xb0] sm:$0xff] %vm228_vm0, %v1999_v20  ;;  %v4326_v20 = vld [vmem:[%s5789_s3 + $0x8] sm:$0xff]  }
 0x1c3   : > { %3443 = vmatprep.subr.bf16.mxu1 %v4326_v20 }
 0x1c4   : > { %3444 = vmatpush3.bf16.msra.mxu1 %v4326_v20 }
 0x1c8   : > { %v1921_v41 = vpop.f32.mrf.mxu0 }
 0x1c9   : > { %v1922_v25 = vadd.f32 %v5275_v5, %v1921_v41  ;;  %v4327_v41 = vld [vmem:[%s5789_s3] sm:$0xff]  }
 0x1ca   : > { %v1923_v35 = vpop.f32.mrf.mxu0  ;;  %3445 = vmatprep.subr.bf16.mxu1 %v4327_v41 }
 0x1cb   : > { %v2000_v54 = vmax.f32 %v1922_v25, 0.0  ;;  %3446 = vmatpush3.bf16.msra.mxu1 %v4327_v41 }
 0x1cc   : > { %v1924_v55 = vpop.f32.mrf.mxu0 }
 0x1cd   : > { %2032 = vst.msk [vmem:[#allocation2 + $0xc0] sm:$0xff] %vm228_vm0, %v2000_v54  ;;  %v1925_v49 = vadd.f32 %v5275_v5, %v1924_v55 }
 0x1ce   : > { %v1926_v50 = vpop.f32.mrf.mxu0 }
 0x1cf   : > { %v2001_v0 = vmax.f32 %v1925_v49, 0.0 }
 0x1d1   : > { %2033 = vst.msk [vmem:[#allocation2 + $0xc8] sm:$0xff] %vm228_vm0, %v2001_v0 }
 0x1d5   : > { %v1929_v56 = vpop.f32.mrf.mxu0 }
 0x1d6   : > { %v1930_v26 = vadd.f32 %v5275_v5, %v1929_v56  ;;  %v5393_v56 = vld [vmem:[#allocation2 + $0x38] sm:$0xff] }
 0x1d7   : > { %v1931_v28 = vpop.f32.mrf.mxu0 }
 0x1d8   : > { %v2002_v39 = vmax.f32 %v1930_v26, 0.0  ;;  %v2084_v26 = vld [vmem:[#allocation2 + $0x31] sm:$0xff]  ;;  %v2085_v28 = vld [vmem:[#allocation2 + $0x39] sm:$0xff]  ;;  %v5456_v20 = vld [vmem:[#allocation2 + $0xc8] sm:$0xff] }
 0x1d9   : > { %v1932_v40 = vpop.f32.mrf.mxu0  ;;  %v2096_v41 = vld [vmem:[#allocation2 + $0xc1] sm:$0xff] }
 0x1da   : > { %2034 = vst.msk [vmem:[#allocation2 + $0xd8] sm:$0xff] %vm228_vm0, %v2002_v39  ;;  %v1933_v42 = vadd.f32 %v5275_v5, %v1932_v40 }
 0x1db   : > { %v1934_v52 = vpop.f32.mrf.mxu0 }
 0x1dc   : > { %v2003_v51 = vmax.f32 %v1933_v42, 0.0  ;;  %v5399_v42 = vld [vmem:[#allocation2 + $0x30] sm:$0xff] }
 0x1de   : > { %2035 = vst.msk [vmem:[#allocation2 + $0xe0] sm:$0xff] %vm228_vm0, %v2003_v51  ;;  %v4120_v51 = vpack.i.bf16 %v5393_v56, %v5399_v42 }
 0x1ef   : > { %v1953_v58 = vpop.f32.mrf.mxu1 }
 0x1f0   : > { %v1954_v43 = vadd.f32 %v5275_v5, %v1953_v58  ;;  %v1937_v53 = vpop.f32.mrf.mxu0  ;;  %v4130_v58 = vpack.i.bf16 %v2085_v28, %v2084_v26  ;;  %v5464_v26 = vld [vmem:[#allocation2 + $0xe0] sm:$0xff]  ;;  %v5468_v28 = vld [vmem:[#allocation2 + $0xd8] sm:$0xff] }
 0x1f1   : > { %v1955_v57 = vpop.f32.mrf.mxu1  ;;  %v1938_v17 = vadd.f32 %v5275_v5, %v1937_v53  ;;  %v5403_v53 = vld [vmem:[#allocation2 + $0x50] sm:$0xff] }
 0x1f2   : > { %v2008_v59 = vmax.f32 %v1954_v43, 0.0  ;;  %v1939_v18 = vpop.f32.mrf.mxu0 }
 0x1f3   : > { %v1956_v31 = vpop.f32.mrf.mxu1  ;;  %v2004_v32 = vmax.f32 %v1938_v17, 0.0 }
 0x1f4   : > { %2040 = vst.msk [vmem:[#allocation2 + $0x120] sm:$0xff] %vm228_vm0, %v2008_v59  ;;  %v1957_v33 = vadd.f32 %v5275_v5, %v1956_v31  ;;  %v1940_v16 = vpop.f32.mrf.mxu0  ;;  %v5409_v59 = vld [vmem:[#allocation2 + $0x48] sm:$0xff] }
 0x1f5   : > { %v1958_v62 = vpop.f32.mrf.mxu1  ;;  %2036 = vst.msk [vmem:[#allocation2 + $0xf0] sm:$0xff] %vm228_vm0, %v2004_v32  ;;  %v1941_v23 = vadd.f32 %v5275_v5, %v1940_v16  ;;  %v4140_v31 = vpack.i.bf16 %v5403_v53, %v5409_v59  ;;  %v2086_v32 = vld [vmem:[#allocation2 + $0x49] sm:$0xff] }
 0x1f6   : > { %v2009_v8 = vmax.f32 %v1957_v33, 0.0  ;;  %v1942_v7 = vpop.f32.mrf.mxu0  ;;  %v2087_v33 = vld [vmem:[#allocation2 + $0x51] sm:$0xff]  ;;  %v5416_v62 = vld [vmem:[#allocation2 + $0x68] sm:$0xff] }
 0x1f7   : > { %v2005_v9 = vmax.f32 %v1941_v23, 0.0  ;;  %v4135_v16 = vpack.i.bf16 %v2087_v33, %v2086_v32  ;;  %v2088_v23 = vld [vmem:[#allocation2 + $0x61] sm:$0xff] }
 0x1f8   : > { %2041 = vst.msk [vmem:[#allocation2 + $0x128] sm:$0xff] %vm228_vm0, %v2009_v8  ;;  %v2089_v8 = vld [vmem:[#allocation2 + $0x69] sm:$0xff] }
 0x1f9   : > { %2037 = vst.msk [vmem:[#allocation2 + $0xf8] sm:$0xff] %vm228_vm0, %v2005_v9 }
 0x1fb   : > { %v5347_v30 = vld [vmem:[#allocation2 + $0x120] sm:$0xff] }
 0x1ff   : > { %v5349_v34 = vld [vmem:[#allocation2 + $0x128] sm:$0xff] }
 0x200   : > { %v2104_v10 = vld [vmem:[#allocation2 + $0x121] sm:$0xff]  ;;  %v2105_v60 = vld [vmem:[#allocation2 + $0x129] sm:$0xff]  ;;  %v4080_v27 = vpack.i.bf16 %v5349_v34, %v5347_v30 }
 0x201   : > { %v4090_v61 = vpack.i.bf16 %v2105_v60, %v2104_v10  ;;  %v5421_v10 = vld [vmem:[#allocation2 + $0x60] sm:$0xff] }
 0x202   : > { %4081 = vrot.lane.b32.xlu1 %v4080_v27, %s4468_s13  ;;  %v4150_v27 = vpack.i.bf16 %v5416_v62, %v5421_v10 }
 0x203   : > { %4091 = vrot.lane.b32.xlu0 %v4090_v61, %s4466_s9 }
 0x206   : > { %4086 = vrot.lane.b32.xlu1 %v4090_v61, %s4465_s6  ;;  %v4160_v61 = vpack.i.bf16 %v2089_v8, %v2088_v23 }
 0x207   : > { %4101 = vrot.lane.b32.xlu0 %v4100_v19, %s4468_s13  ;;  %v5425_v19 = vld [vmem:[#allocation2 + $0x80] sm:$0xff] }
 0x20a   : > { %4096 = vrot.lane.b32.xlu1 %v4095_v46, %s4466_s9 }
 0x20b   : > { %4106 = vrot.lane.b32.xlu0 %v4095_v46, %s4465_s6  ;;  %v1961_v47 = vpop.f32.mrf.mxu1  ;;  %v5431_v46 = vld [vmem:[#allocation2 + $0x78] sm:$0xff] }
 0x20c   : > { %v1962_v48 = vadd.f32 %v5275_v5, %v1961_v47  ;;  %v1945_v44 = vpop.f32.mrf.mxu0 }
 0x20d   : > { %v1963_v45 = vpop.f32.mrf.mxu1  ;;  %v1946_v2 = vadd.f32 %v5275_v5, %v1945_v44 }
 0x20e   : > { %v2010_v3 = vmax.f32 %v1962_v48, 0.0  ;;  %v1947_v13 = vpop.f32.mrf.mxu0  ;;  %v4170_v48 = vpack.i.bf16 %v5425_v19, %v5431_v46  ;;  %v2090_v45 = vld [vmem:[#allocation2 + $0x79] sm:$0xff] }
 0x20f   : > { %v1964_v14 = vpop.f32.mrf.mxu1  ;;  %v2006_v6 = vmax.f32 %v1946_v2, 0.0  ;;  %v2091_v2 = vld [vmem:[#allocation2 + $0x81] sm:$0xff]  ;;  %v5438_v13 = vld [vmem:[#allocation2 + $0x98] sm:$0xff] }
 0x210   : > { %2042 = vst.msk [vmem:[#allocation2 + $0x138] sm:$0xff] %vm228_vm0, %v2010_v3  ;;  %v1965_v21 = vadd.f32 %v5275_v5, %v1964_v14  ;;  %v1948_v63 = vpop.f32.mrf.mxu0  ;;  %v4165_v3 = vpack.i.bf16 %v2091_v2, %v2090_v45  ;;  %v2092_v14 = vld [vmem:[#allocation2 + $0x91] sm:$0xff]  ;;  %v2143_v45 = vld [vmem:[#allocation2 + $0x180] sm:$0xff]  ;;  %v2144_v2 = vld [vmem:[#allocation2 + $0x188] sm:$0xff] }
 0x211   : > { %v1966_v37 = vpop.f32.mrf.mxu1  ;;  %2038 = vst.msk [vmem:[#allocation2 + $0x108] sm:$0xff] %vm228_vm0, %v2006_v6  ;;  %v1949_v22 = vadd.f32 %v5275_v5, %v1948_v63  ;;  %v5442_v6 = vld [vmem:[#allocation2 + $0x90] sm:$0xff] }
 0x212   : > { %v2011_v38 = vmax.f32 %v1965_v21, 0.0  ;;  %v1950_v29 = vpop.f32.mrf.mxu0  ;;  %v4180_v21 = vpack.i.bf16 %v5438_v13, %v5442_v6  ;;  %v5446_v37 = vld [vmem:[#allocation2 + $0xb0] sm:$0xff] }
 0x213   : > { %v2007_v4 = vmax.f32 %v1949_v22, 0.0  ;;  %v5450_v22 = vld [vmem:[#allocation2 + $0xa8] sm:$0xff]  ;;  %v2095_v29 = vld [vmem:[#allocation2 + $0xb1] sm:$0xff] }
 0x214   : > { %2043 = vst.msk [vmem:[#allocation2 + $0x140] sm:$0xff] %vm228_vm0, %v2011_v38  ;;  %v4200_v24 = vpack.i.bf16 %v5446_v37, %v5450_v22  ;;  %v2094_v38 = vld [vmem:[#allocation2 + $0xa9] sm:$0xff] }
 0x215   : > { %2039 = vst.msk [vmem:[#allocation2 + $0x110] sm:$0xff] %vm228_vm0, %v2007_v4  ;;  %v4195_v4 = vpack.i.bf16 %v2095_v29, %v2094_v38 }
 0x217   : > { %v5385_v25 = vld [vmem:[#allocation2 + $0x138] sm:$0xff] }
 0x218   : > { %v5482_v32 = vld [vmem:[#allocation2 + $0x108] sm:$0xff] }
 0x21b   : > { %v2106_v35 = vld [vmem:[#allocation2 + $0x139] sm:$0xff]  ;;  %v2107_v54 = vld [vmem:[#allocation2 + $0x141] sm:$0xff] }
 0x21c   : > { %v5387_v55 = vld [vmem:[#allocation2 + $0x140] sm:$0xff]  ;;  %v5389_v49 = vpack.i.bf16 %v2107_v54, %v2106_v35  ;;  %v1969_v0 = vpop.f32.mrf.mxu1  ;;  %v2097_v35 = vld [vmem:[#allocation2 + $0xc9] sm:$0xff]  ;;  %v2103_v8 = vld [vmem:[#allocation2 + $0x111] sm:$0xff] }
 0x21d   : > { %v4115_v50 = vpack.i.bf16 %v5387_v55, %v5385_v25  ;;  %v1970_v39 = vadd.f32 %v5275_v5, %v1969_v0  ;;  %v5460_v54 = vld [vmem:[#allocation2 + $0xc0] sm:$0xff]  ;;  %v4220_v0 = vpack.i.bf16 %v2097_v35, %v2096_v41  ;;  %v5484_v33 = vld [vmem:[#allocation2 + $0x110] sm:$0xff] }
 0x21e   : > { %4111 = vrot.lane.b32.xlu1 %v5389_v49, %s4466_s9  ;;  %v1971_v40 = vpop.f32.mrf.mxu1  ;;  %v2102_v23 = vld [vmem:[#allocation2 + $0x109] sm:$0xff] }
 0x21f   : > { %4116 = vrot.lane.b32.xlu0 %v4115_v50, %s4468_s13  ;;  %v2012_v52 = vmax.f32 %v1970_v39, 0.0  ;;  %v4210_v50 = vpack.i.bf16 %v5456_v20, %v5460_v54  ;;  %v4230_v39 = vpack.i.bf16 %v5464_v26, %v5468_v28  ;;  %v2098_v40 = vld [vmem:[#allocation2 + $0xd9] sm:$0xff] }
 0x220   : > { %v1972_v43 = vpop.f32.mrf.mxu1 }
 0x221   : > { %2044 = vst.msk [vmem:[#allocation2 + $0x150] sm:$0xff] %vm228_vm0, %v2012_v52  ;;  %v1973_v57 = vadd.f32 %v5275_v5, %v1972_v43  ;;  %v2099_v52 = vld [vmem:[#allocation2 + $0xe1] sm:$0xff]  ;;  %v5476_v43 = vld [vmem:[#allocation2 + $0xf8] sm:$0xff] }
 0x222   : > { %4121 = vrot.lane.b32.xlu1 %v4120_v51, %s4468_s13  ;;  %v1974_v17 = vpop.f32.mrf.mxu1  ;;  %v4225_v51 = vpack.i.bf16 %v2099_v52, %v2098_v40 }
 0x223   : > { %4131 = vrot.lane.b32.xlu0 %v4130_v58, %s4466_s9  ;;  %v2013_v18 = vmax.f32 %v1973_v57, 0.0  ;;  %v2100_v57 = vld [vmem:[#allocation2 + $0xf1] sm:$0xff]  ;;  %v2101_v17 = vld [vmem:[#allocation2 + $0xf9] sm:$0xff] }
 0x225   : > { %2045 = vst.msk [vmem:[#allocation2 + $0x158] sm:$0xff] %vm228_vm0, %v2013_v18 }
 0x226   : > { %4126 = vrot.lane.b32.xlu1 %v4130_v58, %s4465_s6  ;;  %v5474_v58 = vld [vmem:[#allocation2 + $0xf0] sm:$0xff] }
 0x227   : > { %4141 = vrot.lane.b32.xlu0 %v4140_v31, %s4468_s13  ;;  %v4240_v18 = vpack.i.bf16 %v5476_v43, %v5474_v58  ;;  %v4250_v31 = vpack.i.bf16 %v2101_v17, %v2100_v57 }
 0x229   : > { %v1977_v7 = vpop.f32.mrf.mxu1 }
 0x22a   : > { %4136 = vrot.lane.b32.xlu1 %v4135_v16, %s4466_s9  ;;  %v1978_v9 = vadd.f32 %v5275_v5, %v1977_v7  ;;  %v4255_v7 = vpack.i.bf16 %v2103_v8, %v2102_v23 }
 0x22b   : > { %4146 = vrot.lane.b32.xlu0 %v4135_v16, %s4465_s6  ;;  %v1979_v60 = vpop.f32.mrf.mxu1  ;;  %v4265_v16 = vpack.i.bf16 %v5484_v33, %v5482_v32 }
 0x22c   : > { %v2014_v36 = vmax.f32 %v1978_v9, 0.0  ;;  %v5492_v9 = vld [vmem:[#allocation2 + $0x150] sm:$0xff]  ;;  %v5494_v60 = vld [vmem:[#allocation2 + $0x158] sm:$0xff] }
 0x22d   : > { %v1980_v12 = vpop.f32.mrf.mxu1 }
 0x22e   : > { %4151 = vrot.lane.b32.xlu1 %v4150_v27, %s4468_s13  ;;  %2046 = vst.msk [vmem:[#allocation2 + $0x168] sm:$0xff] %vm228_vm0, %v2014_v36  ;;  %v1981_v1 = vadd.f32 %v5275_v5, %v1980_v12  ;;  %v2093_v5 = vld [vmem:[#allocation2 + $0x99] sm:$0xff]  ;;  %v4260_v27 = vpack.i.bf16 %v5494_v60, %v5492_v9 }
 0x22f   : > { %4161 = vrot.lane.b32.xlu0 %v4160_v61, %s4466_s9  ;;  %v1982_v47 = vpop.f32.mrf.mxu1  ;;  %v4190_v63 = vpack.i.bf16 %v2093_v5, %v2092_v14  ;;  %v2172_v36 = vld [vmem:[#allocation2 + $0x159] sm:$0xff]  ;;  %v2175_v5 = vld [vmem:[#allocation2 + $0x181] sm:$0xff] }
 0x230   : > { %v2015_v44 = vmax.f32 %v1981_v1, 0.0 }
 0x232   : > { %4156 = vrot.lane.b32.xlu1 %v4160_v61, %s4465_s6  ;;  %2047 = vst.msk [vmem:[#allocation2 + $0x170] sm:$0xff] %vm228_vm0, %v2015_v44  ;;  %v2171_v61 = vld [vmem:[#allocation2 + $0x151] sm:$0xff] }
 0x233   : > { %4171 = vrot.lane.b32.xlu0 %v4170_v48, %s4468_s13  ;;  %v4280_v12 = vpack.i.bf16 %v2172_v36, %v2171_v61 }
 0x235   : > { %v5503_v1 = vld [vmem:[#allocation2 + $0x168] sm:$0xff] }
 0x236   : > { %4166 = vrot.lane.b32.xlu1 %v4165_v3, %s4466_s9 }
 0x237   : > { %4176 = vrot.lane.b32.xlu0 %v4165_v3, %s4465_s6 }
 0x239   : > { %v2110_v47 = vld [vmem:[#allocation2 + $0x169] sm:$0xff]  ;;  %v2111_v48 = vld [vmem:[#allocation2 + $0x171] sm:$0xff] }
 0x23a   : > { %4181 = vrot.lane.b32.xlu1 %v4180_v21, %s4468_s13  ;;  %v5505_v44 = vld [vmem:[#allocation2 + $0x170] sm:$0xff]  ;;  %v4290_v3 = vpack.i.bf16 %v2111_v48, %v2110_v47 }
 0x23b   : > { %4191 = vrot.lane.b32.xlu0 %v4190_v63, %s4466_s9  ;;  %v4295_v14 = vpack.i.bf16 %v5505_v44, %v5503_v1  ;;  %v2176_v21 = vld [vmem:[#allocation2 + $0x189] sm:$0xff] }
 0x23e   : > { %4186 = vrot.lane.b32.xlu1 %v4190_v63, %s4465_s6  ;;  %v4310_v63 = vpack.i.bf16 %v2176_v21, %v2175_v5 }
 0x23f   : > { %4201 = vrot.lane.b32.xlu0 %v4200_v24, %s4468_s13  ;;  %v4077_v24 = vpop.permute.xlu0 %4076 }
 0x240   : > { %v4078_v41 = vunpack.i.l.bf16 %v4077_v24 }
 0x242   : > { %4196 = vrot.lane.b32.xlu1 %v4195_v4, %s4466_s9 }
 0x243   : > { %4206 = vrot.lane.b32.xlu0 %v4195_v4, %s4465_s6  ;;  %v4079_v4 = vunpack.i.h.bf16 %v4077_v24 }
 0x246   : > { %4211 = vrot.lane.b32.xlu1 %v4210_v50, %s4468_s13 }
 0x247   : > { %4221 = vrot.lane.b32.xlu0 %v4220_v0, %s4466_s9 }
 0x24a   : > { %4216 = vrot.lane.b32.xlu1 %v4220_v0, %s4465_s6  ;;  %v2049_v0 = vld [vmem:[#allocation2 + $0x8] sm:$0xff] }
 0x24b   : > { %4231 = vrot.lane.b32.xlu0 %v4230_v39, %s4468_s13  ;;  %v2048_v39 = vld [vmem:[#allocation2] sm:$0xff]  ;;  %v2562_v52 = vsel %vm228_vm0, %v2049_v0, %v4079_v4 }
 0x24e   : > { %4226 = vrot.lane.b32.xlu1 %v4225_v51, %s4466_s9 }
 0x24f   : > { %4236 = vrot.lane.b32.xlu0 %v4225_v51, %s4465_s6  ;;  %v2561_v51 = vsel %vm228_vm0, %v2048_v39, %v4078_v41 }
 0x252   : > { %4241 = vrot.lane.b32.xlu1 %v4240_v18, %s4468_s13 }
 0x253   : > { %4251 = vrot.lane.b32.xlu0 %v4250_v31, %s4466_s9 }
 0x256   : > { %4246 = vrot.lane.b32.xlu1 %v4250_v31, %s4465_s6 }
 0x257   : > { %4266 = vrot.lane.b32.xlu0 %v4265_v16, %s4468_s13 }
 0x25a   : > { %4256 = vrot.lane.b32.xlu1 %v4255_v7, %s4466_s9 }
 0x25b   : > { %4271 = vrot.lane.b32.xlu0 %v4255_v7, %s4465_s6 }
 0x25e   : > { %4261 = vrot.lane.b32.xlu1 %v4260_v27, %s4468_s13 }
 0x25f   : > { %4276 = vrot.lane.b32.xlu0 %v5389_v49, %s4465_s6  ;;  %v4300_v49 = vpack.i.bf16 %v2144_v2, %v2143_v45 }
 0x262   : > { %4281 = vrot.lane.b32.xlu1 %v4280_v12, %s4465_s6 }
 0x263   : > { %4286 = vrot.lane.b32.xlu0 %v4280_v12, %s4466_s9 }
 0x266   : > { %4291 = vrot.lane.b32.xlu1 %v4290_v3, %s4466_s9 }
 0x267   : > { %4296 = vrot.lane.b32.xlu0 %v4295_v14, %s4468_s13 }
 0x26a   : > { %4301 = vrot.lane.b32.xlu1 %v4300_v49, %s4468_s13  ;;  %s3176_s13 = sshll.u32 %s4509_s19, 5 }
 0x26b   : > { %4306 = vrot.lane.b32.xlu0 %v4290_v3, %s4465_s6  ;;  %p221_p4 = scmp.lt.s32.totalorder %s3176_s13, 63 }
 0x26d   : > { %s5793_s13 = smov (!%p221_p4, %s3176_s13), 63 }
 0x26e   : > { %4311 = vrot.lane.b32.xlu1 %v4310_v63, %s4465_s6  ;;  %s3177_s19 = sshll.u32 %s5793_s13, 3 }
 0x26f   : > { %s5697_s17 = scalar_lea.vmem %s5791_s5, %s3177_s19 }
 0x274   : > { %v5522_v8 = vpop.permute.xlu1 %4081 }
 0x275   : > { %v4092_v38 = vpop.permute.xlu0 %4091 }
 0x276   : > { %v4094_v36 = vunpack.i.h.bf16 %v4092_v38  ;;  %v4093_v12 = vunpack.i.l.bf16 %v4092_v38 }
 0x278   : > { %v5525_v27 = vpop.permute.xlu1 %4086  ;;  %v2586_v3 = vsel %vm228_vm0, %v5349_v34, %v4094_v36  ;;  %v2585_v14 = vsel %vm228_vm0, %v5347_v30, %v4093_v12 }
 0x279   : > { %v4102_v29 = vpop.permute.xlu0 %4101 }
 0x27a   : > { %v4104_v35 = vunpack.i.h.bf16 %v4102_v29  ;;  %v4103_v50 = vunpack.i.l.bf16 %v4102_v29 }
 0x27c   : > { %v2593_v18 = vsel %vm1466_vm1, %v2561_v51, %v4103_v50  ;;  %v2594_v31 = vsel %vm1466_vm1, %v2562_v52, %v4104_v35  ;;  %v4097_v61 = vpop.permute.xlu1 %4096 }
 0x27d   : > { %v4107_v40 = vpop.permute.xlu0 %4106  ;;  %v4099_v21 = vunpack.i.h.bf16 %v4097_v61  ;;  %v4098_v63 = vunpack.i.l.bf16 %v4097_v61 }
 0x27e   : > { %v4109_v57 = vunpack.i.h.bf16 %v4107_v40  ;;  %v4108_v17 = vunpack.i.l.bf16 %v4107_v40 }
 0x27f   : > { %v2564_v41 = vsel %vm228_vm0, %v5353_v11, %v4099_v21  ;;  %v2563_v34 = vsel %vm228_vm0, %v5360_v15, %v4098_v63 }
 0x280   : > { %v2625_v16 = vsel %vm1499_vm2, %v2593_v18, %v4108_v17  ;;  %v2626_v23 = vsel %vm1499_vm2, %v2594_v31, %v4109_v57 }
 0x281   : > { %v2657_v7 = vpack.c.bf16 %v2626_v23, %v2625_v16 }
 0x283   : > { %3447 = vmatprep.mubr.msk.bf16.mxu1 %vm1532_vm3, %v2657_v7 }
 0x290   : > { %v5527_v47 = vpop.permute.xlu1 %4111 }
 0x291   : > { %v4117_v48 = vpop.permute.xlu0 %4116 }
 0x292   : > { %v4119_v45 = vunpack.i.h.bf16 %v4117_v48  ;;  %v4118_v2 = vunpack.i.l.bf16 %v4117_v48 }
 0x294   : > { %v5534_v49 = vsel %vm1466_vm1, %v2585_v14, %v4118_v2  ;;  %v5537_v5 = vsel %vm1466_vm1, %v2586_v3, %v4119_v45  ;;  %v4122_v24 = vpop.permute.xlu1 %4121 }
 0x295   : > { %v4132_v38 = vpop.permute.xlu0 %4131  ;;  %v4124_v29 = vunpack.i.h.bf16 %v4122_v24  ;;  %v4123_v4 = vunpack.i.l.bf16 %v4122_v24 }
 0x296   : > { %v4134_v50 = vunpack.i.h.bf16 %v4132_v38  ;;  %v4133_v0 = vunpack.i.l.bf16 %v4132_v38 }
 0x297   : > { %v2595_v52 = vsel %vm1466_vm1, %v2563_v34, %v4123_v4  ;;  %v2596_v51 = vsel %vm1466_vm1, %v2564_v41, %v4124_v29 }
 0x298   : > { %v4127_v35 = vpop.permute.xlu1 %4126  ;;  %v2566_v15 = vsel %vm228_vm0, %v5393_v56, %v4134_v50  ;;  %v2565_v7 = vsel %vm228_vm0, %v5399_v42, %v4133_v0 }
 0x299   : > { %v4142_v30 = vpop.permute.xlu0 %4141  ;;  %v4129_v39 = vunpack.i.h.bf16 %v4127_v35  ;;  %v4128_v40 = vunpack.i.l.bf16 %v4127_v35 }
 0x29a   : > { %v4144_v57 = vunpack.i.h.bf16 %v4142_v30  ;;  %v4143_v17 = vunpack.i.l.bf16 %v4142_v30 }
 0x29b   : > { %v2627_v18 = vsel %vm1499_vm2, %v2595_v52, %v4128_v40  ;;  %v2628_v31 = vsel %vm1499_vm2, %v2596_v51, %v4129_v39 }
 0x29c   : > { %v2658_v11 = vpack.c.bf16 %v2628_v31, %v2627_v18  ;;  %v4137_v16 = vpop.permute.xlu1 %4136  ;;  %v2597_v12 = vsel %vm1466_vm1, %v2565_v7, %v4143_v17  ;;  %v2598_v48 = vsel %vm1466_vm1, %v2566_v15, %v4144_v57 }
 0x29d   : > { %v4147_v23 = vpop.permute.xlu0 %4146  ;;  %v4139_v3 = vunpack.i.h.bf16 %v4137_v16  ;;  %v4138_v14 = vunpack.i.l.bf16 %v4137_v16 }
 0x29e   : > { %v4149_v61 = vunpack.i.h.bf16 %v4147_v23  ;;  %v4148_v36 = vunpack.i.l.bf16 %v4147_v23  ;;  %3448 = vmatmul.mubr.msk.bf16.vlgmr.msra.gmra.mxu1 %vm1532_vm3, %v2658_v11 }
 0x29f   : > { %v2568_v42 = vsel %vm228_vm0, %v5403_v53, %v4139_v3  ;;  %v2567_v29 = vsel %vm228_vm0, %v5409_v59, %v4138_v14 }
 0x2a0   : > { %v2629_v45 = vsel %vm1499_vm2, %v2597_v12, %v4148_v36  ;;  %v2630_v2 = vsel %vm1499_vm2, %v2598_v48, %v4149_v61  ;;  %v4152_v63 = vpop.permute.xlu1 %4151 }
 0x2a1   : > { %v2659_v21 = vpack.c.bf16 %v2630_v2, %v2629_v45  ;;  %v4162_v56 = vpop.permute.xlu0 %4161  ;;  %v4154_v24 = vunpack.i.h.bf16 %v4152_v63  ;;  %v4153_v38 = vunpack.i.l.bf16 %v4152_v63 }
 0x2a2   : > { %v4164_v34 = vunpack.i.h.bf16 %v4162_v56  ;;  %v4163_v35 = vunpack.i.l.bf16 %v4162_v56 }
 0x2a3   : > { %3451 = vmatprep.mubr.msk.bf16.mxu1 %vm1532_vm3, %v2659_v21  ;;  %v2599_v0 = vsel %vm1466_vm1, %v2567_v29, %v4153_v38  ;;  %v2600_v39 = vsel %vm1466_vm1, %v2568_v42, %v4154_v24 }
 0x2a4   : > { %v4157_v4 = vpop.permute.xlu1 %4156  ;;  %v2570_v59 = vsel %vm228_vm0, %v5416_v62, %v4164_v34  ;;  %v2569_v31 = vsel %vm228_vm0, %v5421_v10, %v4163_v35 }
 0x2a5   : > { %v4172_v41 = vpop.permute.xlu0 %4171  ;;  %v4159_v30 = vunpack.i.h.bf16 %v4157_v4  ;;  %v4158_v50 = vunpack.i.l.bf16 %v4157_v4 }
 0x2a6   : > { %v4174_v40 = vunpack.i.h.bf16 %v4172_v41  ;;  %v4173_v52 = vunpack.i.l.bf16 %v4172_v41 }
 0x2a7   : > { %v2631_v51 = vsel %vm1499_vm2, %v2599_v0, %v4158_v50  ;;  %v2632_v57 = vsel %vm1499_vm2, %v2600_v39, %v4159_v30 }
 0x2a8   : > { %v2660_v53 = vpack.c.bf16 %v2632_v57, %v2631_v51  ;;  %v4167_v17 = vpop.permute.xlu1 %4166  ;;  %v2601_v23 = vsel %vm1466_vm1, %v2569_v31, %v4173_v52  ;;  %v2602_v15 = vsel %vm1466_vm1, %v2570_v59, %v4174_v40 }
 0x2a9   : > { %v4177_v18 = vpop.permute.xlu0 %4176  ;;  %v4169_v36 = vunpack.i.h.bf16 %v4167_v17  ;;  %v4168_v12 = vunpack.i.l.bf16 %v4167_v17 }
 0x2aa   : > { %v4179_v11 = vunpack.i.h.bf16 %v4177_v18  ;;  %v4178_v16 = vunpack.i.l.bf16 %v4177_v18  ;;  %3452 = vmatmul.mubr.msk.bf16.gmra.mxu1 %vm1532_vm3, %v2660_v53 }
 0x2ab   : > { %v2572_v10 = vsel %vm228_vm0, %v5425_v19, %v4169_v36  ;;  %v2571_v14 = vsel %vm228_vm0, %v5431_v46, %v4168_v12 }
 0x2ac   : > { %v2633_v7 = vsel %vm1499_vm2, %v2601_v23, %v4178_v16  ;;  %v2634_v61 = vsel %vm1499_vm2, %v2602_v15, %v4179_v11  ;;  %v4182_v45 = vpop.permute.xlu1 %4181 }
 0x2ad   : > { %v2661_v48 = vpack.c.bf16 %v2634_v61, %v2633_v7  ;;  %v4192_v62 = vpop.permute.xlu0 %4191  ;;  %v4184_v2 = vunpack.i.h.bf16 %v4182_v45  ;;  %v4183_v3 = vunpack.i.l.bf16 %v4182_v45 }
 0x2ae   : > { %v4194_v56 = vunpack.i.h.bf16 %v4192_v62  ;;  %v4193_v24 = vunpack.i.l.bf16 %v4192_v62 }
 0x2af   : > { %3455 = vmatprep.mubr.msk.bf16.mxu1 %vm1532_vm3, %v2661_v48  ;;  %v2603_v29 = vsel %vm1466_vm1, %v2571_v14, %v4183_v3  ;;  %v2604_v4 = vsel %vm1466_vm1, %v2572_v10, %v4184_v2 }
 0x2b0   : > { %v4187_v21 = vpop.permute.xlu1 %4186  ;;  %v2574_v46 = vsel %vm228_vm0, %v5438_v13, %v4194_v56  ;;  %v2573_v39 = vsel %vm228_vm0, %v5442_v6, %v4193_v24 }
 0x2b1   : > { %v4202_v63 = vpop.permute.xlu0 %4201  ;;  %v4189_v38 = vunpack.i.h.bf16 %v4187_v21  ;;  %v4188_v42 = vunpack.i.l.bf16 %v4187_v21 }
 0x2b2   : > { %v4204_v41 = vunpack.i.h.bf16 %v4202_v63  ;;  %v4203_v34 = vunpack.i.l.bf16 %v4202_v63 }
 0x2b3   : > { %v2635_v35 = vsel %vm1499_vm2, %v2603_v29, %v4188_v42  ;;  %v2636_v30 = vsel %vm1499_vm2, %v2604_v4, %v4189_v38 }
 0x2b4   : > { %v2662_v19 = vpack.c.bf16 %v2636_v30, %v2635_v35  ;;  %v4197_v50 = vpop.permute.xlu1 %4196  ;;  %v2605_v51 = vsel %vm1466_vm1, %v2573_v39, %v4203_v34  ;;  %v2606_v57 = vsel %vm1466_vm1, %v2574_v46, %v4204_v41 }
 0x2b5   : > { %v4207_v0 = vpop.permute.xlu0 %4206  ;;  %v4199_v18 = vunpack.i.h.bf16 %v4197_v50  ;;  %v4198_v59 = vunpack.i.l.bf16 %v4197_v50 }
 0x2b6   : > { %v4209_v40 = vunpack.i.h.bf16 %v4207_v0  ;;  %v4208_v52 = vunpack.i.l.bf16 %v4207_v0  ;;  %3456 = vmatmul.mubr.msk.bf16.gmra.mxu1 %vm1532_vm3, %v2662_v19 }
 0x2b7   : > { %v2576_v6 = vsel %vm228_vm0, %v5446_v37, %v4199_v18  ;;  %v2575_v15 = vsel %vm228_vm0, %v5450_v22, %v4198_v59 }
 0x2b8   : > { %v2637_v53 = vsel %vm1499_vm2, %v2605_v51, %v4208_v52  ;;  %v2638_v17 = vsel %vm1499_vm2, %v2606_v57, %v4209_v40  ;;  %v4212_v11 = vpop.permute.xlu1 %4211 }
 0x2b9   : > { %v2663_v31 = vpack.c.bf16 %v2638_v17, %v2637_v53  ;;  %v4222_v13 = vpop.permute.xlu0 %4221  ;;  %v4214_v16 = vunpack.i.h.bf16 %v4212_v11  ;;  %v4213_v23 = vunpack.i.l.bf16 %v4212_v11 }
 0x2ba   : > { %v4224_v36 = vunpack.i.h.bf16 %v4222_v13  ;;  %v4223_v12 = vunpack.i.l.bf16 %v4222_v13 }
 0x2bb   : > { %3459 = vmatprep.mubr.msk.bf16.mxu1 %vm1532_vm3, %v2663_v31  ;;  %v2607_v62 = vsel %vm1466_vm1, %v2575_v15, %v4213_v23  ;;  %v2608_v2 = vsel %vm1466_vm1, %v2576_v6, %v4214_v16  ;;  %v4084_v23 = vunpack.i.h.bf16 %v5522_v8 }
 0x2bc   : > { %v4217_v7 = vpop.permute.xlu1 %4216  ;;  %v2578_v22 = vsel %vm228_vm0, %v5456_v20, %v4224_v36  ;;  %v2577_v24 = vsel %vm228_vm0, %v5460_v54, %v4223_v12 }
 0x2bd   : > { %v4232_v61 = vpop.permute.xlu0 %4231  ;;  %v4219_v48 = vunpack.i.h.bf16 %v4217_v7  ;;  %v4218_v45 = vunpack.i.l.bf16 %v4217_v7 }
 0x2be   : > { %v4234_v3 = vunpack.i.h.bf16 %v4232_v61  ;;  %v4233_v10 = vunpack.i.l.bf16 %v4232_v61 }
 0x2bf   : > { %v2639_v14 = vsel %vm1499_vm2, %v2607_v62, %v4218_v45  ;;  %v2640_v21 = vsel %vm1499_vm2, %v2608_v2, %v4219_v48  ;;  %v4083_v45 = vunpack.i.l.bf16 %v5522_v8  ;;  %v4089_v62 = vunpack.i.h.bf16 %v5525_v27 }
 0x2c0   : > { %v2664_v37 = vpack.c.bf16 %v2640_v21, %v2639_v14  ;;  %v4227_v63 = vpop.permute.xlu1 %4226  ;;  %v2609_v29 = vsel %vm1466_vm1, %v2577_v24, %v4233_v10  ;;  %v2610_v4 = vsel %vm1466_vm1, %v2578_v22, %v4234_v3  ;;  %v4088_v8 = vunpack.i.l.bf16 %v5525_v27 }
 0x2c1   : > { %v4237_v56 = vpop.permute.xlu0 %4236  ;;  %v4229_v50 = vunpack.i.h.bf16 %v4227_v63  ;;  %v4228_v20 = vunpack.i.l.bf16 %v4227_v63 }
 0x2c2   : > { %v4239_v38 = vunpack.i.h.bf16 %v4237_v56  ;;  %v4238_v42 = vunpack.i.l.bf16 %v4237_v56  ;;  %3460 = vmatmul.mubr.msk.bf16.gmra.mxu1 %vm1532_vm3, %v2664_v37 }
 0x2c3   : > { %v2580_v51 = vsel %vm228_vm0, %v5464_v26, %v4229_v50  ;;  %v2579_v57 = vsel %vm228_vm0, %v5468_v28, %v4228_v20 }
 0x2c4   : > { %v2641_v41 = vsel %vm1499_vm2, %v2609_v29, %v4238_v42  ;;  %v2642_v34 = vsel %vm1499_vm2, %v2610_v4, %v4239_v38  ;;  %v4242_v30 = vpop.permute.xlu1 %4241  ;;  %v4114_v42 = vunpack.i.h.bf16 %v5527_v47  ;;  %v4113_v29 = vunpack.i.l.bf16 %v5527_v47 }
 0x2c5   : > { %v2665_v35 = vpack.c.bf16 %v2642_v34, %v2641_v41  ;;  %v4252_v19 = vpop.permute.xlu0 %4251  ;;  %v4244_v0 = vunpack.i.h.bf16 %v4242_v30  ;;  %v4243_v46 = vunpack.i.l.bf16 %v4242_v30 }
 0x2c6   : > { %v4254_v54 = vunpack.i.h.bf16 %v4252_v19  ;;  %v4253_v39 = vunpack.i.l.bf16 %v4252_v19  ;;  %v2587_v47 = vsel %vm228_vm0, %v5385_v25, %v4113_v29 }
 0x2c7   : > { %3463 = vmatprep.mubr.msk.bf16.mxu1 %vm1532_vm3, %v2665_v35  ;;  %v2611_v18 = vsel %vm1466_vm1, %v2579_v57, %v4243_v46  ;;  %v2612_v59 = vsel %vm1466_vm1, %v2580_v51, %v4244_v0  ;;  %v2588_v46 = vsel %vm228_vm0, %v5387_v55, %v4114_v42 }
 0x2c8   : > { %v4247_v40 = vpop.permute.xlu1 %4246  ;;  %v2582_v26 = vsel %vm228_vm0, %v5476_v43, %v4254_v54  ;;  %v2581_v28 = vsel %vm228_vm0, %v5474_v58, %v4253_v39 }
 0x2c9   : > { %v4267_v52 = vpop.permute.xlu0 %4266  ;;  %v4249_v53 = vunpack.i.h.bf16 %v4247_v40  ;;  %v4248_v17 = vunpack.i.l.bf16 %v4247_v40 }
 0x2ca   : > { %v4269_v31 = vunpack.i.h.bf16 %v4267_v52  ;;  %v4268_v11 = vunpack.i.l.bf16 %v4267_v52 }
 0x2cb   : > { %v2643_v13 = vsel %vm1499_vm2, %v2611_v18, %v4248_v17  ;;  %v2644_v16 = vsel %vm1499_vm2, %v2612_v59, %v4249_v53 }
 0x2cc   : > { %v2666_v6 = vpack.c.bf16 %v2644_v16, %v2643_v13  ;;  %v4257_v15 = vpop.permute.xlu1 %4256  ;;  %v2613_v2 = vsel %vm1466_vm1, %v2581_v28, %v4268_v11  ;;  %v2614_v3 = vsel %vm1466_vm1, %v2582_v26, %v4269_v31 }
 0x2cd   : > { %v4272_v7 = vpop.permute.xlu0 %4271  ;;  %v4259_v61 = vunpack.i.h.bf16 %v4257_v15  ;;  %v4258_v36 = vunpack.i.l.bf16 %v4257_v15 }
 0x2ce   : > { %v4274_v12 = vunpack.i.h.bf16 %v4272_v7  ;;  %v4273_v48 = vunpack.i.l.bf16 %v4272_v7  ;;  %3464 = vmatmul.mubr.msk.bf16.gmra.mxu1 %vm1532_vm3, %v2666_v6 }
 0x2cf   : > { %v2584_v58 = vsel %vm228_vm0, %v5484_v33, %v4259_v61  ;;  %v2583_v43 = vsel %vm228_vm0, %v5482_v32, %v4258_v36 }
 0x2d0   : > { %v2645_v10 = vsel %vm1499_vm2, %v2613_v2, %v4273_v48  ;;  %v2646_v14 = vsel %vm1499_vm2, %v2614_v3, %v4274_v12  ;;  %v2616_v21 = vsel %vm1466_vm1, %v2584_v58, %v4084_v23  ;;  %v2615_v37 = vsel %vm1466_vm1, %v2583_v43, %v4083_v45  ;;  %v4262_v56 = vpop.permute.xlu1 %4261 }
 0x2d1   : > { %v2667_v63 = vpack.c.bf16 %v2646_v14, %v2645_v10  ;;  %v4277_v22 = vpop.permute.xlu0 %4276  ;;  %v2647_v33 = vsel %vm1499_vm2, %v2615_v37, %v4088_v8  ;;  %v2648_v32 = vsel %vm1499_vm2, %v2616_v21, %v4089_v62  ;;  %v4264_v41 = vunpack.i.h.bf16 %v4262_v56 }
 0x2d2   : > { %v4279_v24 = vunpack.i.h.bf16 %v4277_v22  ;;  %v4278_v38 = vunpack.i.l.bf16 %v4277_v22  ;;  %v4263_v34 = vunpack.i.l.bf16 %v4262_v56  ;;  %v2668_v50 = vpack.c.bf16 %v2648_v32, %v2647_v33 }
 0x2d3   : > { %3467 = vmatprep.mubr.msk.bf16.mxu1 %vm1532_vm3, %v2667_v63 }
 0x2d4   : > { %v2649_v27 = vsel %vm1499_vm2, %v5534_v49, %v4278_v38  ;;  %v2650_v4 = vsel %vm1499_vm2, %v5537_v5, %v4279_v24  ;;  %v4282_v30 = vpop.permute.xlu1 %4281  ;;  %v2619_v49 = vsel %vm1466_vm1, %v2587_v47, %v4263_v34  ;;  %v2620_v5 = vsel %vm1466_vm1, %v2588_v46, %v4264_v41 }
 0x2d5   : > { %v2669_v35 = vpack.c.bf16 %v2650_v4, %v2649_v27  ;;  %v4287_v19 = vpop.permute.xlu0 %4286  ;;  %v4284_v20 = vunpack.i.h.bf16 %v4282_v30  ;;  %v4283_v0 = vunpack.i.l.bf16 %v4282_v30 }
 0x2d6   : > { %3468 = vmatmul.mubr.msk.bf16.gmra.mxu1 %vm1532_vm3, %v2668_v50  ;;  %v4289_v54 = vunpack.i.h.bf16 %v4287_v19  ;;  %v4288_v39 = vunpack.i.l.bf16 %v4287_v19 }
 0x2d7   : > { %3471 = vmatprep.mubr.msk.bf16.mxu1 %vm1532_vm3, %v2669_v35  ;;  %v2651_v51 = vsel %vm1499_vm2, %v2619_v49, %v4283_v0  ;;  %v2652_v57 = vsel %vm1499_vm2, %v2620_v5, %v4284_v20 }
 0x2d8   : > { %v4292_v40 = vpop.permute.xlu1 %4291  ;;  %v2670_v55 = vpack.c.bf16 %v2652_v57, %v2651_v51  ;;  %v2590_v25 = vsel %vm228_vm0, %v5494_v60, %v4289_v54  ;;  %v2589_v18 = vsel %vm228_vm0, %v5492_v9, %v4288_v39 }
 0x2d9   : > { %v4297_v52 = vpop.permute.xlu0 %4296  ;;  %v4294_v11 = vunpack.i.h.bf16 %v4292_v40  ;;  %v4293_v13 = vunpack.i.l.bf16 %v4292_v40 }
 0x2da   : > { %v4299_v53 = vunpack.i.h.bf16 %v4297_v52  ;;  %v4298_v17 = vunpack.i.l.bf16 %v4297_v52 }
 0x2db   : > { %v2592_v36 = vsel %vm228_vm0, %v5505_v44, %v4294_v11  ;;  %v2591_v12 = vsel %vm228_vm0, %v5503_v1, %v4293_v13  ;;  %v5679_v44 = vld [vmem:[%s5790_s4] ss:$0 sm:$0xff] }
 0x2dc   : > { %v4302_v59 = vpop.permute.xlu1 %4301  ;;  %v2621_v26 = vsel %vm1466_vm1, %v2589_v18, %v4298_v17  ;;  %v2622_v28 = vsel %vm1466_vm1, %v2590_v25, %v4299_v53 }
 0x2dd   : > { %v4307_v31 = vpop.permute.xlu0 %4306  ;;  %v4304_v6 = vunpack.i.h.bf16 %v4302_v59  ;;  %v4303_v15 = vunpack.i.l.bf16 %v4302_v59 }
 0x2de   : > { %v4309_v16 = vunpack.i.h.bf16 %v4307_v31  ;;  %v4308_v23 = vunpack.i.l.bf16 %v4307_v31  ;;  %3472 = vmatmul.mubr.msk.bf16.gmra.mxu1 %vm1532_vm3, %v2670_v55 }
 0x2df   : > { %v2623_v62 = vsel %vm1466_vm1, %v2591_v12, %v4303_v15  ;;  %v2624_v2 = vsel %vm1466_vm1, %v2592_v36, %v4304_v6 }
 0x2e0   : > { %v2653_v7 = vsel %vm1499_vm2, %v2621_v26, %v4308_v23  ;;  %v2654_v60 = vsel %vm1499_vm2, %v2622_v28, %v4309_v16  ;;  %v4312_v9 = vpop.permute.xlu1 %4311 }
 0x2e1   : > { %v2671_v61 = vpack.c.bf16 %v2654_v60, %v2653_v7  ;;  %v4314_v48 = vunpack.i.h.bf16 %v4312_v9  ;;  %v4313_v45 = vunpack.i.l.bf16 %v4312_v9 }
 0x2e3   : > { %3475 = vmatprep.mubr.msk.bf16.mxu1 %vm1532_vm3, %v2671_v61  ;;  %v2655_v3 = vsel %vm1499_vm2, %v2623_v62, %v4313_v45  ;;  %v2656_v58 = vsel %vm1499_vm2, %v2624_v2, %v4314_v48 }
 0x2e4   : > { %v2672_v43 = vpack.c.bf16 %v2656_v58, %v2655_v3 }
 0x2e6   : > { %3476 = vmatmul.mubr.msk.bf16.gmra.mxu1 %vm1532_vm3, %v2672_v43 }
 0x35e   : > { %v3449_v1 = vpop.f32.mrf.mxu1 }
 0x35f   : > { %v2803_v10 = vadd.f32 %v3449_v1, %v5679_v44 }
 0x360   : > { %v2794_v14 = vpop.f32.mrf.mxu1 }
 0x361   : > { %v2923_v8 = vsub.f32 0.0, %v2803_v10  ;;  %v2795_v21 = vadd.f32 %v5679_v44, %v2794_v14 }
 0x362   : > { %v3450_v37 = vpop.f32.mrf.mxu1 }
 0x363   : > { %v2957_v63 = vmul.f32 1.442695, %v2923_v8  ;;  %v2921_v56 = vsub.f32 0.0, %v2795_v21  ;;  %v2806_v22 = vadd.f32 %v3450_v37, %v5679_v44 }
 0x364   : > { %v2797_v24 = vpop.f32.mrf.mxu1 }
 0x365   : > { %4328 = vpow2.f32 %v2957_v63  ;;  %v2953_v38 = vmul.f32 1.442695, %v2921_v56  ;;  %v2924_v33 = vsub.f32 0.0, %v2806_v22  ;;  %v2798_v32 = vadd.f32 %v5679_v44, %v2797_v24 }
 0x367   : > { %4330 = vpow2.f32 %v2953_v38  ;;  %v2959_v42 = vmul.f32 1.442695, %v2924_v33  ;;  %v2922_v29 = vsub.f32 0.0, %v2798_v32 }
 0x369   : > { %4332 = vpow2.f32 %v2959_v42  ;;  %v2955_v27 = vmul.f32 1.442695, %v2922_v29 }
 0x36a   : > { %v3453_v4 = vpop.f32.mrf.mxu1 }
 0x36b   : > { %4334 = vpow2.f32 %v2955_v27  ;;  %v2819_v41 = vadd.f32 %v3453_v4, %v5679_v44 }
 0x36c   : > { %v2810_v34 = vpop.f32.mrf.mxu1 }
 0x36d   : > { %v2927_v35 = vsub.f32 0.0, %v2819_v41  ;;  %v2811_v30 = vadd.f32 %v5679_v44, %v2810_v34 }
 0x36e   : > { %v3454_v19 = vpop.f32.mrf.mxu1 }
 0x36f   : > { %v2965_v50 = vmul.f32 1.442695, %v2927_v35  ;;  %v2925_v20 = vsub.f32 0.0, %v2811_v30  ;;  %v2822_v0 = vadd.f32 %v3454_v19, %v5679_v44 }
 0x370   : > { %v2813_v46 = vpop.f32.mrf.mxu1 }
 0x371   : > { %4336 = vpow2.f32 %v2965_v50  ;;  %v2961_v47 = vmul.f32 1.442695, %v2925_v20  ;;  %v2928_v49 = vsub.f32 0.0, %v2822_v0  ;;  %v2814_v5 = vadd.f32 %v5679_v44, %v2813_v46 }
 0x372   : > { %v4329_v54 = vpop.eup %4328 }
 0x373   : > { %v3019_v39 = vadd.f32 1.0, %v4329_v54  ;;  %4338 = vpow2.f32 %v2961_v47  ;;  %v2967_v40 = vmul.f32 1.442695, %v2928_v49  ;;  %v2926_v52 = vsub.f32 0.0, %v2814_v5 }
 0x374   : > { %v4331_v51 = vpop.eup %4330 }
 0x375   : > { %4340 = vrcp.f32 %v3019_v39  ;;  %v3017_v57 = vadd.f32 1.0, %v4331_v51  ;;  %v2963_v53 = vmul.f32 1.442695, %v2926_v52 }
 0x376   : > { %v4333_v17 = vpop.eup %4332  ;;  %4342 = vpow2.f32 %v2967_v40  ;;  %v3457_v55 = vpop.f32.mrf.mxu1 }
 0x377   : > { %4344 = vrcp.f32 %v3017_v57  ;;  %v3020_v25 = vadd.f32 1.0, %v4333_v17  ;;  %v2835_v18 = vadd.f32 %v3457_v55, %v5679_v44 }
 0x378   : > { %v4335_v59 = vpop.eup %4334  ;;  %4346 = vpow2.f32 %v2963_v53  ;;  %v2826_v31 = vpop.f32.mrf.mxu1 }
 0x379   : > { %4348 = vrcp.f32 %v3020_v25  ;;  %v3018_v11 = vadd.f32 1.0, %v4335_v59  ;;  %v2931_v13 = vsub.f32 0.0, %v2835_v18  ;;  %v2827_v16 = vadd.f32 %v5679_v44, %v2826_v31 }
 0x37a   : > { %v3458_v23 = vpop.f32.mrf.mxu1 }
 0x37b   : > { %4350 = vrcp.f32 %v3018_v11  ;;  %v2973_v26 = vmul.f32 1.442695, %v2931_v13  ;;  %v2929_v28 = vsub.f32 0.0, %v2827_v16  ;;  %v2838_v6 = vadd.f32 %v3458_v23, %v5679_v44 }
 0x37c   : > { %v2829_v15 = vpop.f32.mrf.mxu1 }
 0x37d   : > { %4352 = vpow2.f32 %v2973_v26  ;;  %v2969_v7 = vmul.f32 1.442695, %v2929_v28  ;;  %v2932_v60 = vsub.f32 0.0, %v2838_v6  ;;  %v2830_v61 = vadd.f32 %v5679_v44, %v2829_v15 }
 0x37e   : > { %v4337_v9 = vpop.eup %4336 }
 0x37f   : > { %v3023_v36 = vadd.f32 1.0, %v4337_v9  ;;  %4354 = vpow2.f32 %v2969_v7  ;;  %v2975_v12 = vmul.f32 1.442695, %v2932_v60  ;;  %v2930_v48 = vsub.f32 0.0, %v2830_v61 }
 0x380   : > { %v4339_v45 = vpop.eup %4338 }
 0x381   : > { %4356 = vrcp.f32 %v3023_v36  ;;  %v3021_v62 = vadd.f32 1.0, %v4339_v45  ;;  %v2971_v2 = vmul.f32 1.442695, %v2930_v48 }
 0x382   : > { %v4341_v3 = vpop.eup %4340  ;;  %4358 = vpow2.f32 %v2975_v12  ;;  %v3461_v58 = vpop.f32.mrf.mxu1 }
 0x383   : > { %v4343_v43 = vpop.eup %4342  ;;  %3084 = vst.msk [vmem:[%s5697_s17 + $0x10] sm:$0xff] %vm3081_vm7, %v4341_v3  ;;  %4360 = vrcp.f32 %v3021_v62  ;;  %v2851_v1 = vadd.f32 %v3461_v58, %v5679_v44 }
 0x384   : > { %v4345_v10 = vpop.eup %4344  ;;  %v3024_v14 = vadd.f32 1.0, %v4343_v43  ;;  %4362 = vpow2.f32 %v2971_v2  ;;  %v2842_v8 = vpop.f32.mrf.mxu1 }
 0x385   : > { %v4347_v21 = vpop.eup %4346  ;;  %3082 = vst.msk [vmem:[%s5697_s17] sm:$0xff] %vm3081_vm7, %v4345_v10  ;;  %v2935_v37 = vsub.f32 0.0, %v2851_v1  ;;  %v2843_v63 = vadd.f32 %v5679_v44, %v2842_v8 }
 0x386   : > { %v4349_v56 = vpop.eup %4348  ;;  %4364 = vrcp.f32 %v3024_v14  ;;  %v3022_v22 = vadd.f32 1.0, %v4347_v21  ;;  %v3462_v24 = vpop.f32.mrf.mxu1 }
 0x387   : > { %3085 = vst.msk [vmem:[%s5697_s17 + $0x18] sm:$0xff] %vm3081_vm7, %v4349_v56  ;;  %v2981_v38 = vmul.f32 1.442695, %v2935_v37  ;;  %v2933_v33 = vsub.f32 0.0, %v2843_v63  ;;  %v2854_v32 = vadd.f32 %v3462_v24, %v5679_v44 }
 0x388   : > { %v4351_v42 = vpop.eup %4350  ;;  %4366 = vrcp.f32 %v3022_v22  ;;  %v2845_v29 = vpop.f32.mrf.mxu1 }
 0x389   : > { %3083 = vst.msk [vmem:[%s5697_s17 + $0x8] sm:$0xff] %vm3081_vm7, %v4351_v42  ;;  %4368 = vpow2.f32 %v2981_v38  ;;  %v2977_v27 = vmul.f32 1.442695, %v2933_v33  ;;  %v2936_v4 = vsub.f32 0.0, %v2854_v32  ;;  %v2846_v41 = vadd.f32 %v5679_v44, %v2845_v29 }
 0x38a   : > { %v4353_v34 = vpop.eup %4352 }
 0x38b   : > { %v3027_v35 = vadd.f32 1.0, %v4353_v34  ;;  %4370 = vpow2.f32 %v2977_v27  ;;  %v2983_v30 = vmul.f32 1.442695, %v2936_v4  ;;  %v2934_v19 = vsub.f32 0.0, %v2846_v41 }
 0x38c   : > { %v4355_v50 = vpop.eup %4354 }
 0x38d   : > { %4372 = vrcp.f32 %v3027_v35  ;;  %v3025_v20 = vadd.f32 1.0, %v4355_v50  ;;  %v2979_v0 = vmul.f32 1.442695, %v2934_v19 }
 0x38e   : > { %v4357_v46 = vpop.eup %4356  ;;  %4374 = vpow2.f32 %v2983_v30  ;;  %v3465_v47 = vpop.f32.mrf.mxu1 }
 0x38f   : > { %v4359_v49 = vpop.eup %4358  ;;  %3088 = vst.msk [vmem:[%s5697_s17 + $0x30] sm:$0xff] %vm3081_vm7, %v4357_v46  ;;  %4376 = vrcp.f32 %v3025_v20  ;;  %v2867_v5 = vadd.f32 %v3465_v47, %v5679_v44 }
 0x390   : > { %v4361_v54 = vpop.eup %4360  ;;  %v3028_v39 = vadd.f32 1.0, %v4359_v49  ;;  %4378 = vpow2.f32 %v2979_v0  ;;  %v2858_v40 = vpop.f32.mrf.mxu1 }
 0x391   : > { %v4363_v52 = vpop.eup %4362  ;;  %3086 = vst.msk [vmem:[%s5697_s17 + $0x20] sm:$0xff] %vm3081_vm7, %v4361_v54  ;;  %v2939_v51 = vsub.f32 0.0, %v2867_v5  ;;  %v2859_v57 = vadd.f32 %v5679_v44, %v2858_v40 }
 0x392   : > { %4380 = vrcp.f32 %v3028_v39  ;;  %v3026_v53 = vadd.f32 1.0, %v4363_v52  ;;  %v3466_v17 = vpop.f32.mrf.mxu1 }
 0x393   : > { %v4365_v55 = vpop.eup %4364  ;;  %v2989_v25 = vmul.f32 1.442695, %v2939_v51  ;;  %v2937_v18 = vsub.f32 0.0, %v2859_v57  ;;  %v2870_v59 = vadd.f32 %v3466_v17, %v5679_v44 }
 0x394   : > { %3089 = vst.msk [vmem:[%s5697_s17 + $0x38] sm:$0xff] %vm3081_vm7, %v4365_v55  ;;  %4382 = vrcp.f32 %v3026_v53  ;;  %v2861_v31 = vpop.f32.mrf.mxu1 }
 0x395   : > { %v4367_v11 = vpop.eup %4366  ;;  %4384 = vpow2.f32 %v2989_v25  ;;  %v2985_v13 = vmul.f32 1.442695, %v2937_v18  ;;  %v2940_v16 = vsub.f32 0.0, %v2870_v59  ;;  %v2862_v23 = vadd.f32 %v5679_v44, %v2861_v31 }
 0x396   : > { %v4369_v26 = vpop.eup %4368  ;;  %3087 = vst.msk [vmem:[%s5697_s17 + $0x28] sm:$0xff] %vm3081_vm7, %v4367_v11  ;;  %v3469_v28 = vpop.f32.mrf.mxu1 }
 0x397   : > { %v3031_v6 = vadd.f32 1.0, %v4369_v26  ;;  %4386 = vpow2.f32 %v2985_v13  ;;  %v2991_v15 = vmul.f32 1.442695, %v2940_v16  ;;  %v2938_v7 = vsub.f32 0.0, %v2862_v23 }
 0x398   : > { %v4371_v60 = vpop.eup %4370  ;;  %v2883_v61 = vadd.f32 %v3469_v28, %v5679_v44  ;;  %v2874_v9 = vpop.f32.mrf.mxu1 }
 0x399   : > { %4388 = vrcp.f32 %v3031_v6  ;;  %v3029_v36 = vadd.f32 1.0, %v4371_v60  ;;  %v2987_v12 = vmul.f32 1.442695, %v2938_v7  ;;  %v2875_v48 = vadd.f32 %v5679_v44, %v2874_v9 }
 0x39a   : > { %v4373_v45 = vpop.eup %4372  ;;  %4390 = vpow2.f32 %v2991_v15  ;;  %v2943_v62 = vsub.f32 0.0, %v2883_v61  ;;  %v3470_v2 = vpop.f32.mrf.mxu1 }
 0x39b   : > { %v4375_v3 = vpop.eup %4374  ;;  %3092 = vst.msk [vmem:[%s5697_s17 + $0x50] sm:$0xff] %vm3081_vm7, %v4373_v45  ;;  %4392 = vrcp.f32 %v3029_v36  ;;  %v2941_v58 = vsub.f32 0.0, %v2875_v48  ;;  %v2886_v43 = vadd.f32 %v3470_v2, %v5679_v44 }
 0x39c   : > { %v4377_v1 = vpop.eup %4376  ;;  %v3032_v10 = vadd.f32 1.0, %v4375_v3  ;;  %4394 = vpow2.f32 %v2987_v12  ;;  %v2997_v14 = vmul.f32 1.442695, %v2943_v62  ;;  %v2877_v8 = vpop.f32.mrf.mxu1 }
 0x39d   : > { %v4379_v21 = vpop.eup %4378  ;;  %3090 = vst.msk [vmem:[%s5697_s17 + $0x40] sm:$0xff] %vm3081_vm7, %v4377_v1  ;;  %v2993_v37 = vmul.f32 1.442695, %v2941_v58  ;;  %v2944_v63 = vsub.f32 0.0, %v2886_v43  ;;  %v2878_v56 = vadd.f32 %v5679_v44, %v2877_v8 }
 0x39e   : > { %4396 = vrcp.f32 %v3032_v10  ;;  %v3030_v22 = vadd.f32 1.0, %v4379_v21  ;;  %v3473_v24 = vpop.f32.mrf.mxu1 }
 0x39f   : > { %v4381_v38 = vpop.eup %4380  ;;  %4398 = vpow2.f32 %v2997_v14  ;;  %v2999_v33 = vmul.f32 1.442695, %v2944_v63  ;;  %v2942_v32 = vsub.f32 0.0, %v2878_v56  ;;  %v2899_v42 = vadd.f32 %v3473_v24, %v5679_v44 }
 0x3a0   : > { %3093 = vst.msk [vmem:[%s5697_s17 + $0x58] sm:$0xff] %vm3081_vm7, %v4381_v38  ;;  %4400 = vrcp.f32 %v3030_v22  ;;  %v2890_v29 = vpop.f32.mrf.mxu1 }
 0x3a1   : > { %v4383_v27 = vpop.eup %4382  ;;  %4402 = vpow2.f32 %v2993_v37  ;;  %v2995_v4 = vmul.f32 1.442695, %v2942_v32  ;;  %v2947_v41 = vsub.f32 0.0, %v2899_v42  ;;  %v2891_v34 = vadd.f32 %v5679_v44, %v2890_v29 }
 0x3a2   : > { %v4385_v35 = vpop.eup %4384  ;;  %3091 = vst.msk [vmem:[%s5697_s17 + $0x48] sm:$0xff] %vm3081_vm7, %v4383_v27  ;;  %4404 = vpow2.f32 %v2999_v33  ;;  %v3474_v30 = vpop.f32.mrf.mxu1 }
 0x3a3   : > { %v3035_v19 = vadd.f32 1.0, %v4385_v35  ;;  %4406 = vpow2.f32 %v2995_v4  ;;  %v3005_v50 = vmul.f32 1.442695, %v2947_v41  ;;  %v2945_v20 = vsub.f32 0.0, %v2891_v34 }
 0x3a4   : > { %v4387_v0 = vpop.eup %4386  ;;  %v2902_v46 = vadd.f32 %v3474_v30, %v5679_v44  ;;  %v2893_v47 = vpop.f32.mrf.mxu1 }
 0x3a5   : > { %4408 = vrcp.f32 %v3035_v19  ;;  %v3033_v49 = vadd.f32 1.0, %v4387_v0  ;;  %v3001_v5 = vmul.f32 1.442695, %v2945_v20  ;;  %v2894_v54 = vadd.f32 %v5679_v44, %v2893_v47 }
 0x3a6   : > { %v4389_v39 = vpop.eup %4388  ;;  %4410 = vpow2.f32 %v3005_v50  ;;  %v2948_v40 = vsub.f32 0.0, %v2902_v46  ;;  %v3477_v52 = vpop.f32.mrf.mxu1 }
 0x3a7   : > { %v4391_v51 = vpop.eup %4390  ;;  %3096 = vst.msk [vmem:[%s5697_s17 + $0x70] sm:$0xff] %vm3081_vm7, %v4389_v39  ;;  %4412 = vrcp.f32 %v3033_v49  ;;  %v2946_v57 = vsub.f32 0.0, %v2894_v54  ;;  %v2915_v53 = vadd.f32 %v3477_v52, %v5679_v44 }
 0x3a8   : > { %v4393_v17 = vpop.eup %4392  ;;  %v3036_v55 = vadd.f32 1.0, %v4391_v51  ;;  %4414 = vpow2.f32 %v3001_v5  ;;  %v3007_v25 = vmul.f32 1.442695, %v2948_v40  ;;  %v2906_v18 = vpop.f32.mrf.mxu1 }
 0x3a9   : > { %v4395_v59 = vpop.eup %4394  ;;  %3094 = vst.msk [vmem:[%s5697_s17 + $0x60] sm:$0xff] %vm3081_vm7, %v4393_v17  ;;  %v3003_v31 = vmul.f32 1.442695, %v2946_v57  ;;  %v2951_v11 = vsub.f32 0.0, %v2915_v53  ;;  %v2907_v13 = vadd.f32 %v5679_v44, %v2906_v18 }
 0x3aa   : > { %4416 = vrcp.f32 %v3036_v55  ;;  %v3034_v16 = vadd.f32 1.0, %v4395_v59  ;;  %v3478_v23 = vpop.f32.mrf.mxu1 }
 0x3ab   : > { %v4397_v26 = vpop.eup %4396  ;;  %4418 = vpow2.f32 %v3007_v25  ;;  %v3013_v28 = vmul.f32 1.442695, %v2951_v11  ;;  %v2949_v6 = vsub.f32 0.0, %v2907_v13  ;;  %v2918_v15 = vadd.f32 %v3478_v23, %v5679_v44 }
 0x3ac   : > { %v4399_v7 = vpop.eup %4398  ;;  %3097 = vst.msk [vmem:[%s5697_s17 + $0x78] sm:$0xff] %vm3081_vm7, %v4397_v26  ;;  %4420 = vrcp.f32 %v3034_v16  ;;  %v2909_v60 = vpop.f32.mrf.mxu1 }
 0x3ad   : > { %v4401_v61 = vpop.eup %4400  ;;  %v3039_v9 = vadd.f32 1.0, %v4399_v7  ;;  %4422 = vpow2.f32 %v3003_v31  ;;  %v3009_v36 = vmul.f32 1.442695, %v2949_v6  ;;  %v2952_v12 = vsub.f32 0.0, %v2918_v15 }
 0x3ae   : > { %v4403_v48 = vpop.eup %4402  ;;  %3095 = vst.msk [vmem:[%s5697_s17 + $0x68] sm:$0xff] %vm3081_vm7, %v4401_v61  ;;  %4424 = vpow2.f32 %v3013_v28  ;;  %v2910_v45 = vadd.f32 %v5679_v44, %v2909_v60 }
 0x3af   : > { %v4405_v62 = vpop.eup %4404  ;;  %4426 = vrcp.f32 %v3039_v9  ;;  %v3037_v2 = vadd.f32 1.0, %v4403_v48  ;;  %v3015_v43 = vmul.f32 1.442695, %v2952_v12 }
 0x3b0   : > { %v4407_v3 = vpop.eup %4406  ;;  %v3040_v58 = vadd.f32 1.0, %v4405_v62  ;;  %4428 = vpow2.f32 %v3009_v36  ;;  %v2950_v1 = vsub.f32 0.0, %v2910_v45 }
 0x3b1   : > { %4430 = vrcp.f32 %v3037_v2  ;;  %v3038_v10 = vadd.f32 1.0, %v4407_v3 }
 0x3b2   : > { %v4409_v14 = vpop.eup %4408  ;;  %4432 = vrcp.f32 %v3040_v58  ;;  %v3011_v8 = vmul.f32 1.442695, %v2950_v1 }
 0x3b3   : > { %v4411_v21 = vpop.eup %4410  ;;  %3100 = vst.msk [vmem:[%s5697_s17 + $0x90] sm:$0xff] %vm3081_vm7, %v4409_v14  ;;  %4434 = vrcp.f32 %v3038_v10 }
 0x3b4   : > { %v4413_v44 = vpop.eup %4412  ;;  %v3043_v37 = vadd.f32 1.0, %v4411_v21  ;;  %4436 = vpow2.f32 %v3015_v43 }
 0x3b5   : > { %v4415_v63 = vpop.eup %4414  ;;  %3098 = vst.msk [vmem:[%s5697_s17 + $0x80] sm:$0xff] %vm3081_vm7, %v4413_v44  ;;  %4438 = vpow2.f32 %v3011_v8 }
 0x3b6   : > { %4440 = vrcp.f32 %v3043_v37  ;;  %v3041_v56 = vadd.f32 1.0, %v4415_v63 }
 0x3b7   : > { %v4417_v22 = vpop.eup %4416 }
 0x3b8   : > { %v4419_v24 = vpop.eup %4418  ;;  %3101 = vst.msk [vmem:[%s5697_s17 + $0x98] sm:$0xff] %vm3081_vm7, %v4417_v22  ;;  %4442 = vrcp.f32 %v3041_v56 }
 0x3b9   : > { %v4421_v38 = vpop.eup %4420  ;;  %v3044_v33 = vadd.f32 1.0, %v4419_v24 }
 0x3ba   : > { %v4423_v32 = vpop.eup %4422  ;;  %3099 = vst.msk [vmem:[%s5697_s17 + $0x88] sm:$0xff] %vm3081_vm7, %v4421_v38 }
 0x3bb   : > { %v4425_v42 = vpop.eup %4424  ;;  %4444 = vrcp.f32 %v3044_v33  ;;  %v3042_v29 = vadd.f32 1.0, %v4423_v32 }
 0x3bc   : > { %v4427_v27 = vpop.eup %4426  ;;  %v3047_v4 = vadd.f32 1.0, %v4425_v42 }
 0x3bd   : > { %v4429_v41 = vpop.eup %4428  ;;  %3104 = vst.msk [vmem:[%s5697_s17 + $0xb0] sm:$0xff] %vm3081_vm7, %v4427_v27  ;;  %4446 = vrcp.f32 %v3042_v29 }
 0x3be   : > { %v4431_v34 = vpop.eup %4430  ;;  %4448 = vrcp.f32 %v3047_v4  ;;  %v3045_v35 = vadd.f32 1.0, %v4429_v41 }
 0x3bf   : > { %v4433_v30 = vpop.eup %4432  ;;  %3102 = vst.msk [vmem:[%s5697_s17 + $0xa0] sm:$0xff] %vm3081_vm7, %v4431_v34 }
 0x3c0   : > { %v4435_v19 = vpop.eup %4434  ;;  %3105 = vst.msk [vmem:[%s5697_s17 + $0xb8] sm:$0xff] %vm3081_vm7, %v4433_v30  ;;  %4450 = vrcp.f32 %v3045_v35 }
 0x3c1   : > { %v4437_v50 = vpop.eup %4436  ;;  %3103 = vst.msk [vmem:[%s5697_s17 + $0xa8] sm:$0xff] %vm3081_vm7, %v4435_v19 }
 0x3c2   : > { %v4439_v20 = vpop.eup %4438  ;;  %v3048_v0 = vadd.f32 1.0, %v4437_v50 }
 0x3c3   : > { %v4441_v46 = vpop.eup %4440  ;;  %v3046_v47 = vadd.f32 1.0, %v4439_v20 }
 0x3c4   : > { %3108 = vst.msk [vmem:[%s5697_s17 + $0xd0] sm:$0xff] %vm3081_vm7, %v4441_v46  ;;  %4452 = vrcp.f32 %v3048_v0 }
 0x3c5   : > { %v4443_v49 = vpop.eup %4442  ;;  %4454 = vrcp.f32 %v3046_v47 }
 0x3c6   : > { %3106 = vst.msk [vmem:[%s5697_s17 + $0xc0] sm:$0xff] %vm3081_vm7, %v4443_v49 }
 0x3c8   : > { %v4445_v5 = vpop.eup %4444 }
 0x3c9   : > { %3109 = vst.msk [vmem:[%s5697_s17 + $0xd8] sm:$0xff] %vm3081_vm7, %v4445_v5 }
 0x3ca   : > { %v4447_v54 = vpop.eup %4446 }
 0x3cb   : > { %v4449_v39 = vpop.eup %4448  ;;  %3107 = vst.msk [vmem:[%s5697_s17 + $0xc8] sm:$0xff] %vm3081_vm7, %v4447_v54 }
 0x3cc   : > { %3112 = vst.msk [vmem:[%s5697_s17 + $0xf0] sm:$0xff] %vm3081_vm7, %v4449_v39 }
 0x3cd   : > { %v4451_v40 = vpop.eup %4450 }
 0x3ce   : > { %3110 = vst.msk [vmem:[%s5697_s17 + $0xe0] sm:$0xff] %vm3081_vm7, %v4451_v40 }
 0x3d1   : > { %v4453_v52 = vpop.eup %4452 }
 0x3d2   : > { %v4455_v51 = vpop.eup %4454  ;;  %3113 = vst.msk [vmem:[%s5697_s17 + $0xf8] sm:$0xff] %vm3081_vm7, %v4453_v52 }
 0x3d3   : > { %3111 = vst.msk [vmem:[%s5697_s17 + $0xe8] sm:$0xff] %vm3081_vm7, %v4455_v51 }
 0x3d4 PF: > { %s15_s18 = sadd.s32 1, %s4462_s18  }
 0x3d5   : > { %p12_p5 = scmp.ge.s32.totalorder %s15_s18, 4  }
 0x3d7   :  { %14 = sbr.rel (!%p12_p5) target bundleno = 1 (0x1), region = 74 }

</bundles_post_ra>
